<compile_context>
chip_gen: v5e
topology: v5e:2x2
jax: 0.10.0
libtpu: 0.0.40
codegen_flags: <defaults>
</compile_context>

<pallas_src>
import math

import jax
import jax.numpy as jnp
from jax.experimental import pallas as pl
from jax.experimental.pallas import tpu as pltpu

# Model dimensions (matching Model1.__init__ with a small input_size)
INPUT_SIZE = 32
LAYER_DIMS = [INPUT_SIZE, 64, 128, 256, 512, 256, 128, 128]  # 7 linear layers
NUM_LAYERS = 7
TILE_M = 256  # rows per batch tile (fills the 256-wide MXU on v6e/v7x)


def _round_up(x, m):
    return ((x + m - 1) // m) * m


def mlp_kernel(x_ref,
               w1, b1, w2, b2, w3, b3, w4, b4, w5, b5, w6, b6, w7, b7,
               o_ref):
    """One batch tile through all 7 fused matmuls.

    Weights are bf16 and VMEM-resident across grid steps (constant block
    index); activations are cast to bf16 only for the MXU dot, while the
    accumulate / bias-add / ReLU stay fp32.
    """
    h = x_ref[...]  # fp32 [TM, INPUT_SIZE]

    def layer(h, w_ref, b_ref, relu=True):
        y = jnp.dot(h.astype(jnp.bfloat16), w_ref[...],
                    preferred_element_type=jnp.float32)
        y = y + b_ref[...]            # fp32 bias-add on the fp32 accumulator
        return jnp.maximum(y, 0.0) if relu else y

    h = layer(h, w1, b1)
    h = layer(h, w2, b2)
    h = layer(h, w3, b3)
    h = layer(h, w4, b4)
    h = layer(h, w5, b5)
    h = layer(h, w6, b6)
    o_ref[...] = layer(h, w7, b7, relu=False).astype(o_ref.dtype)


def init_params(key):
    """PyTorch nn.Linear-style init: U(-1/sqrt(fan_in), 1/sqrt(fan_in)).
    Weights stored [in, out] in bfloat16; biases [1, out] in float32."""
    params = []
    for i in range(NUM_LAYERS):
        fan_in, fan_out = LAYER_DIMS[i], LAYER_DIMS[i + 1]
        key, kw, kb = jax.random.split(key, 3)
        bound = 1.0 / math.sqrt(fan_in)
        w = jax.random.uniform(kw, (fan_in, fan_out), jnp.float32, -bound, bound)
        b = jax.random.uniform(kb, (1, fan_out), jnp.float32, -bound, bound)
        params.append((w.astype(jnp.bfloat16), b))
    return params


def mlp_forward(x, params):
    b_in = x.shape[0]
    # Tile the batch; small batches get a single (8-row-aligned) tile.
    tm = TILE_M if b_in >= TILE_M else _round_up(max(b_in, 1), 8)
    b_pad = _round_up(b_in, tm)
    if b_pad != b_in:
        x = jnp.pad(x, ((0, b_pad - b_in), (0, 0)))
    grid = (b_pad // tm,)

    vmem = pltpu.MemorySpace.VMEM

    # x: tiled over the batch grid axis.
    in_specs = [pl.BlockSpec((tm, LAYER_DIMS[0]), lambda i: (i, 0),
                             memory_space=vmem)]
    flat = []
    for li in range(NUM_LAYERS):
        fin, fout = LAYER_DIMS[li], LAYER_DIMS[li + 1]
        w, b = params[li]
        flat.extend([w, b])
        # Constant block index -> weights/biases DMA'd once, VMEM-resident
        # across all batch-tile grid steps.
        in_specs.append(pl.BlockSpec((fin, fout), lambda i: (0, 0),
                                     memory_space=vmem))
        in_specs.append(pl.BlockSpec((1, fout), lambda i: (0, 0),
                                     memory_space=vmem))
    out_spec = pl.BlockSpec((tm, LAYER_DIMS[-1]), lambda i: (i, 0),
                            memory_space=vmem)

    # Scheduler hint: tiny, HBM-traffic-bound custom call.
    w_elems = sum(LAYER_DIMS[i] * LAYER_DIMS[i + 1] for i in range(NUM_LAYERS))
    b_elems = sum(LAYER_DIMS[i + 1] for i in range(NUM_LAYERS))
    flops = 2 * b_pad * w_elems
    bytes_accessed = (2 * w_elems                    # bf16 weights
                      + 4 * b_elems                  # f32 biases
                      + 4 * b_pad * LAYER_DIMS[0]    # x
                      + 4 * b_pad * LAYER_DIMS[-1])  # out

    out = pl.pallas_call(
        mlp_kernel,
        out_shape=jax.ShapeDtypeStruct((b_pad, LAYER_DIMS[-1]), jnp.float32),
        grid=grid,
        in_specs=in_specs,
        out_specs=out_spec,
        compiler_params=pltpu.CompilerParams(
            dimension_semantics=("parallel",),   # megacore-shard batch tiles
            vmem_limit_bytes=16 << 20,           # working set ~2.5 MB + dbl-buf
        ),
        cost_estimate=pl.CostEstimate(flops=flops, transcendentals=0,
                                      bytes_accessed=bytes_accessed),
    )(x, *flat)
    return out[:b_in]


def mlp_reference(x, params):
    """Same numerics as the kernel: bf16 operands, f32 accumulation/bias/ReLU."""
    h = x
    for i, (w, b) in enumerate(params):
        h = jnp.dot(h.astype(jnp.bfloat16), w,
                    preferred_element_type=jnp.float32) + b
        if i < NUM_LAYERS - 1:
            h = jnp.maximum(h, 0.0)
    return h


if __name__ == "__main__":
    key = jax.random.PRNGKey(0)
    key, kx_big, kx_small = jax.random.split(key, 3)
    params = init_params(key)

    # Multi-tile batch (2 grid steps of 256 rows) — exercises weight residency
    # across grid steps and the parallel batch axis.
    x_big = jax.random.normal(kx_big, (512, INPUT_SIZE), jnp.float32)
    out_big = jax.block_until_ready(mlp_forward(x_big, params))
    ref_big = mlp_reference(x_big, params)
    assert out_big.shape == (512, LAYER_DIMS[-1])
    assert jnp.allclose(out_big, ref_big, atol=1e-3, rtol=1e-3), "mismatch (B=512)"

    # Small batch (padding path, single 8-row tile).
    x_small = jax.random.normal(kx_small, (8, INPUT_SIZE), jnp.float32)
    out_small = jax.block_until_ready(mlp_forward(x_small, params))
    ref_small = mlp_reference(x_small, params)
    assert out_small.shape == (8, LAYER_DIMS[-1])
    assert jnp.allclose(out_small, ref_small, atol=1e-3, rtol=1e-3), "mismatch (B=8)"

    print("KERNEL_OK")
</pallas_src>

<mosaic_0001>
module attributes {stable_mosaic.version = 11 : i64} {
  func.func @mlp_kernel(%arg0: i32, %arg1: memref<256x32xf32, #tpu.memory_space<vmem>>, %arg2: memref<32x64xbf16, #tpu.memory_space<vmem>>, %arg3: memref<1x64xf32, #tpu.memory_space<vmem>>, %arg4: memref<64x128xbf16, #tpu.memory_space<vmem>>, %arg5: memref<1x128xf32, #tpu.memory_space<vmem>>, %arg6: memref<128x256xbf16, #tpu.memory_space<vmem>>, %arg7: memref<1x256xf32, #tpu.memory_space<vmem>>, %arg8: memref<256x512xbf16, #tpu.memory_space<vmem>>, %arg9: memref<1x512xf32, #tpu.memory_space<vmem>>, %arg10: memref<512x256xbf16, #tpu.memory_space<vmem>>, %arg11: memref<1x256xf32, #tpu.memory_space<vmem>>, %arg12: memref<256x128xbf16, #tpu.memory_space<vmem>>, %arg13: memref<1x128xf32, #tpu.memory_space<vmem>>, %arg14: memref<128x128xbf16, #tpu.memory_space<vmem>>, %arg15: memref<1x128xf32, #tpu.memory_space<vmem>>, %arg16: memref<256x128xf32, #tpu.memory_space<vmem>>) attributes {dimension_semantics = [#tpu.dimension_semantics<parallel>], iteration_bounds = array<i64: 2>, scalar_prefetch = 0 : i64, scratch_operands = 0 : i64, tpu.core_type = #tpu.core_type<tc>, window_params = [{transform_indices = @transform_0, window_bounds = array<i64: 256, 32>}, {pipeline_mode = #tpu.pipeline_mode<synchronous>, transform_indices = @transform_1, window_bounds = array<i64: 32, 64>}, {pipeline_mode = #tpu.pipeline_mode<synchronous>, transform_indices = @transform_2, window_bounds = array<i64: 1, 64>}, {pipeline_mode = #tpu.pipeline_mode<synchronous>, transform_indices = @transform_3, window_bounds = array<i64: 64, 128>}, {pipeline_mode = #tpu.pipeline_mode<synchronous>, transform_indices = @transform_4, window_bounds = array<i64: 1, 128>}, {pipeline_mode = #tpu.pipeline_mode<synchronous>, transform_indices = @transform_5, window_bounds = array<i64: 128, 256>}, {pipeline_mode = #tpu.pipeline_mode<synchronous>, transform_indices = @transform_6, window_bounds = array<i64: 1, 256>}, {pipeline_mode = #tpu.pipeline_mode<synchronous>, transform_indices = @transform_7, window_bounds = array<i64: 256, 512>}, {pipeline_mode = #tpu.pipeline_mode<synchronous>, transform_indices = @transform_8, window_bounds = array<i64: 1, 512>}, {pipeline_mode = #tpu.pipeline_mode<synchronous>, transform_indices = @transform_9, window_bounds = array<i64: 512, 256>}, {pipeline_mode = #tpu.pipeline_mode<synchronous>, transform_indices = @transform_10, window_bounds = array<i64: 1, 256>}, {pipeline_mode = #tpu.pipeline_mode<synchronous>, transform_indices = @transform_11, window_bounds = array<i64: 256, 128>}, {pipeline_mode = #tpu.pipeline_mode<synchronous>, transform_indices = @transform_12, window_bounds = array<i64: 1, 128>}, {pipeline_mode = #tpu.pipeline_mode<synchronous>, transform_indices = @transform_13, window_bounds = array<i64: 128, 128>}, {pipeline_mode = #tpu.pipeline_mode<synchronous>, transform_indices = @transform_14, window_bounds = array<i64: 1, 128>}, {transform_indices = @transform_15, window_bounds = array<i64: 256, 128>}]} {
    %c0 = arith.constant 0 : index
    %c0_0 = arith.constant 0 : index
    %0 = vector.load %arg1[%c0, %c0_0] : memref<256x32xf32, #tpu.memory_space<vmem>>, vector<256x32xf32>
    %1 = arith.truncf %0 : vector<256x32xf32> to vector<256x32xbf16>
    %c0_1 = arith.constant 0 : index
    %c0_2 = arith.constant 0 : index
    %2 = vector.load %arg2[%c0_1, %c0_2] : memref<32x64xbf16, #tpu.memory_space<vmem>>, vector<32x64xbf16>
    %cst = arith.constant dense<0.000000e+00> : vector<256x64xf32>
    %3 = tpu.matmul %1, %2, %cst {dimension_numbers = #tpu.dot_dimension_numbers<[1], [0], [0], [1], [0, 0, 1, 1], [], []>} : vector<256x32xbf16>, vector<32x64xbf16>, vector<256x64xf32> -> vector<256x64xf32>
    %c0_3 = arith.constant 0 : index
    %c0_4 = arith.constant 0 : index
    %4 = vector.load %arg3[%c0_3, %c0_4] : memref<1x64xf32, #tpu.memory_space<vmem>>, vector<1x64xf32>
    %5 = vector.broadcast %4 : vector<1x64xf32> to vector<256x64xf32>
    %6 = arith.addf %3, %5 : vector<256x64xf32>
    %cst_5 = arith.constant 0.000000e+00 : f32
    %7 = vector.broadcast %cst_5 : f32 to vector<256x64xf32>
    %8 = arith.maximumf %6, %7 : vector<256x64xf32>
    %9 = arith.truncf %8 : vector<256x64xf32> to vector<256x64xbf16>
    %c0_6 = arith.constant 0 : index
    %c0_7 = arith.constant 0 : index
    %10 = vector.load %arg4[%c0_6, %c0_7] : memref<64x128xbf16, #tpu.memory_space<vmem>>, vector<64x128xbf16>
    %cst_8 = arith.constant dense<0.000000e+00> : vector<256x128xf32>
    %11 = tpu.matmul %9, %10, %cst_8 {dimension_numbers = #tpu.dot_dimension_numbers<[1], [0], [0], [1], [0, 0, 1, 1], [], []>} : vector<256x64xbf16>, vector<64x128xbf16>, vector<256x128xf32> -> vector<256x128xf32>
    %c0_9 = arith.constant 0 : index
    %c0_10 = arith.constant 0 : index
    %12 = vector.load %arg5[%c0_9, %c0_10] : memref<1x128xf32, #tpu.memory_space<vmem>>, vector<1x128xf32>
    %13 = vector.broadcast %12 : vector<1x128xf32> to vector<256x128xf32>
    %14 = arith.addf %11, %13 : vector<256x128xf32>
    %cst_11 = arith.constant 0.000000e+00 : f32
    %15 = vector.broadcast %cst_11 : f32 to vector<256x128xf32>
    %16 = arith.maximumf %14, %15 : vector<256x128xf32>
    %17 = arith.truncf %16 : vector<256x128xf32> to vector<256x128xbf16>
    %c0_12 = arith.constant 0 : index
    %c0_13 = arith.constant 0 : index
    %18 = vector.load %arg6[%c0_12, %c0_13] : memref<128x256xbf16, #tpu.memory_space<vmem>>, vector<128x256xbf16>
    %cst_14 = arith.constant dense<0.000000e+00> : vector<256x256xf32>
    %19 = tpu.matmul %17, %18, %cst_14 {dimension_numbers = #tpu.dot_dimension_numbers<[1], [0], [0], [1], [0, 0, 1, 1], [], []>} : vector<256x128xbf16>, vector<128x256xbf16>, vector<256x256xf32> -> vector<256x256xf32>
    %c0_15 = arith.constant 0 : index
    %c0_16 = arith.constant 0 : index
    %20 = vector.load %arg7[%c0_15, %c0_16] : memref<1x256xf32, #tpu.memory_space<vmem>>, vector<1x256xf32>
    %21 = vector.broadcast %20 : vector<1x256xf32> to vector<256x256xf32>
    %22 = arith.addf %19, %21 : vector<256x256xf32>
    %cst_17 = arith.constant 0.000000e+00 : f32
    %23 = vector.broadcast %cst_17 : f32 to vector<256x256xf32>
    %24 = arith.maximumf %22, %23 : vector<256x256xf32>
    %25 = arith.truncf %24 : vector<256x256xf32> to vector<256x256xbf16>
    %c0_18 = arith.constant 0 : index
    %c0_19 = arith.constant 0 : index
    %26 = vector.load %arg8[%c0_18, %c0_19] : memref<256x512xbf16, #tpu.memory_space<vmem>>, vector<256x512xbf16>
    %cst_20 = arith.constant dense<0.000000e+00> : vector<256x512xf32>
    %27 = tpu.matmul %25, %26, %cst_20 {dimension_numbers = #tpu.dot_dimension_numbers<[1], [0], [0], [1], [0, 0, 1, 1], [], []>} : vector<256x256xbf16>, vector<256x512xbf16>, vector<256x512xf32> -> vector<256x512xf32>
    %c0_21 = arith.constant 0 : index
    %c0_22 = arith.constant 0 : index
    %28 = vector.load %arg9[%c0_21, %c0_22] : memref<1x512xf32, #tpu.memory_space<vmem>>, vector<1x512xf32>
    %29 = vector.broadcast %28 : vector<1x512xf32> to vector<256x512xf32>
    %30 = arith.addf %27, %29 : vector<256x512xf32>
    %cst_23 = arith.constant 0.000000e+00 : f32
    %31 = vector.broadcast %cst_23 : f32 to vector<256x512xf32>
    %32 = arith.maximumf %30, %31 : vector<256x512xf32>
    %33 = arith.truncf %32 : vector<256x512xf32> to vector<256x512xbf16>
    %c0_24 = arith.constant 0 : index
    %c0_25 = arith.constant 0 : index
    %34 = vector.load %arg10[%c0_24, %c0_25] : memref<512x256xbf16, #tpu.memory_space<vmem>>, vector<512x256xbf16>
    %cst_26 = arith.constant dense<0.000000e+00> : vector<256x256xf32>
    %35 = tpu.matmul %33, %34, %cst_26 {dimension_numbers = #tpu.dot_dimension_numbers<[1], [0], [0], [1], [0, 0, 1, 1], [], []>} : vector<256x512xbf16>, vector<512x256xbf16>, vector<256x256xf32> -> vector<256x256xf32>
    %c0_27 = arith.constant 0 : index
    %c0_28 = arith.constant 0 : index
    %36 = vector.load %arg11[%c0_27, %c0_28] : memref<1x256xf32, #tpu.memory_space<vmem>>, vector<1x256xf32>
    %37 = vector.broadcast %36 : vector<1x256xf32> to vector<256x256xf32>
    %38 = arith.addf %35, %37 : vector<256x256xf32>
    %cst_29 = arith.constant 0.000000e+00 : f32
    %39 = vector.broadcast %cst_29 : f32 to vector<256x256xf32>
    %40 = arith.maximumf %38, %39 : vector<256x256xf32>
    %41 = arith.truncf %40 : vector<256x256xf32> to vector<256x256xbf16>
    %c0_30 = arith.constant 0 : index
    %c0_31 = arith.constant 0 : index
    %42 = vector.load %arg12[%c0_30, %c0_31] : memref<256x128xbf16, #tpu.memory_space<vmem>>, vector<256x128xbf16>
    %cst_32 = arith.constant dense<0.000000e+00> : vector<256x128xf32>
    %43 = tpu.matmul %41, %42, %cst_32 {dimension_numbers = #tpu.dot_dimension_numbers<[1], [0], [0], [1], [0, 0, 1, 1], [], []>} : vector<256x256xbf16>, vector<256x128xbf16>, vector<256x128xf32> -> vector<256x128xf32>
    %c0_33 = arith.constant 0 : index
    %c0_34 = arith.constant 0 : index
    %44 = vector.load %arg13[%c0_33, %c0_34] : memref<1x128xf32, #tpu.memory_space<vmem>>, vector<1x128xf32>
    %45 = vector.broadcast %44 : vector<1x128xf32> to vector<256x128xf32>
    %46 = arith.addf %43, %45 : vector<256x128xf32>
    %cst_35 = arith.constant 0.000000e+00 : f32
    %47 = vector.broadcast %cst_35 : f32 to vector<256x128xf32>
    %48 = arith.maximumf %46, %47 : vector<256x128xf32>
    %49 = arith.truncf %48 : vector<256x128xf32> to vector<256x128xbf16>
    %c0_36 = arith.constant 0 : index
    %c0_37 = arith.constant 0 : index
    %50 = vector.load %arg14[%c0_36, %c0_37] : memref<128x128xbf16, #tpu.memory_space<vmem>>, vector<128x128xbf16>
    %cst_38 = arith.constant dense<0.000000e+00> : vector<256x128xf32>
    %51 = tpu.matmul %49, %50, %cst_38 {dimension_numbers = #tpu.dot_dimension_numbers<[1], [0], [0], [1], [0, 0, 1, 1], [], []>} : vector<256x128xbf16>, vector<128x128xbf16>, vector<256x128xf32> -> vector<256x128xf32>
    %c0_39 = arith.constant 0 : index
    %c0_40 = arith.constant 0 : index
    %52 = vector.load %arg15[%c0_39, %c0_40] : memref<1x128xf32, #tpu.memory_space<vmem>>, vector<1x128xf32>
    %53 = vector.broadcast %52 : vector<1x128xf32> to vector<256x128xf32>
    %54 = arith.addf %51, %53 : vector<256x128xf32>
    %c0_41 = arith.constant 0 : index
    %c0_42 = arith.constant 0 : index
    %55 = vector.load %arg16[%c0_41, %c0_42] : memref<256x128xf32, #tpu.memory_space<vmem>>, vector<256x128xf32>
    tpu.vector_store %arg16[%c0_41, %c0_42], %54 {strides = array<i32>} : memref<256x128xf32, #tpu.memory_space<vmem>>, vector<256x128xf32>,
    return
  }
  func.func @transform_0(%arg0: i32) -> (i32, i32) {
    %c0_i32 = arith.constant 0 : i32
    %c0_i32_0 = arith.constant 0 : i32
    return %arg0, %c0_i32 : i32, i32
  }
  func.func @transform_1(%arg0: i32) -> (i32, i32) {
    %c0_i32 = arith.constant 0 : i32
    %c0_i32_0 = arith.constant 0 : i32
    %c0_i32_1 = arith.constant 0 : i32
    return %c0_i32, %c0_i32_0 : i32, i32
  }
  func.func @transform_2(%arg0: i32) -> (i32, i32) {
    %c0_i32 = arith.constant 0 : i32
    %c0_i32_0 = arith.constant 0 : i32
    %c0_i32_1 = arith.constant 0 : i32
    return %c0_i32, %c0_i32_0 : i32, i32
  }
  func.func @transform_3(%arg0: i32) -> (i32, i32) {
    %c0_i32 = arith.constant 0 : i32
    %c0_i32_0 = arith.constant 0 : i32
    %c0_i32_1 = arith.constant 0 : i32
    return %c0_i32, %c0_i32_0 : i32, i32
  }
  func.func @transform_4(%arg0: i32) -> (i32, i32) {
    %c0_i32 = arith.constant 0 : i32
    %c0_i32_0 = arith.constant 0 : i32
    %c0_i32_1 = arith.constant 0 : i32
    return %c0_i32, %c0_i32_0 : i32, i32
  }
  func.func @transform_5(%arg0: i32) -> (i32, i32) {
    %c0_i32 = arith.constant 0 : i32
    %c0_i32_0 = arith.constant 0 : i32
    %c0_i32_1 = arith.constant 0 : i32
    return %c0_i32, %c0_i32_0 : i32, i32
  }
  func.func @transform_6(%arg0: i32) -> (i32, i32) {
    %c0_i32 = arith.constant 0 : i32
    %c0_i32_0 = arith.constant 0 : i32
    %c0_i32_1 = arith.constant 0 : i32
    return %c0_i32, %c0_i32_0 : i32, i32
  }
  func.func @transform_7(%arg0: i32) -> (i32, i32) {
    %c0_i32 = arith.constant 0 : i32
    %c0_i32_0 = arith.constant 0 : i32
    %c0_i32_1 = arith.constant 0 : i32
    return %c0_i32, %c0_i32_0 : i32, i32
  }
  func.func @transform_8(%arg0: i32) -> (i32, i32) {
    %c0_i32 = arith.constant 0 : i32
    %c0_i32_0 = arith.constant 0 : i32
    %c0_i32_1 = arith.constant 0 : i32
    return %c0_i32, %c0_i32_0 : i32, i32
  }
  func.func @transform_9(%arg0: i32) -> (i32, i32) {
    %c0_i32 = arith.constant 0 : i32
    %c0_i32_0 = arith.constant 0 : i32
    %c0_i32_1 = arith.constant 0 : i32
    return %c0_i32, %c0_i32_0 : i32, i32
  }
  func.func @transform_10(%arg0: i32) -> (i32, i32) {
    %c0_i32 = arith.constant 0 : i32
    %c0_i32_0 = arith.constant 0 : i32
    %c0_i32_1 = arith.constant 0 : i32
    return %c0_i32, %c0_i32_0 : i32, i32
  }
  func.func @transform_11(%arg0: i32) -> (i32, i32) {
    %c0_i32 = arith.constant 0 : i32
    %c0_i32_0 = arith.constant 0 : i32
    %c0_i32_1 = arith.constant 0 : i32
    return %c0_i32, %c0_i32_0 : i32, i32
  }
  func.func @transform_12(%arg0: i32) -> (i32, i32) {
    %c0_i32 = arith.constant 0 : i32
    %c0_i32_0 = arith.constant 0 : i32
    %c0_i32_1 = arith.constant 0 : i32
    return %c0_i32, %c0_i32_0 : i32, i32
  }
  func.func @transform_13(%arg0: i32) -> (i32, i32) {
    %c0_i32 = arith.constant 0 : i32
    %c0_i32_0 = arith.constant 0 : i32
    %c0_i32_1 = arith.constant 0 : i32
    return %c0_i32, %c0_i32_0 : i32, i32
  }
  func.func @transform_14(%arg0: i32) -> (i32, i32) {
    %c0_i32 = arith.constant 0 : i32
    %c0_i32_0 = arith.constant 0 : i32
    %c0_i32_1 = arith.constant 0 : i32
    return %c0_i32, %c0_i32_0 : i32, i32
  }
  func.func @transform_15(%arg0: i32) -> (i32, i32) {
    %c0_i32 = arith.constant 0 : i32
    %c0_i32_0 = arith.constant 0 : i32
    return %arg0, %c0_i32 : i32, i32
  }
}

</mosaic_0001>

<bundles_post_ra>
// kernel: tpu_custom_call.1
= control target key start
LH: loop header
LB: loop body
LE: loop exit
PB: predicated region body
PF: predicated region fallthrough
CT: control target
= control target key end

     0   :  { %s8885_s0 = inlined_call_operand.vmem [shape: f32[512,32], index: 0, kind: input, shape index: {}]   ;;  %s8886_s1 = inlined_call_operand.hbm [shape: bf16[32,64], index: 1, kind: input, shape index: {}]   ;;  %s8887_s2 = inlined_call_operand.hbm [shape: f32[1,64], index: 2, kind: input, shape index: {}]   ;;  %s8888_s3 = inlined_call_operand.hbm [shape: bf16[64,128], index: 3, kind: input, shape index: {}]   ;;  %s8889_s4 = inlined_call_operand.hbm [shape: f32[1,128], index: 4, kind: input, shape index: {}]   ;;  %s8890_s5 = inlined_call_operand.vmem [shape: bf16[128,256], index: 5, kind: input, shape index: {}]   ;;  %s8891_s6 = inlined_call_operand.vmem [shape: f32[1,256], index: 6, kind: input, shape index: {}]   ;;  %s8892_s7 = inlined_call_operand.vmem [shape: bf16[256,512], index: 7, kind: input, shape index: {}]   ;;  %s8893_s8 = inlined_call_operand.vmem [shape: f32[1,512], index: 8, kind: input, shape index: {}]   ;;  %s8894_s9 = inlined_call_operand.hbm [shape: bf16[512,256], index: 9, kind: input, shape index: {}]   ;;  %s8895_s10 = inlined_call_operand.hbm [shape: f32[1,256], index: 10, kind: input, shape index: {}]   ;;  %s8896_s11 = inlined_call_operand.hbm [shape: bf16[256,128], index: 11, kind: input, shape index: {}]   ;;  %s8897_s12 = inlined_call_operand.hbm [shape: f32[1,128], index: 12, kind: input, shape index: {}]   ;;  %s8898_s13 = inlined_call_operand.hbm [shape: bf16[128,128], index: 13, kind: input, shape index: {}]   ;;  %s8899_s14 = inlined_call_operand.vmem [shape: f32[1,128], index: 14, kind: input, shape index: {}]   ;;  %s8900_s15 = inlined_call_operand.hbm [shape: f32[512,128], index: 15, kind: output, shape index: {}]  }
   0x1   :  { %8963 = sst [smem:[#allocation106_spill]] %s8886_s1 }
   0x2   :  { %8964 = sst [smem:[#allocation107_spill]] %s8887_s2 }
   0x3   :  { %8965 = sst [smem:[#allocation108_spill]] %s8888_s3 }
   0x4   :  { %8966 = sst [smem:[#allocation109_spill]] %s8889_s4 }
   0x5   :  { %8967 = sst [smem:[#allocation110_spill]] %s8894_s9 }
   0x6   :  { %8968 = sst [smem:[#allocation111_spill]] %s8895_s10 }
   0x7   :  { %8969 = sst [smem:[#allocation112_spill]] %s8900_s15 }
   0x8   :  { %20 = vsyncpa [#allocation3], 0 }
   0x9   :  { %21 = vsyncpa [#allocation6], 0 }
   0xa   :  { %22 = vsyncpa [#allocation9], 0 }
   0xb   :  { %23 = vsyncpa [#allocation12], 0 }
   0xc   :  { %24 = vsyncpa [#allocation15], 0 }
   0xd   :  { %25 = vsyncpa [#allocation4], 0 }
   0xe   :  { %27 = vsyncpa [#allocation4 + $0x1], 0  ;;  %s6244_s18 = smov 0   ;;  %s6246_s19 = smov 0  }
   0xf   :  { %s6248_s20 = smov 0   ;;  %s6250_s21 = smov 0  }
  0x10 LB: > { %8970 = sst [smem:[#allocation24_spill]] %s6135_s18  ;;  %s6265_s22 = sadd.s32 4294967295, %s6147_s21   ;;  %s6147_s21 = sphi %s6250_s21, %s9367_s21   ;;  %s6143_s20 = sphi %s6248_s20, %s9369_s20   ;;  %s6139_s19 = sphi %s6246_s19, %s9371_s19   ;;  %s6135_s18 = sphi %s6244_s18, %s9370_s18  }
  0x11   : > { %8971 = sst [smem:[#allocation25_spill]] %s6143_s20  ;;  %s4699_s23 = sadd.s32 4294967294, %s6147_s21  }
  0x12   : > { %8972 = sst [smem:[#allocation26_spill]] %s6147_s21  ;;  %s6269_s24 = sadd.s32 1, %s6147_s21  }
  0x13   : > { %8973 = sst [smem:[#allocation27_spill]] %s6269_s24  ;;  %s360_s25 = sadd.s32 1, %s6143_s20 }
  0x14   : > { %s357_s26 = ssub.s32 %s6147_s21, %s6269_s24  ;;  %p370_p0 = scmp.ne.s32.totalorder %s6143_s20, %s6139_s19 }
  0x15   : > { %p358_p1 = scmp.eq.s32.totalorder %s357_s26, 0  ;;  %p371_p2 = scmp.eq.s32.totalorder %s6265_s22, 1 }
  0x16   : > { %p376_p3 = scmp.ne.s32.totalorder %s6139_s19, %s6135_s18  ;;  %p377_p4 = scmp.eq.s32.totalorder %s4699_s23, 1 }
  0x17   : > { %s6280_s27 = scalar_select %p358_p1, %s6143_s20, %s360_s25  }
  0x18   : > { %p6282_p5 = por %p371_p2, %p370_p0  ;;  %p6286_p6 = por %p377_p4, %p376_p3 }
  0x19   : > { %8974 = sst [smem:[#allocation28_spill]] %s6280_s27  ;;  %p4700_p7 = scmp.ge.s32.totalorder %s6147_s21, 1 }
  0x1a   : > { %s8976_s29 = scalar_select %p6286_p6, 1, 0 }
  0x1b   : > { %p384_p8 = scmp.lt.s32.totalorder %s6147_s21, 3  ;;  %p5724_p9 = scmp.eq.s32.totalorder %s6265_s22, 0 }
  0x1c   : > { %8977 = sst [smem:[#allocation29_spill]] %s8976_s29  ;;  %s6149_s25 = smov [#allocation5]  }
  0x1d   : > { %p6293_p10 = pnand %p4700_p7, %p384_p8  ;;  %s8979_s2 = sld [smem:[#allocation107_spill]] }
  0x1e   : > { %s412_s26 = sshll.u32 %s6149_s25, 4  ;;  %s8980_s4 = sld [smem:[#allocation109_spill]]  ;;  %s413_s26 = int_to_ptr.vmem [resolvable:$true] %s412_s26 }
  0x1f   : > { %p5692_p11 = pneg %p6293_p10  ;;  %s8982_s10 = sld [smem:[#allocation111_spill]] }
  0x20   : > { %s6150_s18 = smov [#allocation8]   ;;  %s6151_s21 = smov [#allocation11]  }
  0x21   : > { %p6307_p12 = pnand %p5724_p9, %p5692_p11  ;;  %s438_s25 = sshll.u32 %s6150_s18, 4  ;;  %s439_s25 = int_to_ptr.vmem [resolvable:$true] %s438_s25 }
  0x22   : > { %s476_s15 = sshll.u32 %s6151_s21, 4  ;;  %s6152_s16 = smov [#allocation14]   ;;  %s477_s15 = int_to_ptr.vmem [resolvable:$true] %s476_s15 }
  0x23   : > { %s410_s23 = sshll.u32 %s8979_s2, 4  ;;  %s502_s18 = sshll.u32 %s6152_s16, 4  ;;  %s411_s23 = int_to_ptr.hbm [resolvable:$true] %s410_s23  ;;  %s503_s18 = int_to_ptr.vmem [resolvable:$true] %s502_s18 }
  0x24   : > { %s436_s24 = sshll.u32 %s8980_s4, 4  ;;  %s500_s4 = sshll.u32 %s8897_s12, 4  ;;  %s437_s24 = int_to_ptr.hbm [resolvable:$true] %s436_s24  ;;  %s501_s4 = int_to_ptr.hbm [resolvable:$true] %s500_s4 }
  0x25   : > { %s474_s2 = sshll.u32 %s8982_s10, 4  ;;  %s8983_s1 = sld [smem:[#allocation106_spill]]  ;;  %s475_s2 = int_to_ptr.hbm [resolvable:$true] %s474_s2 }
  0x26   : > { %5698 = dma.hbm_to_vmem [thread:$0]  (!%p6307_p12), %s411_s23, 16, %s413_s26, [#allocation6]  }
  0x27   : > { %5704 = dma.hbm_to_vmem [thread:$0]  (!%p6307_p12), %s437_s24, 16, %s439_s25, [#allocation9]  }
  0x28   : > { %5710 = dma.hbm_to_vmem [thread:$0]  (!%p6307_p12), %s475_s2, 32, %s477_s15, [#allocation12]  }
  0x29   : > { %5716 = dma.hbm_to_vmem [thread:$0]  (!%p6307_p12), %s501_s4, 16, %s503_s18, [#allocation15]  }
  0x2a   : > { %s6153_s24 = smov [#allocation2]   ;;  %s8984_s3 = sld [smem:[#allocation108_spill]] }
  0x2b   : > { %s395_s23 = sshll.u32 %s8983_s1, 4  ;;  %s397_s26 = sshll.u32 %s6153_s24, 4  ;;  %s396_s23 = int_to_ptr.hbm [resolvable:$true] %s395_s23  ;;  %s398_s26 = int_to_ptr.vmem [resolvable:$true] %s397_s26 }
  0x2c   : > { %s6154_s27 = smov 64   ;;  %s6155_s2 = smov 4  }
  0x2d   : > { %5695 = dma.hbm_to_vmem [thread:$0]  (!%p6307_p12), %s396_s23, 256, %s398_s26, [#allocation3], %s6154_s27, %s6154_s27, %s6155_s2  }
  0x2e   : > { %s6156_s10 = smov [#allocation7]   ;;  %s8985_s9 = sld [smem:[#allocation110_spill]] }
  0x2f   : > { %s423_s15 = sshll.u32 %s6156_s10, 4  ;;  %s6157_s17 = smov [#allocation10]   ;;  %s424_s15 = int_to_ptr.vmem [resolvable:$true] %s423_s15 }
  0x30   : > { %s421_s20 = sshll.u32 %s8984_s3, 4  ;;  %s461_s24 = sshll.u32 %s6157_s17, 4  ;;  %s422_s20 = int_to_ptr.hbm [resolvable:$true] %s421_s20  ;;  %s462_s24 = int_to_ptr.vmem [resolvable:$true] %s461_s24 }
  0x31   : > { %5701 = dma.hbm_to_vmem [thread:$0]  (!%p6307_p12), %s422_s20, 512, %s424_s15, [#allocation6], %s6154_s27, %s6154_s27, %s6155_s2  }
  0x32   : > { %s485_s21 = sshll.u32 %s8896_s11, 4  ;;  %s6158_s25 = smov 128   ;;  %s486_s21 = int_to_ptr.hbm [resolvable:$true] %s485_s21 }
  0x33   : > { %s6159_s10 = smov 8   ;;  %s6160_s16 = smov [#allocation13]  }
  0x34   : > { %s459_s18 = sshll.u32 %s8985_s9, 4  ;;  %s487_s4 = sshll.u32 %s6160_s16, 4  ;;  %s460_s18 = int_to_ptr.hbm [resolvable:$true] %s459_s18  ;;  %s488_s4 = int_to_ptr.vmem [resolvable:$true] %s487_s4 }
  0x35   : > { %5707 = dma.hbm_to_vmem [thread:$0]  (!%p6307_p12), %s460_s18, 8192, %s462_s24, [#allocation9], %s6158_s25, %s6158_s25, %s6159_s10  }
  0x36   : > { %s511_s9 = sshll.u32 %s8898_s13, 4  ;;  %s6161_s20 = smov [#allocation16]   ;;  %s512_s9 = int_to_ptr.hbm [resolvable:$true] %s511_s9 }
  0x37   : > { %5713 = dma.hbm_to_vmem [thread:$0]  (!%p6307_p12), %s486_s21, 2048, %s488_s4, [#allocation12], %s6154_s27, %s6154_s27, %s6155_s2  }
  0x38   : > { %s513_s15 = sshll.u32 %s6161_s20, 4  ;;  %541 = sbr.rel (%p6293_p10) target bundleno = 2317 (0x90d), region = 80  ;;  %s514_s15 = int_to_ptr.vmem [resolvable:$true] %s513_s15 }
  0x39   : > { %5719 = dma.hbm_to_vmem [thread:$0]  (!%p6307_p12), %s512_s9, 1024, %s514_s15, [#allocation15], %s6154_s27, %s6154_s27, %s6155_s2  }
  0x3d   : > { %6110 = dma.done.wait (%p5724_p9), [#allocation3], 256  }
  0x3e   : > { %6112 = vsyncadd (%p5724_p9), [#allocation3], 4294967040 }
  0x3f   : > { %6114 = dma.done.wait (%p5724_p9), [#allocation6], 528  }
  0x40   : > { %6116 = vsyncadd (%p5724_p9), [#allocation6], 4294966768 }
  0x41   : > { %6118 = dma.done.wait (%p5724_p9), [#allocation9], 8208  }
  0x42   : > { %6120 = vsyncadd (%p5724_p9), [#allocation9], 4294959088 }
  0x43   : > { %6122 = dma.done.wait (%p5724_p9), [#allocation12], 2080  }
  0x44   : > { %6124 = vsyncadd (%p5724_p9), [#allocation12], 4294965216 }
  0x45   : > { %6126 = dma.done.wait (%p5724_p9), [#allocation15], 1040  }
  0x46   : > { %6128 = vsyncadd (%p5724_p9), [#allocation15], 4294966256  ;;  %s4722_s1 = sshll.u32 %s6265_s22, 5  ;;  %v5458_v0 = vld [vmem:[#allocation2 + $0x8] sm:$0xff]  ;;  %v5457_v1 = vld [vmem:[#allocation2] sm:$0xff]  ;;  %vm706_vm0 = vcmask 261120  }
  0x47   : > { %p631_p13 = scmp.lt.s32.totalorder %s4722_s1, 63  ;;  %761 = vmatpush.bf16.msra.mxu0 %v5458_v0  ;;  %5632 = vmatpush.bf16.msra.mxu3 %v5458_v0  ;;  %v5462_v22 = vld [vmem:[#allocation7 + $0x18] sm:$0xff]  ;;  %v5461_v24 = vld [vmem:[#allocation7 + $0x10] sm:$0xff]  ;;  %v5460_v25 = vld [vmem:[#allocation7 + $0x8] sm:$0xff]  ;;  %vm928_vm1 = vcmask 523264   ;;  %s627_s17 = sand.u32 1, %s6139_s19  }
  0x48   : > { %981 = vmatpush.bf16.msra.mxu1 %v5462_v22  ;;  %v5459_v26 = vld [vmem:[#allocation7] sm:$0xff]  ;;  %v6416_v34 = vld [vmem:[#allocation5] ss:$0 sm:$0xff]  ;;  %s4721_s24 = sshll.u32 %s627_s17, 8  ;;  %s5631_s25 = sshll.u32 %s6265_s22, 8 }
  0x49   : > { %s9373_s1 = smov (!%p631_p13, %s4722_s1), 63  ;;  %s8773_s21 = scalar_lea.vmem [#allocation17], %s4721_s24 }
  0x4a   : > { %s4723_s3 = sshll.u32 %s9373_s1, 3  ;;  %s9363_s4 = sld [smem:[#allocation112_spill]] }
  0x4b   : > { %s6388_s30 = scalar_lea.vmem %s8885_s0, %s4723_s3  ;;  %762 = vmatpush.bf16.msra.mxu0 %v5457_v1  ;;  %5633 = vmatpush.bf16.msra.mxu3 %v5457_v1  ;;  %s4546_s15 = sshll.u32 %s8773_s21, 4  ;;  %s4547_s15 = int_to_ptr.vmem [resolvable:$true] %s4546_s15 }
  0x4c   : > { %v638_v2 = vld [vmem:[%s6388_s30] sm:$0xff]  ;;  %v639_v3 = vld [vmem:[%s6388_s30 + $0x8] sm:$0xff]  ;;  %v640_v5 = vld [vmem:[%s6388_s30 + $0x10] sm:$0xff]  ;;  %982 = vmatpush.bf16.msra.mxu1 %v5461_v24  ;;  %s4534_s3 = scalar_lea.sflag [#allocation4], %s627_s17 }
  0x4d   : > { %v670_v4 = vpack.c.bf16 %v639_v3, %v638_v2  ;;  %v641_v6 = vld [vmem:[%s6388_s30 + $0x18] sm:$0xff]  ;;  %v642_v8 = vld [vmem:[%s6388_s30 + $0x20] sm:$0xff]  ;;  %v643_v9 = vld [vmem:[%s6388_s30 + $0x28] sm:$0xff] }
  0x4e   : > { %v671_v7 = vpack.c.bf16 %v641_v6, %v640_v5  ;;  %v672_v10 = vpack.c.bf16 %v643_v9, %v642_v8  ;;  %v644_v11 = vld [vmem:[%s6388_s30 + $0x30] sm:$0xff]  ;;  %v645_v12 = vld [vmem:[%s6388_s30 + $0x38] sm:$0xff]  ;;  %v646_v14 = vld [vmem:[%s6388_s30 + $0x40] sm:$0xff] }
  0x4f   : > { %4732 = vmatmul.msk.bf16.vlgmr.msra.gmra.mxu0 %vm706_vm0, %v670_v4  ;;  %v673_v13 = vpack.c.bf16 %v645_v12, %v644_v11  ;;  %v647_v15 = vld [vmem:[%s6388_s30 + $0x48] sm:$0xff]  ;;  %v648_v17 = vld [vmem:[%s6388_s30 + $0x50] sm:$0xff]  ;;  %v649_v18 = vld [vmem:[%s6388_s30 + $0x58] sm:$0xff]  ;;  %5634 = vmatpush.bf16.msrb.mxu3 %v5462_v22 }
  0x50   : > { %v674_v16 = vpack.c.bf16 %v647_v15, %v646_v14  ;;  %v675_v19 = vpack.c.bf16 %v649_v18, %v648_v17  ;;  %v650_v20 = vld [vmem:[%s6388_s30 + $0x60] sm:$0xff]  ;;  %v651_v21 = vld [vmem:[%s6388_s30 + $0x68] sm:$0xff]  ;;  %983 = vmatpush.bf16.msra.mxu1 %v5460_v25  ;;  %v652_v27 = vld [vmem:[%s6388_s30 + $0x70] sm:$0xff]  ;;  %s4545_s20 = scalar_lea.hbm %s9363_s4, %s5631_s25  ;;  %s6085_s27 = scalar_lea.hbm %s9363_s4, 512 }
  0x51   : > { %v676_v23 = vpack.c.bf16 %v651_v21, %v650_v20  ;;  %v653_v28 = vld [vmem:[%s6388_s30 + $0x78] sm:$0xff]  ;;  %v654_v30 = vld [vmem:[%s6388_s30 + $0x80] sm:$0xff]  ;;  %v655_v31 = vld [vmem:[%s6388_s30 + $0x88] sm:$0xff]  ;;  %s4548_s1 = sshll.u32 %s4545_s20, 4  ;;  %s4549_s1 = int_to_ptr.hbm [resolvable:$true] %s4548_s1 }
  0x52   : > { %v677_v29 = vpack.c.bf16 %v653_v28, %v652_v27  ;;  %v678_v32 = vpack.c.bf16 %v655_v31, %v654_v30  ;;  %v656_v40 = vld [vmem:[%s6388_s30 + $0x90] sm:$0xff]  ;;  %v657_v41 = vld [vmem:[%s6388_s30 + $0x98] sm:$0xff]  ;;  %v658_v53 = vld [vmem:[%s6388_s30 + $0xa0] sm:$0xff]  ;;  %s6079_s22 = sshra.s32 %s4549_s1, 4  ;;  %s6080_s22 = int_to_ptr.hbm [resolvable:$true] %s6079_s22 }
  0x53   : > { %5635 = vmatpush.bf16.msrb.mxu3 %v5461_v24  ;;  %v679_v43 = vpack.c.bf16 %v657_v41, %v656_v40  ;;  %v664_v45 = vld [vmem:[%s6388_s30 + $0xd0] sm:$0xff]  ;;  %v665_v46 = vld [vmem:[%s6388_s30 + $0xd8] sm:$0xff]  ;;  %v659_v54 = vld [vmem:[%s6388_s30 + $0xa8] sm:$0xff]  ;;  %s6081_s9 = scalar_lea.hbm %s6080_s22, 256  ;;  %p6086_p3 = scmp.lt.s32.totalorder %s6080_s22, %s9363_s4 }
  0x54   : > { %984 = vmatpush.bf16.msra.mxu1 %v5459_v26  ;;  %v683_v47 = vpack.c.bf16 %v665_v46, %v664_v45  ;;  %v680_v56 = vpack.c.bf16 %v659_v54, %v658_v53  ;;  %v666_v58 = vld [vmem:[%s6388_s30 + $0xe0] sm:$0xff]  ;;  %v667_v59 = vld [vmem:[%s6388_s30 + $0xe8] sm:$0xff]  ;;  %v660_v2 = vld [vmem:[%s6388_s30 + $0xb0] sm:$0xff]  ;;  %p6082_p0 = scmp.ne.s32.totalorder %s6080_s22, %s6081_s9  ;;  %p6087_p4 = scmp.lt.s32.totalorder %s6085_s27, %s6081_s9 }
  0x55   : > { %v684_v60 = vpack.c.bf16 %v667_v59, %v666_v58  ;;  %v661_v3 = vld [vmem:[%s6388_s30 + $0xb8] sm:$0xff]  ;;  %v662_v15 = vld [vmem:[%s6388_s30 + $0xc0] sm:$0xff]  ;;  %v4838_v30 = vld [vmem:[%s8890_s5 + $0x70] sm:$0xf] }
  0x56   : > { %4745 = vmatmul.msk.bf16.vlgmr.msra.gmra.mxu3 %vm706_vm0, %v683_v47  ;;  %v681_v5 = vpack.c.bf16 %v661_v3, %v660_v2  ;;  %v669_v8 = vld [vmem:[%s6388_s30 + $0xf8] sm:$0xff]  ;;  %v4822_v41 = vld [vmem:[%s8890_s5 + $0x50] sm:$0xf]  ;;  %v5472_v45 = vld [vmem:[%s8890_s5 + $0x44] sm:$0xf0]  ;;  %p6083_p1 = pnand %p6082_p0, %p6282_p5  ;;  %p6088_p7 = por %p6087_p4, %p6086_p3 }
  0x57   : > { %5636 = vmatpush.bf16.msrb.mxu3 %v5460_v25  ;;  %v5478_v31 = vld [vmem:[%s8890_s5 + $0x74] sm:$0xf0] }
  0x58   : > { %p6084_p2 = pneg %p6083_p1 }
  0x5a   : > { %p6089_p8 = pnand %p6088_p7, %p6084_p2 }
  0x5b   : > { %5637 = vmatpush.bf16.msrb.mxu3 %v5459_v26 }
  0x5f   : > { %4733 = vmatmul.msk.bf16.gmra.mxu0 %vm706_vm0, %v671_v7  ;;  %v668_v7 = vld [vmem:[%s6388_s30 + $0xf0] sm:$0xff] }
  0x60   : > { %v685_v9 = vpack.c.bf16 %v669_v8, %v668_v7 }
  0x66   : > { %4746 = vmatmul.msk.bf16.gmra.mxu3 %vm706_vm0, %v684_v60  ;;  %v4790_v60 = vld [vmem:[%s8890_s5 + $0x10] sm:$0xf] }
  0x6f   : > { %4734 = vmatmul.msk.bf16.gmra.mxu0 %vm706_vm0, %v672_v10 }
  0x76   : > { %4747 = vmatmul.msk.bf16.gmra.mxu3 %vm706_vm0, %v685_v9 }
  0x7f   : > { %4735 = vmatmul.msk.bf16.gmra.mxu0 %vm706_vm0, %v673_v13 }
  0x8f   : > { %4736 = vmatmul.msk.bf16.gmra.mxu0 %vm706_vm0, %v674_v16  ;;  %v663_v16 = vld [vmem:[%s6388_s30 + $0xc8] sm:$0xff] }
  0x90   : > { %v682_v18 = vpack.c.bf16 %v663_v16, %v662_v15  ;;  %v6514_v16 = vld [vmem:[#allocation8] ss:$0 sm:$0xff] }
  0x9f   : > { %4737 = vmatmul.msk.bf16.gmra.mxu0 %vm706_vm0, %v675_v19 }
  0xaf   : > { %4738 = vmatmul.msk.bf16.gmra.mxu0 %vm706_vm0, %v676_v23 }
  0xbf   : > { %4739 = vmatmul.msk.bf16.gmra.mxu0 %vm706_vm0, %v677_v29 }
  0xcc   : > { %v764_v33 = vpop.f32.mrf.mxu0 }
  0xcd   : > { %v765_v35 = vadd.f32 %v6416_v34, %v764_v33 }
  0xcf   : > { %4740 = vmatmul.msk.bf16.gmra.mxu0 %vm706_vm0, %v678_v32  ;;  %v844_v38 = vmax.f32 %v765_v35, 0.0  ;;  %v4839_v32 = vor.u32 %v5478_v31, %v4838_v30 }
  0xd1   : > { %1216 = vmatpush.bf16.msra.mxu2 %v4839_v32  ;;  %5638 = vmatpush.bf16.msra.mxu3 %v4839_v32 }
  0xd4   : > { %v766_v36 = vpop.f32.mrf.mxu0 }
  0xd5   : > { %v767_v37 = vadd.f32 %v6416_v34, %v766_v36 }
  0xd7   : > { %v845_v39 = vmax.f32 %v767_v37, 0.0  ;;  %v4830_v37 = vld [vmem:[%s8890_s5 + $0x60] sm:$0xf] }
  0xd9   : > { %v876_v42 = vpack.c.bf16 %v845_v39, %v844_v38  ;;  %v5476_v38 = vld [vmem:[%s8890_s5 + $0x64] sm:$0xf0] }
  0xda   : > { %v4831_v39 = vor.u32 %v5476_v38, %v4830_v37 }
  0xdb   : > { %4764 = vmatmul.msk.bf16.vlgmr.msra.gmra.mxu1 %vm928_vm1, %v876_v42  ;;  %v5474_v42 = vld [vmem:[%s8890_s5 + $0x54] sm:$0xf0] }
  0xdc   : > { %v769_v44 = vpop.f32.mrf.mxu0  ;;  %1217 = vmatpush.bf16.msra.mxu2 %v4831_v39  ;;  %5639 = vmatpush.bf16.msra.mxu3 %v4831_v39 }
  0xdd   : > { %v770_v48 = vadd.f32 %v6416_v34, %v769_v44  ;;  %v4814_v44 = vld [vmem:[%s8890_s5 + $0x40] sm:$0xf] }
  0xde   : > { %v4815_v46 = vor.u32 %v5472_v45, %v4814_v44 }
  0xdf   : > { %4741 = vmatmul.msk.bf16.gmra.mxu0 %vm706_vm0, %v679_v43  ;;  %v846_v51 = vmax.f32 %v770_v48, 0.0  ;;  %v4823_v43 = vor.u32 %v5474_v42, %v4822_v41 }
  0xe1   : > { %1218 = vmatpush.bf16.msra.mxu2 %v4823_v43  ;;  %5640 = vmatpush.bf16.msra.mxu3 %v4823_v43 }
  0xe4   : > { %v771_v49 = vpop.f32.mrf.mxu0 }
  0xe5   : > { %v772_v50 = vadd.f32 %v6416_v34, %v771_v49  ;;  %1219 = vmatpush.bf16.msra.mxu2 %v4815_v46  ;;  %5641 = vmatpush.bf16.msra.mxu3 %v4815_v46 }
  0xe7   : > { %v847_v52 = vmax.f32 %v772_v50, 0.0  ;;  %v4806_v50 = vld [vmem:[%s8890_s5 + $0x30] sm:$0xf] }
  0xe9   : > { %v877_v55 = vpack.c.bf16 %v847_v52, %v846_v51  ;;  %v5470_v51 = vld [vmem:[%s8890_s5 + $0x34] sm:$0xf0] }
  0xea   : > { %v4807_v52 = vor.u32 %v5470_v51, %v4806_v50 }
  0xeb   : > { %4765 = vmatmul.msk.bf16.gmra.mxu1 %vm928_vm1, %v877_v55 }
  0xec   : > { %v774_v57 = vpop.f32.mrf.mxu0  ;;  %1220 = vmatpush.bf16.msra.mxu2 %v4807_v52  ;;  %5642 = vmatpush.bf16.msra.mxu3 %v4807_v52 }
  0xed   : > { %v775_v61 = vadd.f32 %v6416_v34, %v774_v57  ;;  %v5468_v57 = vld [vmem:[%s8890_s5 + $0x24] sm:$0xf0] }
  0xef   : > { %4742 = vmatmul.msk.bf16.gmra.mxu0 %vm706_vm0, %v680_v56  ;;  %v848_v0 = vmax.f32 %v775_v61, 0.0  ;;  %v4798_v56 = vld [vmem:[%s8890_s5 + $0x20] sm:$0xf]  ;;  %v5466_v61 = vld [vmem:[%s8890_s5 + $0x14] sm:$0xf0] }
  0xf0   : > { %v4799_v58 = vor.u32 %v5468_v57, %v4798_v56 }
  0xf2   : > { %1221 = vmatpush.bf16.msra.mxu2 %v4799_v58  ;;  %5643 = vmatpush.bf16.msra.mxu3 %v4799_v58 }
  0xf4   : > { %v776_v62 = vpop.f32.mrf.mxu0 }
  0xf5   : > { %v777_v63 = vadd.f32 %v6416_v34, %v776_v62  ;;  %v4791_v62 = vor.u32 %v5466_v61, %v4790_v60 }
  0xf7   : > { %v849_v1 = vmax.f32 %v777_v63, 0.0  ;;  %1222 = vmatpush.bf16.msra.mxu2 %v4791_v62  ;;  %5644 = vmatpush.bf16.msra.mxu3 %v4791_v62  ;;  %v4782_v63 = vld [vmem:[%s8890_s5] sm:$0xf] }
  0xf9   : > { %v878_v4 = vpack.c.bf16 %v849_v1, %v848_v0  ;;  %v5464_v0 = vld [vmem:[%s8890_s5 + $0x4] sm:$0xf0] }
  0xfa   : > { %v4783_v1 = vor.u32 %v5464_v0, %v4782_v63 }
  0xfb   : > { %4766 = vmatmul.msk.bf16.gmra.mxu1 %vm928_vm1, %v878_v4 }
  0xfc   : > { %v779_v6 = vpop.f32.mrf.mxu0  ;;  %1223 = vmatpush.bf16.msra.mxu2 %v4783_v1  ;;  %5645 = vmatpush.bf16.msra.mxu3 %v4783_v1 }
  0xfd   : > { %v780_v10 = vadd.f32 %v6416_v34, %v779_v6 }
  0xff   : > { %4743 = vmatmul.msk.bf16.gmra.mxu0 %vm706_vm0, %v681_v5  ;;  %v850_v13 = vmax.f32 %v780_v10, 0.0 }
 0x104   : > { %v781_v11 = vpop.f32.mrf.mxu0 }
 0x105   : > { %v782_v12 = vadd.f32 %v6416_v34, %v781_v11 }
 0x107   : > { %v851_v14 = vmax.f32 %v782_v12, 0.0 }
 0x109   : > { %v879_v17 = vpack.c.bf16 %v851_v14, %v850_v13 }
 0x10b   : > { %4767 = vmatmul.msk.bf16.gmra.mxu1 %vm928_vm1, %v879_v17 }
 0x10c   : > { %v784_v19 = vpop.f32.mrf.mxu0 }
 0x10d   : > { %v785_v20 = vadd.f32 %v6416_v34, %v784_v19 }
 0x10f   : > { %4744 = vmatmul.msk.bf16.gmra.mxu0 %vm706_vm0, %v682_v18  ;;  %v852_v23 = vmax.f32 %v785_v20, 0.0 }
 0x114   : > { %v786_v21 = vpop.f32.mrf.mxu0 }
 0x115   : > { %v787_v22 = vadd.f32 %v6416_v34, %v786_v21 }
 0x117   : > { %v853_v24 = vmax.f32 %v787_v22, 0.0 }
 0x119   : > { %v880_v25 = vpack.c.bf16 %v853_v24, %v852_v23 }
 0x11b   : > { %4768 = vmatmul.msk.bf16.gmra.mxu1 %vm928_vm1, %v880_v25 }
 0x11c   : > { %v789_v26 = vpop.f32.mrf.mxu0 }
 0x11d   : > { %v790_v27 = vadd.f32 %v6416_v34, %v789_v26 }
 0x11f   : > { %v854_v33 = vmax.f32 %v790_v27, 0.0  ;;  %v829_v27 = vpop.f32.mrf.mxu3 }
 0x120   : > { %v830_v32 = vadd.f32 %v6416_v34, %v829_v27 }
 0x122   : > { %v870_v37 = vmax.f32 %v830_v32, 0.0 }
 0x124   : > { %v791_v28 = vpop.f32.mrf.mxu0 }
 0x125   : > { %v792_v29 = vadd.f32 %v6416_v34, %v791_v28 }
 0x127   : > { %v855_v35 = vmax.f32 %v792_v29, 0.0 }
 0x129   : > { %v881_v36 = vpack.c.bf16 %v855_v35, %v854_v33  ;;  %v831_v35 = vpop.f32.mrf.mxu3 }
 0x12a   : > { %v832_v38 = vadd.f32 %v6416_v34, %v831_v35 }
 0x12b   : > { %4769 = vmatmul.msk.bf16.gmra.mxu1 %vm928_vm1, %v881_v36 }
 0x12c   : > { %v794_v40 = vpop.f32.mrf.mxu0  ;;  %v871_v41 = vmax.f32 %v832_v38, 0.0 }
 0x12d   : > { %v795_v47 = vadd.f32 %v6416_v34, %v794_v40 }
 0x12e   : > { %v889_v45 = vpack.c.bf16 %v871_v41, %v870_v37 }
 0x12f   : > { %v856_v53 = vmax.f32 %v795_v47, 0.0 }
 0x130   : > { %4777 = vmatmul.msk.bf16.vlgmr.msrb.gmra.mxu3 %vm928_vm1, %v889_v45 }
 0x134   : > { %v796_v48 = vpop.f32.mrf.mxu0 }
 0x135   : > { %v797_v49 = vadd.f32 %v6416_v34, %v796_v48 }
 0x137   : > { %v857_v54 = vmax.f32 %v797_v49, 0.0  ;;  %v834_v49 = vpop.f32.mrf.mxu3 }
 0x139   : > { %v882_v55 = vpack.c.bf16 %v857_v54, %v856_v53  ;;  %v835_v54 = vadd.f32 %v6416_v34, %v834_v49 }
 0x13b   : > { %4770 = vmatmul.msk.bf16.gmra.mxu1 %vm928_vm1, %v882_v55  ;;  %v872_v58 = vmax.f32 %v835_v54, 0.0 }
 0x13c   : > { %v799_v59 = vpop.f32.mrf.mxu0 }
 0x13d   : > { %v800_v2 = vadd.f32 %v6416_v34, %v799_v59 }
 0x13f   : > { %v858_v5 = vmax.f32 %v800_v2, 0.0  ;;  %v836_v56 = vpop.f32.mrf.mxu3 }
 0x140   : > { %v837_v59 = vadd.f32 %v6416_v34, %v836_v56  ;;  %v5501_v56 = vld [vmem:[%s8892_s7 + $0xac] sm:$0xf0] }
 0x142   : > { %v873_v62 = vmax.f32 %v837_v59, 0.0 }
 0x144   : > { %v801_v3 = vpop.f32.mrf.mxu0  ;;  %v890_v2 = vpack.c.bf16 %v873_v62, %v872_v58  ;;  %v4910_v62 = vld [vmem:[%s8892_s7 + $0x80] sm:$0xf] }
 0x145   : > { %v802_v4 = vadd.f32 %v6416_v34, %v801_v3 }
 0x146   : > { %4778 = vmatmul.msk.bf16.gmra.mxu3 %vm928_vm1, %v890_v2  ;;  %v4894_v2 = vld [vmem:[%s8892_s7 + $0x60] sm:$0xf] }
 0x147   : > { %v859_v6 = vmax.f32 %v802_v4, 0.0 }
 0x149   : > { %v883_v7 = vpack.c.bf16 %v859_v6, %v858_v5  ;;  %v839_v6 = vpop.f32.mrf.mxu3 }
 0x14b   : > { %4771 = vmatmul.msk.bf16.gmra.mxu1 %vm928_vm1, %v883_v7 }
 0x14c   : > { %v804_v8 = vpop.f32.mrf.mxu0 }
 0x14d   : > { %v805_v9 = vadd.f32 %v6416_v34, %v804_v8 }
 0x14f   : > { %v860_v12 = vmax.f32 %v805_v9, 0.0 }
 0x154   : > { %v806_v10 = vpop.f32.mrf.mxu0 }
 0x155   : > { %v807_v11 = vadd.f32 %v6416_v34, %v806_v10 }
 0x157   : > { %v861_v13 = vmax.f32 %v807_v11, 0.0  ;;  %v840_v11 = vadd.f32 %v6416_v34, %v839_v6 }
 0x158   : > { %v986_v14 = vpop.f32.mrf.mxu1 }
 0x159   : > { %v884_v15 = vpack.c.bf16 %v861_v13, %v860_v12  ;;  %v987_v18 = vadd.f32 %v6514_v16, %v986_v14  ;;  %v841_v13 = vpop.f32.mrf.mxu3 }
 0x15b   : > { %4772 = vmatmul.msk.bf16.gmra.mxu1 %vm928_vm1, %v884_v15  ;;  %v1066_v21 = vmax.f32 %v987_v18, 0.0  ;;  %v874_v15 = vmax.f32 %v840_v11, 0.0  ;;  %v4862_v11 = vld [vmem:[%s8892_s7 + $0x20] sm:$0xf] }
 0x15c   : > { %v809_v17 = vpop.f32.mrf.mxu0 }
 0x15d   : > { %v810_v22 = vadd.f32 %v6416_v34, %v809_v17  ;;  %v842_v17 = vadd.f32 %v6416_v34, %v841_v13 }
 0x15f   : > { %v862_v28 = vmax.f32 %v810_v22, 0.0 }
 0x160   : > { %v988_v19 = vpop.f32.mrf.mxu1 }
 0x161   : > { %v989_v20 = vadd.f32 %v6514_v16, %v988_v19 }
 0x163   : > { %v1067_v23 = vmax.f32 %v989_v20, 0.0  ;;  %v875_v20 = vmax.f32 %v842_v17, 0.0 }
 0x164   : > { %v811_v24 = vpop.f32.mrf.mxu0 }
 0x165   : > { %v812_v25 = vadd.f32 %v6416_v34, %v811_v24  ;;  %v6521_v26 = vpack.c.bf16 %v1067_v23, %v1066_v21  ;;  %v891_v24 = vpack.c.bf16 %v875_v20, %v874_v15  ;;  %v5481_v20 = vld [vmem:[%s8892_s7 + $0xc] sm:$0xf0] }
 0x167   : > { %v863_v29 = vmax.f32 %v812_v25, 0.0  ;;  %1224 = vmatmul.bf16.vlgmr.msra.gmra.mxu2 %v6521_v26  ;;  %4779 = vmatmul.msk.bf16.gmra.mxu3 %vm928_vm1, %v891_v24 }
 0x168   : > { %v991_v30 = vpop.f32.mrf.mxu1 }
 0x169   : > { %v885_v31 = vpack.c.bf16 %v863_v29, %v862_v28  ;;  %v992_v36 = vadd.f32 %v6514_v16, %v991_v30 }
 0x16b   : > { %4773 = vmatmul.msk.bf16.gmra.mxu1 %vm928_vm1, %v885_v31  ;;  %v1068_v42 = vmax.f32 %v992_v36, 0.0 }
 0x16c   : > { %v814_v33 = vpop.f32.mrf.mxu0 }
 0x16d   : > { %v815_v43 = vadd.f32 %v6416_v34, %v814_v33 }
 0x16f   : > { %v864_v50 = vmax.f32 %v815_v43, 0.0 }
 0x170   : > { %v993_v39 = vpop.f32.mrf.mxu1 }
 0x171   : > { %v994_v40 = vadd.f32 %v6514_v16, %v993_v39 }
 0x173   : > { %v1069_v44 = vmax.f32 %v994_v40, 0.0 }
 0x174   : > { %v816_v46 = vpop.f32.mrf.mxu0 }
 0x175   : > { %v817_v47 = vadd.f32 %v6416_v34, %v816_v46  ;;  %v6531_v48 = vpack.c.bf16 %v1069_v44, %v1068_v42  ;;  %v4958_v46 = vld [vmem:[%s8892_s7 + $0xe0] sm:$0xf] }
 0x177   : > { %v865_v51 = vmax.f32 %v817_v47, 0.0  ;;  %1229 = vmatmul.bf16.gmra.mxu2 %v6531_v48  ;;  %v5509_v47 = vld [vmem:[%s8892_s7 + $0xec] sm:$0xf0] }
 0x178   : > { %v996_v52 = vpop.f32.mrf.mxu1 }
 0x179   : > { %v886_v53 = vpack.c.bf16 %v865_v51, %v864_v50  ;;  %v997_v57 = vadd.f32 %v6514_v16, %v996_v52  ;;  %v4959_v50 = vor.u32 %v5509_v47, %v4958_v46  ;;  %v4942_v51 = vld [vmem:[%s8892_s7 + $0xc0] sm:$0xf]  ;;  %v5505_v52 = vld [vmem:[%s8892_s7 + $0xcc] sm:$0xf0] }
 0x17b   : > { %4774 = vmatmul.msk.bf16.gmra.mxu1 %vm928_vm1, %v886_v53  ;;  %v1070_v63 = vmax.f32 %v997_v57, 0.0  ;;  %1884 = vmatpush.bf16.msrb.mxu0 %v4959_v50  ;;  %v4943_v53 = vor.u32 %v5505_v52, %v4942_v51  ;;  %v5495_v52 = vld [vmem:[%s8892_s7 + $0x84] sm:$0xf] }
 0x17c   : > { %v819_v55 = vpop.f32.mrf.mxu0 }
 0x17d   : > { %v820_v0 = vadd.f32 %v6416_v34, %v819_v55  ;;  %v4926_v55 = vld [vmem:[%s8892_s7 + $0xa0] sm:$0xf] }
 0x17e   : > { %v4927_v58 = vor.u32 %v5501_v56, %v4926_v55 }
 0x17f   : > { %v866_v7 = vmax.f32 %v820_v0, 0.0  ;;  %1885 = vmatpush.bf16.msrb.mxu0 %v4943_v53  ;;  %v4912_v53 = vld [vmem:[%s8892_s7 + $0x90] sm:$0xf0] }
 0x180   : > { %v998_v60 = vpop.f32.mrf.mxu1  ;;  %v4915_v55 = vor.u32 %v5495_v52, %v4912_v53 }
 0x181   : > { %v999_v61 = vadd.f32 %v6514_v16, %v998_v60 }
 0x183   : > { %v1071_v1 = vmax.f32 %v999_v61, 0.0  ;;  %1886 = vmatpush.bf16.msrb.mxu0 %v4927_v58 }
 0x184   : > { %v821_v3 = vpop.f32.mrf.mxu0 }
 0x185   : > { %v822_v4 = vadd.f32 %v6416_v34, %v821_v3  ;;  %v6542_v5 = vpack.c.bf16 %v1071_v1, %v1070_v63  ;;  %v5497_v63 = vld [vmem:[%s8892_s7 + $0x8c] sm:$0xf0] }
 0x186   : > { %v4911_v0 = vor.u32 %v5497_v63, %v4910_v62  ;;  %v5493_v3 = vld [vmem:[%s8892_s7 + $0x6c] sm:$0xf0]  ;;  %v5491_v62 = vld [vmem:[%s8892_s7 + $0x64] sm:$0xf]  ;;  %v4896_v63 = vld [vmem:[%s8892_s7 + $0x70] sm:$0xf0] }
 0x187   : > { %v867_v8 = vmax.f32 %v822_v4, 0.0  ;;  %1234 = vmatmul.bf16.gmra.mxu2 %v6542_v5  ;;  %v4895_v6 = vor.u32 %v5493_v3, %v4894_v2 }
 0x188   : > { %v1001_v9 = vpop.f32.mrf.mxu1  ;;  %1887 = vmatpush.bf16.msrb.mxu0 %v4911_v0  ;;  %v4899_v0 = vor.u32 %v5491_v62, %v4896_v63  ;;  %v4824_v62 = vld [vmem:[%s8890_s5 + $0x58] sm:$0xf0] }
 0x189   : > { %v887_v10 = vpack.c.bf16 %v867_v8, %v866_v7  ;;  %v1002_v14 = vadd.f32 %v6514_v16, %v1001_v9  ;;  %v4878_v7 = vld [vmem:[%s8892_s7 + $0x40] sm:$0xf]  ;;  %v5489_v8 = vld [vmem:[%s8892_s7 + $0x4c] sm:$0xf0] }
 0x18a   : > { %v4879_v9 = vor.u32 %v5489_v8, %v4878_v7 }
 0x18b   : > { %4775 = vmatmul.msk.bf16.gmra.mxu1 %vm928_vm1, %v887_v10  ;;  %v1072_v21 = vmax.f32 %v1002_v14, 0.0 }
 0x18c   : > { %v824_v12 = vpop.f32.mrf.mxu0  ;;  %1888 = vmatpush.bf16.msrb.mxu0 %v4895_v6  ;;  %v4880_v6 = vld [vmem:[%s8892_s7 + $0x50] sm:$0xf0] }
 0x18d   : > { %v825_v22 = vadd.f32 %v6416_v34, %v824_v12  ;;  %v5485_v12 = vld [vmem:[%s8892_s7 + $0x2c] sm:$0xf0] }
 0x18e   : > { %v4863_v14 = vor.u32 %v5485_v12, %v4862_v11 }
 0x18f   : > { %v868_v29 = vmax.f32 %v825_v22, 0.0 }
 0x190   : > { %v1003_v18 = vpop.f32.mrf.mxu1  ;;  %1889 = vmatpush.bf16.msrb.mxu0 %v4879_v9  ;;  %v5483_v9 = vld [vmem:[%s8892_s7 + $0x24] sm:$0xf] }
 0x191   : > { %v1004_v19 = vadd.f32 %v6514_v16, %v1003_v18 }
 0x193   : > { %v1073_v23 = vmax.f32 %v1004_v19, 0.0  ;;  %v4846_v19 = vld [vmem:[%s8892_s7] sm:$0xf] }
 0x194   : > { %v826_v25 = vpop.f32.mrf.mxu0  ;;  %1890 = vmatpush.bf16.msrb.mxu0 %v4863_v14 }
 0x195   : > { %v827_v27 = vadd.f32 %v6416_v34, %v826_v25  ;;  %v6553_v28 = vpack.c.bf16 %v1073_v23, %v1072_v21  ;;  %v4847_v21 = vor.u32 %v5481_v20, %v4846_v19 }
 0x197   : > { %v869_v30 = vmax.f32 %v827_v27, 0.0  ;;  %1239 = vmatmul.bf16.gmra.mxu2 %v6553_v28 }
 0x198   : > { %v1006_v31 = vpop.f32.mrf.mxu1  ;;  %1891 = vmatpush.bf16.msrb.mxu0 %v4847_v21 }
 0x199   : > { %v888_v32 = vpack.c.bf16 %v869_v30, %v868_v29  ;;  %v1007_v33 = vadd.f32 %v6514_v16, %v1006_v31 }
 0x19b   : > { %4776 = vmatmul.msk.bf16.gmra.mxu1 %vm928_vm1, %v888_v32  ;;  %v1074_v37 = vmax.f32 %v1007_v33, 0.0  ;;  %v5507_v32 = vld [vmem:[%s8892_s7 + $0xe4] sm:$0xf]  ;;  %v4960_v33 = vld [vmem:[%s8892_s7 + $0xf0] sm:$0xf0] }
 0x1a0   : > { %v1008_v35 = vpop.f32.mrf.mxu1 }
 0x1a1   : > { %v1009_v36 = vadd.f32 %v6514_v16, %v1008_v35  ;;  %v4963_v35 = vor.u32 %v5507_v32, %v4960_v33  ;;  %v5477_v32 = vld [vmem:[%s8890_s5 + $0x74] sm:$0xf]  ;;  %v4840_v33 = vld [vmem:[%s8890_s5 + $0x78] sm:$0xf0] }
 0x1a3   : > { %v1075_v38 = vmax.f32 %v1009_v36, 0.0  ;;  %2062 = vmatpush.bf16.msrb.mxu2 %v4963_v35 }
 0x1a5   : > { %v6560_v34 = vpack.c.bf16 %v1075_v38, %v1074_v37  ;;  %v5503_v37 = vld [vmem:[%s8892_s7 + $0xc4] sm:$0xf]  ;;  %v4944_v38 = vld [vmem:[%s8892_s7 + $0xd0] sm:$0xf0] }
 0x1a7   : > { %1244 = vmatmul.bf16.gmra.mxu2 %v6560_v34 }
 0x1a8   : > { %v1011_v39 = vpop.f32.mrf.mxu1 }
 0x1a9   : > { %v1012_v40 = vadd.f32 %v6514_v16, %v1011_v39  ;;  %v6646_v39 = vld [vmem:[%s8891_s6] sm:$0x3] }
 0x1ab   : > { %v1076_v43 = vmax.f32 %v1012_v40, 0.0 }
 0x1b0   : > { %v1013_v41 = vpop.f32.mrf.mxu1 }
 0x1b1   : > { %v1014_v42 = vadd.f32 %v6514_v16, %v1013_v41  ;;  %v4947_v41 = vor.u32 %v5503_v37, %v4944_v38  ;;  %v5475_v38 = vld [vmem:[%s8890_s5 + $0x64] sm:$0xf] }
 0x1b3   : > { %v1077_v44 = vmax.f32 %v1014_v42, 0.0  ;;  %2063 = vmatpush.bf16.msrb.mxu2 %v4947_v41  ;;  %v6649_v42 = vperm.slane %v6646_v39, 0 }
 0x1b5   : > { %v6565_v45 = vpack.c.bf16 %v1077_v44, %v1076_v43  ;;  %v5499_v43 = vld [vmem:[%s8892_s7 + $0xa4] sm:$0xf]  ;;  %v4928_v44 = vld [vmem:[%s8892_s7 + $0xb0] sm:$0xf0] }
 0x1b6   : > { %v4931_v46 = vor.u32 %v5499_v43, %v4928_v44  ;;  %v5086_v43 = vld [vmem:[%s8892_s7 + $0x1e0] sm:$0xf]  ;;  %v5541_v44 = vld [vmem:[%s8892_s7 + $0x1ec] sm:$0xf0] }
 0x1b7   : > { %1249 = vmatmul.bf16.gmra.mxu2 %v6565_v45 }
 0x1b8   : > { %v1016_v49 = vpop.f32.mrf.mxu1  ;;  %2064 = vmatpush.bf16.msrb.mxu2 %v4931_v46 }
 0x1b9   : > { %v1017_v54 = vadd.f32 %v6514_v16, %v1016_v49 }
 0x1bb   : > { %v1078_v60 = vmax.f32 %v1017_v54, 0.0 }
 0x1bc   : > { %2065 = vmatpush.bf16.msrb.mxu2 %v4915_v55 }
 0x1c0   : > { %v1018_v57 = vpop.f32.mrf.mxu1  ;;  %2066 = vmatpush.bf16.msrb.mxu2 %v4899_v0  ;;  %v1051_v0 = vpop.f32.mrf.mxu3 }
 0x1c1   : > { %v1019_v59 = vadd.f32 %v6514_v16, %v1018_v57 }
 0x1c3   : > { %v1079_v61 = vmax.f32 %v1019_v59, 0.0 }
 0x1c5   : > { %v6594_v1 = vpack.c.bf16 %v1079_v61, %v1078_v60 }
 0x1c7   : > { %1254 = vmatmul.bf16.gmra.mxu2 %v6594_v1 }
 0x1c8   : > { %v1021_v4 = vpop.f32.mrf.mxu1 }
 0x1c9   : > { %v1022_v10 = vadd.f32 %v6514_v16, %v1021_v4  ;;  %v5487_v4 = vld [vmem:[%s8892_s7 + $0x44] sm:$0xf] }
 0x1ca   : > { %v4883_v8 = vor.u32 %v5487_v4, %v4880_v6  ;;  %v5471_v6 = vld [vmem:[%s8890_s5 + $0x44] sm:$0xf] }
 0x1cb   : > { %v1080_v17 = vmax.f32 %v1022_v10, 0.0  ;;  %v4864_v10 = vld [vmem:[%s8892_s7 + $0x30] sm:$0xf0] }
 0x1cc   : > { %2067 = vmatpush.bf16.msrb.mxu2 %v4883_v8  ;;  %v4867_v11 = vor.u32 %v5483_v9, %v4864_v10 }
 0x1d0   : > { %v1023_v13 = vpop.f32.mrf.mxu1  ;;  %2068 = vmatpush.bf16.msrb.mxu2 %v4867_v11 }
 0x1d1   : > { %v1024_v15 = vadd.f32 %v6514_v16, %v1023_v13 }
 0x1d3   : > { %v1081_v18 = vmax.f32 %v1024_v15, 0.0 }
 0x1d5   : > { %v6623_v22 = vpack.c.bf16 %v1081_v18, %v1080_v17  ;;  %v5479_v17 = vld [vmem:[%s8892_s7 + $0x4] sm:$0xf]  ;;  %v4848_v18 = vld [vmem:[%s8892_s7 + $0x10] sm:$0xf0] }
 0x1d6   : > { %v4851_v20 = vor.u32 %v5479_v17, %v4848_v18 }
 0x1d7   : > { %1259 = vmatmul.bf16.gmra.mxu2 %v6623_v22 }
 0x1d8   : > { %v1026_v23 = vpop.f32.mrf.mxu1  ;;  %2069 = vmatpush.bf16.msrb.mxu2 %v4851_v20 }
 0x1d9   : > { %v1027_v24 = vadd.f32 %v6514_v16, %v1026_v23 }
 0x1db   : > { %v1082_v29 = vmax.f32 %v1027_v24, 0.0 }
 0x1e0   : > { %v1028_v25 = vpop.f32.mrf.mxu1 }
 0x1e1   : > { %v1029_v27 = vadd.f32 %v6514_v16, %v1028_v25 }
 0x1e3   : > { %v1083_v30 = vmax.f32 %v1029_v27, 0.0 }
 0x1e5   : > { %v6628_v31 = vpack.c.bf16 %v1083_v30, %v1082_v29 }
 0x1e7   : > { %1264 = vmatmul.bf16.gmra.mxu2 %v6628_v31 }
 0x1e8   : > { %v1031_v36 = vpop.f32.mrf.mxu1 }
 0x1e9   : > { %v1032_v47 = vadd.f32 %v6514_v16, %v1031_v36  ;;  %v4843_v36 = vor.u32 %v5477_v32, %v4840_v33  ;;  %v5070_v32 = vld [vmem:[%s8892_s7 + $0x1c0] sm:$0xf]  ;;  %v5537_v33 = vld [vmem:[%s8892_s7 + $0x1cc] sm:$0xf0] }
 0x1ea   : > { %v1225_v40 = vpop.f32.mrf.mxu2 }
 0x1eb   : > { %v1226_v50 = vadd.f32 %v1225_v40, %v6649_v42  ;;  %v1084_v56 = vmax.f32 %v1032_v47, 0.0  ;;  %1305 = vmatpush.bf16.msrb.mxu3 %v4843_v36  ;;  %v4832_v40 = vld [vmem:[%s8890_s5 + $0x68] sm:$0xf0]  ;;  %v5087_v47 = vor.u32 %v5541_v44, %v5086_v43  ;;  %v5071_v36 = vor.u32 %v5537_v33, %v5070_v32 }
 0x1ec   : > { %v4835_v41 = vor.u32 %v5475_v38, %v4832_v40  ;;  %v1052_v38 = vadd.f32 %v6514_v16, %v1051_v0  ;;  %v4800_v43 = vld [vmem:[%s8890_s5 + $0x28] sm:$0xf0] }
 0x1ed   : > { %v1394_v59 = vmax.f32 %v1226_v50, 0.0  ;;  %1973 = vmatpush.bf16.msrb.mxu1 %v5087_v47 }
 0x1ef   : > { %1306 = vmatpush.bf16.msrb.mxu3 %v4835_v41  ;;  %v5467_v41 = vld [vmem:[%s8890_s5 + $0x24] sm:$0xf] }
 0x1f0   : > { %v1033_v49 = vpop.f32.mrf.mxu1  ;;  %v4803_v44 = vor.u32 %v5467_v41, %v4800_v43 }
 0x1f1   : > { %v1034_v51 = vadd.f32 %v6514_v16, %v1033_v49  ;;  %1974 = vmatpush.bf16.msrb.mxu1 %v5071_v36 }
 0x1f2   : > { %v1227_v54 = vpop.f32.mrf.mxu2 }
 0x1f3   : > { %v1085_v57 = vmax.f32 %v1034_v51, 0.0  ;;  %v1228_v58 = vadd.f32 %v1227_v54, %v6649_v42 }
 0x1f5   : > { %v1396_v60 = vmax.f32 %v1228_v58, 0.0  ;;  %v6667_v61 = vpack.c.bf16 %v1085_v57, %v1084_v56 }
 0x1f7   : > { %v6675_v2 = vpack.c.bf16 %v1396_v60, %v1394_v59  ;;  %1269 = vmatmul.bf16.gmra.mxu2 %v6667_v61  ;;  %v5473_v60 = vld [vmem:[%s8890_s5 + $0x54] sm:$0xf] }
 0x1f8   : > { %v1036_v3 = vpop.f32.mrf.mxu1 }
 0x1f9   : > { %1892 = vmatmul.bf16.vlgmr.msrb.gmra.mxu0 %v6675_v2  ;;  %v1037_v12 = vadd.f32 %v6514_v16, %v1036_v3  ;;  %v4827_v3 = vor.u32 %v5473_v60, %v4824_v62  ;;  %v4792_v60 = vld [vmem:[%s8890_s5 + $0x18] sm:$0xf0] }
 0x1fa   : > { %v1230_v7 = vpop.f32.mrf.mxu2 }
 0x1fb   : > { %v1231_v14 = vadd.f32 %v1230_v7, %v6649_v42  ;;  %v1086_v21 = vmax.f32 %v1037_v12, 0.0  ;;  %1307 = vmatpush.bf16.msrb.mxu3 %v4827_v3  ;;  %v4816_v7 = vld [vmem:[%s8890_s5 + $0x48] sm:$0xf0] }
 0x1fc   : > { %v4819_v8 = vor.u32 %v5471_v6, %v4816_v7  ;;  %v4784_v6 = vld [vmem:[%s8890_s5 + $0x8] sm:$0xf0] }
 0x1fd   : > { %v1398_v25 = vmax.f32 %v1231_v14, 0.0 }
 0x1ff   : > { %1308 = vmatpush.bf16.msrb.mxu3 %v4819_v8 }
 0x200   : > { %v1038_v13 = vpop.f32.mrf.mxu1 }
 0x201   : > { %v1039_v15 = vadd.f32 %v6514_v16, %v1038_v13  ;;  %v1053_v13 = vpop.f32.mrf.mxu3 }
 0x202   : > { %v1232_v19 = vpop.f32.mrf.mxu2  ;;  %v1054_v40 = vadd.f32 %v6514_v16, %v1053_v13 }
 0x203   : > { %v1087_v23 = vmax.f32 %v1039_v15, 0.0  ;;  %v1233_v24 = vadd.f32 %v1232_v19, %v6649_v42 }
 0x204   : > { %v1093_v47 = vmax.f32 %v1054_v40, 0.0 }
 0x205   : > { %v1400_v27 = vmax.f32 %v1233_v24, 0.0  ;;  %v6701_v29 = vpack.c.bf16 %v1087_v23, %v1086_v21  ;;  %v5469_v24 = vld [vmem:[%s8890_s5 + $0x34] sm:$0xf] }
 0x207   : > { %v6703_v30 = vpack.c.bf16 %v1400_v27, %v1398_v25  ;;  %1274 = vmatmul.bf16.gmra.mxu2 %v6701_v29  ;;  %v4808_v25 = vld [vmem:[%s8890_s5 + $0x38] sm:$0xf0] }
 0x208   : > { %v1041_v35 = vpop.f32.mrf.mxu1  ;;  %v4811_v27 = vor.u32 %v5469_v24, %v4808_v25  ;;  %v5539_v24 = vld [vmem:[%s8892_s7 + $0x1e4] sm:$0xf] }
 0x209   : > { %1897 = vmatmul.bf16.gmra.mxu0 %v6703_v30  ;;  %v1042_v46 = vadd.f32 %v6514_v16, %v1041_v35 }
 0x20a   : > { %v1235_v37 = vpop.f32.mrf.mxu2  ;;  %1309 = vmatpush.bf16.msrb.mxu3 %v4811_v27  ;;  %v5088_v27 = vld [vmem:[%s8892_s7 + $0x1f0] sm:$0xf0] }
 0x20b   : > { %v1236_v50 = vadd.f32 %v1235_v37, %v6649_v42  ;;  %v1088_v53 = vmax.f32 %v1042_v46, 0.0  ;;  %v1056_v37 = vpop.f32.mrf.mxu3  ;;  %v1092_v46 = vmax.f32 %v1052_v38, 0.0  ;;  %v5091_v32 = vor.u32 %v5539_v24, %v5088_v27 }
 0x20c   : > { %v1057_v0 = vadd.f32 %v6514_v16, %v1056_v37 }
 0x20d   : > { %v1402_v56 = vmax.f32 %v1236_v50, 0.0 }
 0x20e   : > { %1310 = vmatpush.bf16.msrb.mxu3 %v4803_v44 }
 0x210   : > { %v1043_v49 = vpop.f32.mrf.mxu1 }
 0x211   : > { %v1044_v51 = vadd.f32 %v6514_v16, %v1043_v49 }
 0x212   : > { %v1237_v52 = vpop.f32.mrf.mxu2 }
 0x213   : > { %v1089_v54 = vmax.f32 %v1044_v51, 0.0  ;;  %v1238_v55 = vadd.f32 %v1237_v52, %v6649_v42 }
 0x215   : > { %v1404_v57 = vmax.f32 %v1238_v55, 0.0  ;;  %v6729_v58 = vpack.c.bf16 %v1089_v54, %v1088_v53  ;;  %v6780_v54 = vpack.c.bf16 %v1093_v47, %v1092_v46  ;;  %v1058_v55 = vpop.f32.mrf.mxu3 }
 0x216   : > { %v1059_v3 = vadd.f32 %v6514_v16, %v1058_v55 }
 0x217   : > { %v6731_v59 = vpack.c.bf16 %v1404_v57, %v1402_v56  ;;  %1279 = vmatmul.bf16.gmra.mxu2 %v6729_v58  ;;  %v5465_v57 = vld [vmem:[%s8890_s5 + $0x14] sm:$0xf] }
 0x218   : > { %v1046_v63 = vpop.f32.mrf.mxu1  ;;  %v4795_v62 = vor.u32 %v5465_v57, %v4792_v60 }
 0x219   : > { %1902 = vmatmul.bf16.gmra.mxu0 %v6731_v59  ;;  %v1047_v9 = vadd.f32 %v6514_v16, %v1046_v63 }
 0x21a   : > { %v1240_v4 = vpop.f32.mrf.mxu2  ;;  %1311 = vmatpush.bf16.msrb.mxu3 %v4795_v62 }
 0x21b   : > { %v1241_v11 = vadd.f32 %v1240_v4, %v6649_v42  ;;  %v1090_v15 = vmax.f32 %v1047_v9, 0.0  ;;  %v5463_v4 = vld [vmem:[%s8890_s5 + $0x4] sm:$0xf]  ;;  %v1094_v9 = vmax.f32 %v1057_v0, 0.0 }
 0x21c   : > { %v4787_v7 = vor.u32 %v5463_v4, %v4784_v6  ;;  %v5072_v4 = vld [vmem:[%s8892_s7 + $0x1d0] sm:$0xf0] }
 0x21d   : > { %v1406_v19 = vmax.f32 %v1241_v11, 0.0  ;;  %v1061_v8 = vpop.f32.mrf.mxu3 }
 0x21e   : > { %1312 = vmatpush.bf16.msrb.mxu3 %v4787_v7  ;;  %v1062_v36 = vadd.f32 %v6514_v16, %v1061_v8 }
 0x220   : > { %v1048_v10 = vpop.f32.mrf.mxu1  ;;  %v1096_v38 = vmax.f32 %v1062_v36, 0.0 }
 0x221   : > { %v1049_v12 = vadd.f32 %v6514_v16, %v1048_v10  ;;  %v1095_v10 = vmax.f32 %v1059_v3, 0.0  ;;  %v5535_v3 = vld [vmem:[%s8892_s7 + $0x1c4] sm:$0xf] }
 0x222   : > { %v1242_v14 = vpop.f32.mrf.mxu2  ;;  %v5075_v6 = vor.u32 %v5535_v3, %v5072_v4 }
 0x223   : > { %v1091_v17 = vmax.f32 %v1049_v12, 0.0  ;;  %v1243_v18 = vadd.f32 %v1242_v14, %v6649_v42 }
 0x225   : > { %v6751_v20 = vpack.c.bf16 %v1091_v17, %v1090_v15  ;;  %v1408_v21 = vmax.f32 %v1243_v18, 0.0  ;;  %v6803_v17 = vpack.c.bf16 %v1095_v10, %v1094_v9  ;;  %v1063_v33 = vpop.f32.mrf.mxu3 }
 0x226   : > { %v1064_v37 = vadd.f32 %v6514_v16, %v1063_v33 }
 0x227   : > { %v6753_v23 = vpack.c.bf16 %v1408_v21, %v1406_v19  ;;  %1284 = vmatmul.bf16.vlgmr.msra.gmra.mxu3 %v6751_v20  ;;  %2070 = vmatmul.bf16.vlgmr.msrb.gmra.mxu2 %v6675_v2  ;;  %v5054_v19 = vld [vmem:[%s8892_s7 + $0x1a0] sm:$0xf]  ;;  %v5533_v21 = vld [vmem:[%s8892_s7 + $0x1ac] sm:$0xf0] }
 0x228   : > { %v5055_v25 = vor.u32 %v5533_v21, %v5054_v19  ;;  %2151 = vmatpush.bf16.msra.mxu3 %v5091_v32  ;;  %v1097_v40 = vmax.f32 %v1064_v37, 0.0  ;;  %v5531_v37 = vld [vmem:[%s8892_s7 + $0x1a4] sm:$0xf] }
 0x229   : > { %1907 = vmatmul.bf16.gmra.mxu0 %v6753_v23 }
 0x22a   : > { %v1245_v35 = vpop.f32.mrf.mxu2  ;;  %1975 = vmatpush.bf16.msrb.mxu1 %v5055_v25 }
 0x22b   : > { %v1246_v49 = vadd.f32 %v1245_v35, %v6649_v42 }
 0x22c   : > { %2152 = vmatpush.bf16.msra.mxu3 %v5075_v6 }
 0x22d   : > { %v1410_v52 = vmax.f32 %v1246_v49, 0.0  ;;  %v6826_v49 = vpack.c.bf16 %v1097_v40, %v1096_v38  ;;  %v5056_v38 = vld [vmem:[%s8892_s7 + $0x1b0] sm:$0xf0] }
 0x22e   : > { %v5059_v40 = vor.u32 %v5531_v37, %v5056_v38 }
 0x230   : > { %2153 = vmatpush.bf16.msra.mxu3 %v5059_v40 }
 0x232   : > { %v1247_v50 = vpop.f32.mrf.mxu2 }
 0x233   : > { %v1248_v51 = vadd.f32 %v1247_v50, %v6649_v42 }
 0x235   : > { %v1412_v53 = vmax.f32 %v1248_v51, 0.0  ;;  %v5038_v51 = vld [vmem:[%s8892_s7 + $0x180] sm:$0xf] }
 0x237   : > { %v6782_v56 = vpack.c.bf16 %v1412_v53, %v1410_v52  ;;  %1289 = vmatmul.bf16.gmra.mxu3 %v6780_v54  ;;  %2075 = vmatmul.bf16.gmra.mxu2 %v6703_v30  ;;  %v5529_v52 = vld [vmem:[%s8892_s7 + $0x18c] sm:$0xf0] }
 0x238   : > { %v5039_v53 = vor.u32 %v5529_v52, %v5038_v51 }
 0x239   : > { %1912 = vmatmul.bf16.gmra.mxu0 %v6782_v56 }
 0x23a   : > { %v1250_v63 = vpop.f32.mrf.mxu2  ;;  %1976 = vmatpush.bf16.msrb.mxu1 %v5039_v53 }
 0x23b   : > { %v1251_v11 = vadd.f32 %v1250_v63, %v6649_v42 }
 0x23d   : > { %v1414_v14 = vmax.f32 %v1251_v11, 0.0 }
 0x242   : > { %v1252_v12 = vpop.f32.mrf.mxu2 }
 0x243   : > { %v1253_v13 = vadd.f32 %v1252_v12, %v6649_v42 }
 0x245   : > { %v1416_v15 = vmax.f32 %v1253_v13, 0.0 }
 0x247   : > { %v6805_v18 = vpack.c.bf16 %v1416_v15, %v1414_v14  ;;  %1294 = vmatmul.bf16.gmra.mxu3 %v6803_v17  ;;  %2080 = vmatmul.bf16.gmra.mxu2 %v6731_v59  ;;  %v5022_v14 = vld [vmem:[%s8892_s7 + $0x160] sm:$0xf]  ;;  %v5525_v15 = vld [vmem:[%s8892_s7 + $0x16c] sm:$0xf0] }
 0x248   : > { %v5023_v19 = vor.u32 %v5525_v15, %v5022_v14  ;;  %v5517_v15 = vld [vmem:[%s8892_s7 + $0x12c] sm:$0xf0] }
 0x249   : > { %1917 = vmatmul.bf16.gmra.mxu0 %v6805_v18 }
 0x24a   : > { %v1255_v35 = vpop.f32.mrf.mxu2  ;;  %1977 = vmatpush.bf16.msrb.mxu1 %v5023_v19 }
 0x24b   : > { %v1256_v41 = vadd.f32 %v1255_v35, %v6649_v42 }
 0x24d   : > { %v1418_v46 = vmax.f32 %v1256_v41, 0.0 }
 0x252   : > { %v1257_v43 = vpop.f32.mrf.mxu2 }
 0x253   : > { %v1258_v44 = vadd.f32 %v1257_v43, %v6649_v42 }
 0x255   : > { %v1420_v47 = vmax.f32 %v1258_v44, 0.0  ;;  %v5521_v44 = vld [vmem:[%s8892_s7 + $0x14c] sm:$0xf0] }
 0x257   : > { %v6828_v50 = vpack.c.bf16 %v1420_v47, %v1418_v46  ;;  %1299 = vmatmul.bf16.gmra.mxu3 %v6826_v49  ;;  %2085 = vmatmul.bf16.gmra.mxu2 %v6753_v23 }
 0x259   : > { %1922 = vmatmul.bf16.gmra.mxu0 %v6828_v50 }
 0x25a   : > { %v1260_v16 = vpop.f32.mrf.mxu2 }
 0x25b   : > { %v1261_v55 = vadd.f32 %v1260_v16, %v6649_v42 }
 0x25d   : > { %v1422_v62 = vmax.f32 %v1261_v55, 0.0 }
 0x262   : > { %v1262_v57 = vpop.f32.mrf.mxu2 }
 0x263   : > { %v1263_v60 = vadd.f32 %v1262_v57, %v6649_v42 }
 0x265   : > { %v1424_v63 = vmax.f32 %v1263_v60, 0.0 }
 0x267   : > { %v6841_v0 = vpack.c.bf16 %v1424_v63, %v1422_v62  ;;  %1313 = vmatmul.bf16.vlgmr.msrb.gmra.mxu3 %v6521_v26  ;;  %2090 = vmatmul.bf16.gmra.mxu2 %v6782_v56 }
 0x269   : > { %1927 = vmatmul.bf16.gmra.mxu0 %v6841_v0 }
 0x26a   : > { %v1265_v7 = vpop.f32.mrf.mxu2 }
 0x26b   : > { %v1266_v8 = vadd.f32 %v1265_v7, %v6649_v42 }
 0x26d   : > { %v1426_v10 = vmax.f32 %v1266_v8, 0.0 }
 0x272   : > { %v1267_v9 = vpop.f32.mrf.mxu2 }
 0x273   : > { %v1268_v26 = vadd.f32 %v1267_v9, %v6649_v42 }
 0x275   : > { %v1428_v11 = vmax.f32 %v1268_v26, 0.0  ;;  %v5040_v26 = vld [vmem:[%s8892_s7 + $0x190] sm:$0xf0] }
 0x276   : > { %v6854_v12 = vpop.f32.mrf.mxu0 }
 0x277   : > { %v6856_v13 = vpack.c.bf16 %v1428_v11, %v1426_v10  ;;  %1318 = vmatmul.bf16.gmra.mxu3 %v6531_v48  ;;  %2095 = vmatmul.bf16.gmra.mxu2 %v6805_v18 }
 0x279   : > { %1932 = vmatmul.bf16.gmra.mxu0 %v6856_v13 }
 0x27a   : > { %v1270_v21 = vpop.f32.mrf.mxu2 }
 0x27b   : > { %v1271_v25 = vadd.f32 %v1270_v21, %v6649_v42 }
 0x27d   : > { %v1430_v32 = vmax.f32 %v1271_v25, 0.0 }
 0x27e   : > { %v6867_v24 = vpop.f32.mrf.mxu0 }
 0x282   : > { %v1272_v48 = vpop.f32.mrf.mxu2 }
 0x283   : > { %v1273_v27 = vadd.f32 %v1272_v48, %v6649_v42 }
 0x285   : > { %v1432_v33 = vmax.f32 %v1273_v27, 0.0 }
 0x286   : > { %v6871_v35 = vpop.f32.mrf.mxu0 }
 0x287   : > { %v6873_v36 = vpack.c.bf16 %v1432_v33, %v1430_v32  ;;  %1323 = vmatmul.bf16.gmra.mxu3 %v6542_v5  ;;  %2100 = vmatmul.bf16.gmra.mxu2 %v6828_v50  ;;  %v5006_v5 = vld [vmem:[%s8892_s7 + $0x140] sm:$0xf] }
 0x288   : > { %v5007_v46 = vor.u32 %v5521_v44, %v5006_v5  ;;  %v5510_v5 = vld [vmem:[%s8892_s7 + $0xf4] sm:$0xf0] }
 0x289   : > { %1937 = vmatmul.bf16.gmra.mxu0 %v6873_v36 }
 0x28a   : > { %v1275_v41 = vpop.f32.mrf.mxu2  ;;  %1978 = vmatpush.bf16.msrb.mxu1 %v5007_v46 }
 0x28b   : > { %v1276_v47 = vadd.f32 %v1275_v41, %v6649_v42  ;;  %v4966_v41 = vld [vmem:[%s8892_s7 + $0xe8] sm:$0xf] }
 0x28c   : > { %v4967_v44 = vor.u32 %v5510_v5, %v4966_v41  ;;  %v5494_v41 = vld [vmem:[%s8892_s7 + $0x74] sm:$0xf0] }
 0x28d   : > { %v1434_v52 = vmax.f32 %v1276_v47, 0.0 }
 0x28e   : > { %v6884_v43 = vpop.f32.mrf.mxu0  ;;  %2240 = vmatpush.bf16.msra.mxu0 %v4967_v44 }
 0x292   : > { %v1277_v16 = vpop.f32.mrf.mxu2 }
 0x293   : > { %v1278_v51 = vadd.f32 %v1277_v16, %v6649_v42  ;;  %v5506_v16 = vld [vmem:[%s8892_s7 + $0xd4] sm:$0xf0] }
 0x295   : > { %v1436_v53 = vmax.f32 %v1278_v51, 0.0 }
 0x296   : > { %v6894_v55 = vpop.f32.mrf.mxu0 }
 0x297   : > { %v6896_v57 = vpack.c.bf16 %v1436_v53, %v1434_v52  ;;  %1328 = vmatmul.bf16.gmra.mxu3 %v6553_v28  ;;  %2105 = vmatmul.bf16.gmra.mxu2 %v6841_v0  ;;  %v5527_v28 = vld [vmem:[%s8892_s7 + $0x184] sm:$0xf]  ;;  %v4934_v53 = vld [vmem:[%s8892_s7 + $0xa8] sm:$0xf] }
 0x298   : > { %v5043_v10 = vor.u32 %v5527_v28, %v5040_v26  ;;  %v4918_v28 = vld [vmem:[%s8892_s7 + $0x88] sm:$0xf]  ;;  %v5498_v26 = vld [vmem:[%s8892_s7 + $0x94] sm:$0xf0] }
 0x299   : > { %1942 = vmatmul.bf16.gmra.mxu0 %v6896_v57 }
 0x29a   : > { %v1280_v60 = vpop.f32.mrf.mxu2  ;;  %2154 = vmatpush.bf16.msra.mxu3 %v5043_v10  ;;  %v4919_v10 = vor.u32 %v5498_v26, %v4918_v28 }
 0x29b   : > { %v1281_v63 = vadd.f32 %v1280_v60, %v6649_v42  ;;  %v5502_v60 = vld [vmem:[%s8892_s7 + $0xb4] sm:$0xf0] }
 0x29d   : > { %v1438_v6 = vmax.f32 %v1281_v63, 0.0  ;;  %v4935_v63 = vor.u32 %v5502_v60, %v4934_v53 }
 0x29e   : > { %v6901_v62 = vpop.f32.mrf.mxu0 }
 0x2a2   : > { %v1282_v3 = vpop.f32.mrf.mxu2 }
 0x2a3   : > { %v1283_v4 = vadd.f32 %v1282_v3, %v6649_v42 }
 0x2a5   : > { %v1440_v7 = vmax.f32 %v1283_v4, 0.0 }
 0x2a6   : > { %v6905_v8 = vpop.f32.mrf.mxu0 }
 0x2a7   : > { %v6907_v9 = vpack.c.bf16 %v1440_v7, %v1438_v6  ;;  %1333 = vmatmul.bf16.gmra.mxu3 %v6560_v34  ;;  %2110 = vmatmul.bf16.gmra.mxu2 %v6856_v13  ;;  %v4990_v34 = vld [vmem:[%s8892_s7 + $0x120] sm:$0xf] }
 0x2a8   : > { %v4991_v21 = vor.u32 %v5517_v15, %v4990_v34 }
 0x2a9   : > { %1947 = vmatmul.bf16.gmra.mxu0 %v6907_v9 }
 0x2aa   : > { %v1285_v11 = vpop.f32.mrf.mxu3  ;;  %v6918_v14 = vpop.f32.mrf.mxu2  ;;  %1979 = vmatpush.bf16.msrb.mxu1 %v4991_v21 }
 0x2ab   : > { %v1286_v25 = vadd.f32 %v1285_v11, %v6649_v42 }
 0x2ad   : > { %v1442_v33 = vmax.f32 %v1286_v25, 0.0  ;;  %v4974_v25 = vld [vmem:[%s8892_s7 + $0x100] sm:$0xf] }
 0x2ae   : > { %v6926_v19 = vpop.f32.mrf.mxu0 }
 0x2b2   : > { %v1287_v48 = vpop.f32.mrf.mxu3  ;;  %v6929_v27 = vpop.f32.mrf.mxu2 }
 0x2b3   : > { %v1288_v32 = vadd.f32 %v1287_v48, %v6649_v42  ;;  %v5513_v48 = vld [vmem:[%s8892_s7 + $0x10c] sm:$0xf0] }
 0x2b5   : > { %v1444_v37 = vmax.f32 %v1288_v32, 0.0  ;;  %v5523_v32 = vld [vmem:[%s8892_s7 + $0x164] sm:$0xf] }
 0x2b6   : > { %v6932_v38 = vpop.f32.mrf.mxu0 }
 0x2b7   : > { %v6934_v40 = vpack.c.bf16 %v1444_v37, %v1442_v33  ;;  %1338 = vmatmul.bf16.gmra.mxu3 %v6565_v45  ;;  %2115 = vmatmul.bf16.gmra.mxu2 %v6873_v36  ;;  %v4950_v45 = vld [vmem:[%s8892_s7 + $0xc8] sm:$0xf]  ;;  %v4975_v33 = vor.u32 %v5513_v48, %v4974_v25  ;;  %v5024_v37 = vld [vmem:[%s8892_s7 + $0x170] sm:$0xf0] }
 0x2b8   : > { %v4951_v51 = vor.u32 %v5506_v16, %v4950_v45  ;;  %v5027_v5 = vor.u32 %v5523_v32, %v5024_v37  ;;  %v4886_v16 = vld [vmem:[%s8892_s7 + $0x48] sm:$0xf] }
 0x2b9   : > { %1952 = vmatmul.bf16.gmra.mxu0 %v6934_v40  ;;  %1980 = vmatpush.bf16.msrb.mxu1 %v4975_v33 }
 0x2ba   : > { %v1290_v46 = vpop.f32.mrf.mxu3  ;;  %v6945_v47 = vpop.f32.mrf.mxu2  ;;  %2241 = vmatpush.bf16.msra.mxu0 %v4951_v51  ;;  %2155 = vmatpush.bf16.msra.mxu3 %v5027_v5  ;;  %v5490_v51 = vld [vmem:[%s8892_s7 + $0x54] sm:$0xf0] }
 0x2bb   : > { %v1291_v3 = vadd.f32 %v1290_v46, %v6649_v42  ;;  %v4887_v53 = vor.u32 %v5490_v51, %v4886_v16 }
 0x2bd   : > { %v1446_v11 = vmax.f32 %v1291_v3, 0.0  ;;  %v5486_v3 = vld [vmem:[%s8892_s7 + $0x34] sm:$0xf0] }
 0x2be   : > { %v6953_v52 = vpop.f32.mrf.mxu0  ;;  %2242 = vmatpush.bf16.msra.mxu0 %v4935_v63  ;;  %v4870_v63 = vld [vmem:[%s8892_s7 + $0x28] sm:$0xf] }
 0x2c2   : > { %v1292_v4 = vpop.f32.mrf.mxu3  ;;  %v6962_v6 = vpop.f32.mrf.mxu2  ;;  %2243 = vmatpush.bf16.msra.mxu0 %v4919_v10 }
 0x2c3   : > { %v1293_v7 = vadd.f32 %v1292_v4, %v6649_v42  ;;  %v4871_v4 = vor.u32 %v5486_v3, %v4870_v63 }
 0x2c5   : > { %v1448_v34 = vmax.f32 %v1293_v7, 0.0 }
 0x2c6   : > { %v6971_v15 = vpop.f32.mrf.mxu0 }
 0x2c7   : > { %v6973_v21 = vpack.c.bf16 %v1448_v34, %v1446_v11  ;;  %1343 = vmatmul.bf16.gmra.mxu3 %v6594_v1  ;;  %2120 = vmatmul.bf16.gmra.mxu2 %v6896_v57  ;;  %v4902_v1 = vld [vmem:[%s8892_s7 + $0x68] sm:$0xf]  ;;  %v5482_v34 = vld [vmem:[%s8892_s7 + $0x14] sm:$0xf0] }
 0x2c8   : > { %v4903_v44 = vor.u32 %v5494_v41, %v4902_v1  ;;  %v4854_v11 = vld [vmem:[%s8892_s7 + $0x8] sm:$0xf] }
 0x2c9   : > { %1957 = vmatmul.bf16.gmra.mxu0 %v6973_v21  ;;  %v4855_v25 = vor.u32 %v5482_v34, %v4854_v11 }
 0x2ca   : > { %v1295_v46 = vpop.f32.mrf.mxu3  ;;  %v6996_v45 = vpop.f32.mrf.mxu2  ;;  %2244 = vmatpush.bf16.msra.mxu0 %v4903_v44  ;;  %v5094_v44 = vld [vmem:[%s8892_s7 + $0x1e8] sm:$0xf] }
 0x2cb   : > { %v1296_v7 = vadd.f32 %v1295_v46, %v6649_v42  ;;  %v5542_v46 = vld [vmem:[%s8892_s7 + $0x1f4] sm:$0xf0] }
 0x2cc   : > { %v5095_v16 = vor.u32 %v5542_v46, %v5094_v44 }
 0x2cd   : > { %v1450_v48 = vmax.f32 %v1296_v7, 0.0  ;;  %v5508_v7 = vld [vmem:[%s8892_s7 + $0xec] sm:$0xf] }
 0x2ce   : > { %v7004_v60 = vpop.f32.mrf.mxu0  ;;  %2245 = vmatpush.bf16.msra.mxu0 %v4887_v53  ;;  %2329 = vmatpush.bf16.msra.mxu1 %v5095_v16  ;;  %v7071_v16 = vperm.slane %v6646_v39, 1  ;;  %v4920_v39 = vld [vmem:[%s8892_s7 + $0x98] sm:$0xf0] }
 0x2d2   : > { %v1297_v28 = vpop.f32.mrf.mxu3  ;;  %v7013_v26 = vpop.f32.mrf.mxu2  ;;  %2246 = vmatpush.bf16.msra.mxu0 %v4871_v4 }
 0x2d3   : > { %v1298_v10 = vadd.f32 %v1297_v28, %v6649_v42  ;;  %v4968_v28 = vld [vmem:[%s8892_s7 + $0xf8] sm:$0xf0] }
 0x2d4   : > { %v4971_v11 = vor.u32 %v5508_v7, %v4968_v28  ;;  %v5496_v7 = vld [vmem:[%s8892_s7 + $0x8c] sm:$0xf] }
 0x2d5   : > { %v1452_v32 = vmax.f32 %v1298_v10, 0.0 }
 0x2d6   : > { %v7022_v33 = vpop.f32.mrf.mxu0  ;;  %2247 = vmatpush.bf16.msra.mxu0 %v4855_v25  ;;  %v5008_v25 = vld [vmem:[%s8892_s7 + $0x150] sm:$0xf0]  ;;  %2418 = vmatpush.bf16.msra.mxu2 %v4971_v11 }
 0x2d7   : > { %v7024_v37 = vpack.c.bf16 %v1452_v32, %v1450_v48  ;;  %1348 = vmatmul.bf16.gmra.mxu3 %v6623_v22  ;;  %2125 = vmatmul.bf16.gmra.mxu2 %v6907_v9  ;;  %v5504_v32 = vld [vmem:[%s8892_s7 + $0xcc] sm:$0xf] }
 0x2d9   : > { %1962 = vmatmul.bf16.gmra.mxu0 %v7024_v37 }
 0x2da   : > { %v1300_v1 = vpop.f32.mrf.mxu3  ;;  %v7029_v41 = vpop.f32.mrf.mxu2 }
 0x2db   : > { %8986 = vst [vmem:[#allocation30_spill] sm:$0xff] %v7029_v41  ;;  %v1301_v22 = vadd.f32 %v1300_v1, %v6649_v42 }
 0x2dd   : > { %v1454_v3 = vmax.f32 %v1301_v22, 0.0  ;;  %v5500_v22 = vld [vmem:[%s8892_s7 + $0xac] sm:$0xf] }
 0x2de   : > { %v7031_v5 = vpop.f32.mrf.mxu0 }
 0x2e2   : > { %v1302_v51 = vpop.f32.mrf.mxu3  ;;  %v7040_v53 = vpop.f32.mrf.mxu2 }
 0x2e3   : > { %8987 = vst [vmem:[#allocation31_spill] sm:$0xff] %v7040_v53  ;;  %v1303_v63 = vadd.f32 %v1302_v51, %v6649_v42  ;;  %v5519_v42 = vld [vmem:[%s8892_s7 + $0x144] sm:$0xf]  ;;  %v4936_v51 = vld [vmem:[%s8892_s7 + $0xb8] sm:$0xf0] }
 0x2e4   : > { %v5011_v48 = vor.u32 %v5519_v42, %v5008_v25  ;;  %v4923_v42 = vor.u32 %v5496_v7, %v4920_v39 }
 0x2e5   : > { %v1456_v4 = vmax.f32 %v1303_v63, 0.0 }
 0x2e6   : > { %v7049_v10 = vpop.f32.mrf.mxu0  ;;  %2156 = vmatpush.bf16.msra.mxu3 %v5011_v48 }
 0x2e7   : > { %v7051_v34 = vpack.c.bf16 %v1456_v4, %v1454_v3  ;;  %1353 = vmatmul.bf16.gmra.mxu3 %v6628_v31  ;;  %2130 = vmatmul.bf16.gmra.mxu2 %v6934_v40  ;;  %v4952_v31 = vld [vmem:[%s8892_s7 + $0xd8] sm:$0xf0]  ;;  %v4939_v3 = vor.u32 %v5500_v22, %v4936_v51 }
 0x2e8   : > { %v4955_v46 = vor.u32 %v5504_v32, %v4952_v31  ;;  %v5492_v31 = vld [vmem:[%s8892_s7 + $0x6c] sm:$0xf] }
 0x2e9   : > { %1967 = vmatmul.bf16.gmra.mxu0 %v7051_v34 }
 0x2ea   : > { %v1314_v1 = vpop.f32.mrf.mxu3  ;;  %v7068_v44 = vpop.f32.mrf.mxu2  ;;  %2419 = vmatpush.bf16.msra.mxu2 %v4955_v46 }
 0x2eb   : > { %8988 = vst [vmem:[#allocation32_spill] sm:$0xff] %v7068_v44  ;;  %v1315_v4 = vadd.f32 %v1314_v1, %v7071_v16  ;;  %v4904_v1 = vld [vmem:[%s8892_s7 + $0x78] sm:$0xf0] }
 0x2ec   : > { %v4907_v22 = vor.u32 %v5492_v31, %v4904_v1  ;;  %v5538_v31 = vld [vmem:[%s8892_s7 + $0x1d4] sm:$0xf0] }
 0x2ed   : > { %v1395_v48 = vmax.f32 %v1315_v4, 0.0  ;;  %v4888_v4 = vld [vmem:[%s8892_s7 + $0x58] sm:$0xf0] }
 0x2ee   : > { %v7079_v63 = vpop.f32.mrf.mxu0  ;;  %2420 = vmatpush.bf16.msra.mxu2 %v4939_v3  ;;  %v5488_v3 = vld [vmem:[%s8892_s7 + $0x4c] sm:$0xf] }
 0x2f2   : > { %v1316_v28 = vpop.f32.mrf.mxu3  ;;  %v7088_v11 = vpop.f32.mrf.mxu2  ;;  %2421 = vmatpush.bf16.msra.mxu2 %v4923_v42  ;;  %v4872_v42 = vld [vmem:[%s8892_s7 + $0x38] sm:$0xf0] }
 0x2f3   : > { %8989 = vst [vmem:[#allocation33_spill] sm:$0xff] %v7088_v11  ;;  %v1317_v25 = vadd.f32 %v1316_v28, %v7071_v16  ;;  %v4891_v28 = vor.u32 %v5488_v3, %v4888_v4  ;;  %v5480_v3 = vld [vmem:[%s8892_s7 + $0xc] sm:$0xf]  ;;  %v4856_v4 = vld [vmem:[%s8892_s7 + $0x18] sm:$0xf0] }
 0x2f4   : > { %v5515_v11 = vld [vmem:[%s8892_s7 + $0x124] sm:$0xf] }
 0x2f5   : > { %v1397_v32 = vmax.f32 %v1317_v25, 0.0 }
 0x2f6   : > { %v7097_v46 = vpop.f32.mrf.mxu0  ;;  %2422 = vmatpush.bf16.msra.mxu2 %v4907_v22 }
 0x2f7   : > { %v7099_v51 = vpack.c.bf16 %v1397_v32, %v1395_v48  ;;  %1358 = vmatmul.bf16.gmra.mxu3 %v6667_v61  ;;  %2135 = vmatmul.bf16.gmra.mxu2 %v6973_v21  ;;  %v5484_v61 = vld [vmem:[%s8892_s7 + $0x2c] sm:$0xf]  ;;  %v5078_v32 = vld [vmem:[%s8892_s7 + $0x1c8] sm:$0xf] }
 0x2f8   : > { %v4875_v48 = vor.u32 %v5484_v61, %v4872_v42  ;;  %v5079_v1 = vor.u32 %v5538_v31, %v5078_v32  ;;  %v4859_v42 = vor.u32 %v5480_v3, %v4856_v4 }
 0x2f9   : > { %1981 = vmatmul.bf16.vlgmr.msrb.gmra.mxu1 %v7099_v51  ;;  %2248 = vmatmul.bf16.vlgmr.msra.gmra.mxu0 %v6675_v2 }
 0x2fa   : > { %v1319_v7 = vpop.f32.mrf.mxu3  ;;  %v7111_v39 = vpop.f32.mrf.mxu2  ;;  %2423 = vmatpush.bf16.msra.mxu2 %v4891_v28  ;;  %2330 = vmatpush.bf16.msra.mxu1 %v5079_v1  ;;  %v4992_v1 = vld [vmem:[%s8892_s7 + $0x130] sm:$0xf0] }
 0x2fb   : > { %8990 = vst [vmem:[#allocation34_spill] sm:$0xff] %v7111_v39  ;;  %v1320_v22 = vadd.f32 %v1319_v7, %v7071_v16  ;;  %v4995_v3 = vor.u32 %v5515_v11, %v4992_v1 }
 0x2fd   : > { %v1399_v32 = vmax.f32 %v1320_v22, 0.0  ;;  %2157 = vmatpush.bf16.msra.mxu3 %v4995_v3 }
 0x2fe   : > { %v7119_v25 = vpop.f32.mrf.mxu0  ;;  %2424 = vmatpush.bf16.msra.mxu2 %v4875_v48 }
 0x302   : > { %v1321_v28 = vpop.f32.mrf.mxu3  ;;  %v7134_v61 = vpop.f32.mrf.mxu2  ;;  %2425 = vmatpush.bf16.msra.mxu2 %v4859_v42 }
 0x303   : > { %8991 = vst [vmem:[#allocation35_spill] sm:$0xff] %v7134_v61  ;;  %v1322_v39 = vadd.f32 %v1321_v28, %v7071_v16 }
 0x305   : > { %v1401_v48 = vmax.f32 %v1322_v39, 0.0 }
 0x306   : > { %v7137_v31 = vpop.f32.mrf.mxu0 }
 0x307   : > { %v7139_v7 = vpack.c.bf16 %v1401_v48, %v1399_v32  ;;  %1363 = vmatmul.bf16.gmra.mxu3 %v6701_v29  ;;  %2140 = vmatmul.bf16.gmra.mxu2 %v7024_v37 }
 0x309   : > { %1986 = vmatmul.bf16.gmra.mxu1 %v7139_v7  ;;  %2253 = vmatmul.bf16.gmra.mxu0 %v6703_v30 }
 0x30a   : > { %v1324_v39 = vpop.f32.mrf.mxu3  ;;  %v7151_v22 = vpop.f32.mrf.mxu2 }
 0x30b   : > { %8992 = vst [vmem:[#allocation36_spill] sm:$0xff] %v7151_v22  ;;  %v1325_v4 = vadd.f32 %v1324_v39, %v7071_v16 }
 0x30d   : > { %v1403_v48 = vmax.f32 %v1325_v4, 0.0  ;;  %v5062_v4 = vld [vmem:[%s8892_s7 + $0x1a8] sm:$0xf] }
 0x30e   : > { %v7153_v29 = vpop.f32.mrf.mxu0 }
 0x312   : > { %v1326_v28 = vpop.f32.mrf.mxu3  ;;  %v7156_v42 = vpop.f32.mrf.mxu2 }
 0x313   : > { %8993 = vst [vmem:[#allocation37_spill] sm:$0xff] %v7156_v42  ;;  %v1327_v32 = vadd.f32 %v1326_v28, %v7071_v16 }
 0x315   : > { %v1405_v61 = vmax.f32 %v1327_v32, 0.0 }
 0x316   : > { %v7159_v11 = vpop.f32.mrf.mxu0 }
 0x317   : > { %v7161_v1 = vpack.c.bf16 %v1405_v61, %v1403_v48  ;;  %1368 = vmatmul.bf16.gmra.mxu3 %v6729_v58  ;;  %2145 = vmatmul.bf16.gmra.mxu2 %v7051_v34  ;;  %v5534_v61 = vld [vmem:[%s8892_s7 + $0x1b4] sm:$0xf0] }
 0x318   : > { %v5063_v58 = vor.u32 %v5534_v61, %v5062_v4  ;;  %v4976_v4 = vld [vmem:[%s8892_s7 + $0x110] sm:$0xf0] }
 0x319   : > { %1991 = vmatmul.bf16.gmra.mxu1 %v7161_v1  ;;  %2258 = vmatmul.bf16.gmra.mxu0 %v6731_v59 }
 0x31a   : > { %v1329_v3 = vpop.f32.mrf.mxu3  ;;  %v7167_v39 = vpop.f32.mrf.mxu2  ;;  %2331 = vmatpush.bf16.msra.mxu1 %v5063_v58 }
 0x31b   : > { %8994 = vst [vmem:[#allocation38_spill] sm:$0xff] %v7167_v39  ;;  %v1330_v28 = vadd.f32 %v1329_v3, %v7071_v16  ;;  %v5511_v3 = vld [vmem:[%s8892_s7 + $0x104] sm:$0xf] }
 0x31c   : > { %v4979_v61 = vor.u32 %v5511_v3, %v4976_v4 }
 0x31d   : > { %v1407_v39 = vmax.f32 %v1330_v28, 0.0 }
 0x31e   : > { %v7169_v42 = vpop.f32.mrf.mxu0  ;;  %2158 = vmatpush.bf16.msra.mxu3 %v4979_v61 }
 0x31f   : > { %8995 = vst [vmem:[#allocation39_spill] sm:$0xff] %v7169_v42 }
 0x322   : > { %v1331_v32 = vpop.f32.mrf.mxu3  ;;  %v7178_v48 = vpop.f32.mrf.mxu2 }
 0x323   : > { %8996 = vst [vmem:[#allocation40_spill] sm:$0xff] %v7178_v48  ;;  %v1332_v22 = vadd.f32 %v1331_v32, %v7071_v16 }
 0x325   : > { %v1409_v44 = vmax.f32 %v1332_v22, 0.0 }
 0x326   : > { %v7181_v53 = vpop.f32.mrf.mxu0 }
 0x327   : > { %8997 = vst [vmem:[#allocation41_spill] sm:$0xff] %v7181_v53  ;;  %v7183_v42 = vpack.c.bf16 %v1409_v44, %v1407_v39  ;;  %1373 = vmatmul.bf16.gmra.mxu3 %v6751_v20  ;;  %2426 = vmatmul.bf16.vlgmr.msra.gmra.mxu2 %v6675_v2 }
 0x329   : > { %1996 = vmatmul.bf16.gmra.mxu1 %v7183_v42  ;;  %2263 = vmatmul.bf16.gmra.mxu0 %v6753_v23 }
 0x32a   : > { %v1334_v22 = vpop.f32.mrf.mxu3  ;;  %v7195_v44 = vpop.f32.mrf.mxu2 }
 0x32b   : > { %8998 = vst [vmem:[#allocation42_spill] sm:$0xff] %v7195_v44  ;;  %v1335_v2 = vadd.f32 %v1334_v22, %v7071_v16 }
 0x32d   : > { %v1411_v32 = vmax.f32 %v1335_v2, 0.0  ;;  %v5046_v2 = vld [vmem:[%s8892_s7 + $0x188] sm:$0xf] }
 0x32e   : > { %v7197_v20 = vpop.f32.mrf.mxu0 }
 0x32f   : > { %8999 = vst [vmem:[#allocation43_spill] sm:$0xff] %v7197_v20 }
 0x332   : > { %v1336_v39 = vpop.f32.mrf.mxu3  ;;  %v7201_v28 = vpop.f32.mrf.mxu2 }
 0x333   : > { %v1337_v58 = vadd.f32 %v1336_v39, %v7071_v16  ;;  %9000 = vst [vmem:[#allocation44_spill] sm:$0xff] %v7201_v28 }
 0x335   : > { %v1413_v48 = vmax.f32 %v1337_v58, 0.0 }
 0x336   : > { %v7203_v3 = vpop.f32.mrf.mxu0 }
 0x337   : > { %9001 = vst [vmem:[#allocation45_spill] sm:$0xff] %v7203_v3  ;;  %v7205_v4 = vpack.c.bf16 %v1413_v48, %v1411_v32  ;;  %1378 = vmatmul.bf16.gmra.mxu3 %v6780_v54  ;;  %2431 = vmatmul.bf16.gmra.mxu2 %v6703_v30  ;;  %v5530_v48 = vld [vmem:[%s8892_s7 + $0x194] sm:$0xf0] }
 0x338   : > { %v5047_v54 = vor.u32 %v5530_v48, %v5046_v2  ;;  %v5096_v2 = vld [vmem:[%s8892_s7 + $0x1f8] sm:$0xf0] }
 0x339   : > { %2001 = vmatmul.bf16.gmra.mxu1 %v7205_v4  ;;  %2268 = vmatmul.bf16.gmra.mxu0 %v6782_v56 }
 0x33a   : > { %v1339_v61 = vpop.f32.mrf.mxu3  ;;  %v7211_v22 = vpop.f32.mrf.mxu2  ;;  %2332 = vmatpush.bf16.msra.mxu1 %v5047_v54 }
 0x33b   : > { %9002 = vst [vmem:[#allocation46_spill] sm:$0xff] %v7211_v22  ;;  %v1340_v30 = vadd.f32 %v1339_v61, %v7071_v16  ;;  %v5540_v61 = vld [vmem:[%s8892_s7 + $0x1ec] sm:$0xf] }
 0x33c   : > { %v5099_v48 = vor.u32 %v5540_v61, %v5096_v2 }
 0x33d   : > { %v1415_v28 = vmax.f32 %v1340_v30, 0.0 }
 0x33e   : > { %v7213_v39 = vpop.f32.mrf.mxu0  ;;  %2507 = vmatpush.bf16.msrb.mxu3 %v5099_v48 }
 0x33f   : > { %9003 = vst [vmem:[#allocation47_spill] sm:$0xff] %v7213_v39 }
 0x342   : > { %v1341_v58 = vpop.f32.mrf.mxu3  ;;  %v7227_v3 = vpop.f32.mrf.mxu2 }
 0x343   : > { %v1342_v32 = vadd.f32 %v1341_v58, %v7071_v16  ;;  %9005 = vst [vmem:[#allocation49_spill] sm:$0xff] %v7227_v3 }
 0x345   : > { %v1417_v44 = vmax.f32 %v1342_v32, 0.0 }
 0x346   : > { %v7223_v22 = vpop.f32.mrf.mxu0 }
 0x347   : > { %9004 = vst [vmem:[#allocation48_spill] sm:$0xff] %v7223_v22  ;;  %v7225_v39 = vpack.c.bf16 %v1417_v44, %v1415_v28  ;;  %1383 = vmatmul.bf16.gmra.mxu3 %v6803_v17  ;;  %2436 = vmatmul.bf16.gmra.mxu2 %v6731_v59 }
 0x349   : > { %2006 = vmatmul.bf16.gmra.mxu1 %v7225_v39  ;;  %2273 = vmatmul.bf16.gmra.mxu0 %v6805_v18 }
 0x34a   : > { %v1344_v44 = vpop.f32.mrf.mxu3  ;;  %v7242_v59 = vpop.f32.mrf.mxu2 }
 0x34b   : > { %v1345_v17 = vadd.f32 %v1344_v44, %v7071_v16  ;;  %9007 = vst [vmem:[#allocation51_spill] sm:$0xff] %v7242_v59 }
 0x34d   : > { %v1419_v58 = vmax.f32 %v1345_v17, 0.0 }
 0x34e   : > { %v7239_v28 = vpop.f32.mrf.mxu0 }
 0x34f   : > { %9006 = vst [vmem:[#allocation50_spill] sm:$0xff] %v7239_v28 }
 0x352   : > { %v1346_v54 = vpop.f32.mrf.mxu3  ;;  %v7253_v48 = vpop.f32.mrf.mxu2 }
 0x353   : > { %v1347_v30 = vadd.f32 %v1346_v54, %v7071_v16  ;;  %9009 = vst [vmem:[#allocation53_spill] sm:$0xff] %v7253_v48 }
 0x355   : > { %v1421_v32 = vmax.f32 %v1347_v30, 0.0 }
 0x356   : > { %v7245_v3 = vpop.f32.mrf.mxu0 }
 0x357   : > { %9008 = vst [vmem:[#allocation52_spill] sm:$0xff] %v7245_v3  ;;  %v7247_v61 = vpack.c.bf16 %v1421_v32, %v1419_v58  ;;  %1388 = vmatmul.bf16.gmra.mxu3 %v6826_v49  ;;  %2441 = vmatmul.bf16.gmra.mxu2 %v6753_v23  ;;  %v5030_v49 = vld [vmem:[%s8892_s7 + $0x168] sm:$0xf]  ;;  %v5526_v23 = vld [vmem:[%s8892_s7 + $0x174] sm:$0xf0] }
 0x358   : > { %v5031_v58 = vor.u32 %v5526_v23, %v5030_v49 }
 0x359   : > { %2011 = vmatmul.bf16.gmra.mxu1 %v7247_v61  ;;  %2278 = vmatmul.bf16.gmra.mxu0 %v6828_v50 }
 0x35a   : > { %v1349_v2 = vpop.f32.mrf.mxu3  ;;  %v7265_v59 = vpop.f32.mrf.mxu2  ;;  %2333 = vmatpush.bf16.msra.mxu1 %v5031_v58 }
 0x35b   : > { %v1350_v17 = vadd.f32 %v1349_v2, %v7071_v16  ;;  %9011 = vst [vmem:[#allocation55_spill] sm:$0xff] %v7265_v59 }
 0x35d   : > { %v1423_v32 = vmax.f32 %v1350_v17, 0.0  ;;  %v5536_v17 = vld [vmem:[%s8892_s7 + $0x1cc] sm:$0xf] }
 0x35e   : > { %v7255_v44 = vpop.f32.mrf.mxu0 }
 0x35f   : > { %9010 = vst [vmem:[#allocation54_spill] sm:$0xff] %v7255_v44 }
 0x362   : > { %v1351_v54 = vpop.f32.mrf.mxu3  ;;  %v7288_v23 = vpop.f32.mrf.mxu2 }
 0x363   : > { %v1352_v30 = vadd.f32 %v1351_v54, %v7071_v16  ;;  %v5080_v54 = vld [vmem:[%s8892_s7 + $0x1d8] sm:$0xf0]  ;;  %9014 = vst [vmem:[#allocation58_spill] sm:$0xff] %v7288_v23 }
 0x364   : > { %v5083_v49 = vor.u32 %v5536_v17, %v5080_v54 }
 0x365   : > { %v1425_v48 = vmax.f32 %v1352_v30, 0.0 }
 0x366   : > { %v7267_v3 = vpop.f32.mrf.mxu0  ;;  %2508 = vmatpush.bf16.msrb.mxu3 %v5083_v49 }
 0x367   : > { %9012 = vst [vmem:[#allocation56_spill] sm:$0xff] %v7267_v3  ;;  %v7269_v2 = vpack.c.bf16 %v1425_v48, %v1423_v32  ;;  %2159 = vmatmul.bf16.vlgmr.msra.gmra.mxu3 %v7099_v51  ;;  %2446 = vmatmul.bf16.gmra.mxu2 %v6782_v56  ;;  %v7284_v48 = vld [vmem:[%s8893_s8] sm:$0xf] }
 0x368   : > { %v7291_v58 = vperm.slane %v7284_v48, 0 }
 0x369   : > { %2016 = vmatmul.bf16.gmra.mxu1 %v7269_v2  ;;  %2283 = vmatmul.bf16.gmra.mxu0 %v6841_v0 }
 0x36a   : > { %v1354_v30 = vpop.f32.mrf.mxu3  ;;  %v1894_v17 = vadd.f32 %v6854_v12, %v7291_v58  ;;  %v7303_v23 = vpop.f32.mrf.mxu2  ;;  %v1896_v12 = vadd.f32 %v6867_v24, %v7291_v58 }
 0x36b   : > { %v1355_v32 = vadd.f32 %v1354_v30, %v7071_v16  ;;  %9016 = vst [vmem:[#allocation60_spill] sm:$0xff] %v7303_v23 }
 0x36d   : > { %v1427_v54 = vmax.f32 %v1355_v32, 0.0 }
 0x36e   : > { %v7286_v56 = vpop.f32.mrf.mxu0 }
 0x36f   : > { %9013 = vst [vmem:[#allocation57_spill] sm:$0xff] %v7286_v56 }
 0x372   : > { %v1356_v59 = vpop.f32.mrf.mxu3  ;;  %v7318_v20 = vpop.f32.mrf.mxu2 }
 0x373   : > { %v1357_v3 = vadd.f32 %v1356_v59, %v7071_v16  ;;  %9018 = vst [vmem:[#allocation62_spill] sm:$0xff] %v7318_v20 }
 0x375   : > { %v1429_v49 = vmax.f32 %v1357_v3, 0.0 }
 0x376   : > { %v1982_v44 = vpop.f32.mrf.mxu1  ;;  %v7297_v28 = vpop.f32.mrf.mxu0 }
 0x377   : > { %9015 = vst [vmem:[#allocation59_spill] sm:$0xff] %v7297_v28  ;;  %v7299_v22 = vpack.c.bf16 %v1429_v49, %v1427_v54  ;;  %v1983_v56 = vadd.f32 %v1982_v44, %v1894_v17  ;;  %2164 = vmatmul.bf16.gmra.mxu3 %v7139_v7  ;;  %2451 = vmatmul.bf16.gmra.mxu2 %v6805_v18  ;;  %v5014_v18 = vld [vmem:[%s8892_s7 + $0x148] sm:$0xf]  ;;  %v5522_v49 = vld [vmem:[%s8892_s7 + $0x154] sm:$0xf0] }
 0x378   : > { %v5015_v28 = vor.u32 %v5522_v49, %v5014_v18 }
 0x379   : > { %2021 = vmatmul.bf16.gmra.mxu1 %v7299_v22  ;;  %2288 = vmatmul.bf16.gmra.mxu0 %v6856_v13  ;;  %v2596_v54 = vmax.f32 %v1983_v56, 0.0  ;;  %v1899_v56 = vadd.f32 %v6871_v35, %v7291_v58  ;;  %v5532_v35 = vld [vmem:[%s8892_s7 + $0x1ac] sm:$0xf] }
 0x37a   : > { %v1359_v59 = vpop.f32.mrf.mxu3  ;;  %2334 = vmatpush.bf16.msra.mxu1 %v5015_v28  ;;  %v5064_v28 = vld [vmem:[%s8892_s7 + $0x1b8] sm:$0xf0] }
 0x37b   : > { %v1360_v44 = vadd.f32 %v1359_v59, %v7071_v16 }
 0x37d   : > { %v1431_v59 = vmax.f32 %v1360_v44, 0.0  ;;  %v1901_v44 = vadd.f32 %v6884_v43, %v7291_v58 }
 0x37e   : > { %v1984_v3 = vpop.f32.mrf.mxu1  ;;  %v7309_v30 = vpop.f32.mrf.mxu0 }
 0x37f   : > { %9017 = vst [vmem:[#allocation61_spill] sm:$0xff] %v7309_v30  ;;  %v1985_v32 = vadd.f32 %v1984_v3, %v1896_v12 }
 0x381   : > { %v2600_v17 = vmax.f32 %v1985_v32, 0.0 }
 0x382   : > { %v1361_v23 = vpop.f32.mrf.mxu3 }
 0x383   : > { %v7320_v24 = vpack.c.bf16 %v2600_v17, %v2596_v54  ;;  %v1362_v12 = vadd.f32 %v1361_v23, %v7071_v16  ;;  %v5067_v54 = vor.u32 %v5532_v35, %v5064_v28  ;;  %v7341_v17 = vpop.f32.mrf.mxu2  ;;  %v1904_v35 = vadd.f32 %v6894_v55, %v7291_v58 }
 0x384   : > { %9020 = vst [vmem:[#allocation64_spill] sm:$0xff] %v7341_v17  ;;  %v1906_v55 = vadd.f32 %v6901_v62, %v7291_v58 }
 0x385   : > { %v1433_v3 = vmax.f32 %v1362_v12, 0.0  ;;  %2509 = vmatpush.bf16.msrb.mxu3 %v5067_v54 }
 0x386   : > { %v1987_v32 = vpop.f32.mrf.mxu1  ;;  %v7325_v30 = vpop.f32.mrf.mxu0 }
 0x387   : > { %9019 = vst [vmem:[#allocation63_spill] sm:$0xff] %v7325_v30  ;;  %v7327_v53 = vpack.c.bf16 %v1433_v3, %v1431_v59  ;;  %v1988_v41 = vadd.f32 %v1987_v32, %v1899_v56  ;;  %2169 = vmatmul.bf16.gmra.mxu3 %v7161_v1  ;;  %2456 = vmatmul.bf16.gmra.mxu2 %v6828_v50 }
 0x389   : > { %2026 = vmatmul.bf16.gmra.mxu1 %v7327_v53  ;;  %2293 = vmatmul.bf16.gmra.mxu0 %v6873_v36  ;;  %v2604_v12 = vmax.f32 %v1988_v41, 0.0 }
 0x38a   : > { %v1364_v23 = vpop.f32.mrf.mxu3 }
 0x38b   : > { %v1365_v56 = vadd.f32 %v1364_v23, %v7071_v16  ;;  %v7353_v30 = vpop.f32.mrf.mxu2 }
 0x38c   : > { %9021 = vst [vmem:[#allocation65_spill] sm:$0xff] %v7353_v30 }
 0x38d   : > { %v1435_v28 = vmax.f32 %v1365_v56, 0.0 }
 0x38e   : > { %v1989_v50 = vpop.f32.mrf.mxu1  ;;  %v7343_v18 = vpop.f32.mrf.mxu0 }
 0x38f   : > { %v1990_v49 = vadd.f32 %v1989_v50, %v1901_v44 }
 0x391   : > { %v2608_v59 = vmax.f32 %v1990_v49, 0.0 }
 0x392   : > { %v1366_v3 = vpop.f32.mrf.mxu3 }
 0x393   : > { %v1367_v32 = vadd.f32 %v1366_v3, %v7071_v16  ;;  %v7347_v20 = vpack.c.bf16 %v2608_v59, %v2604_v12  ;;  %v7365_v56 = vpop.f32.mrf.mxu2 }
 0x394   : > { %9023 = vst [vmem:[#allocation67_spill] sm:$0xff] %v7365_v56 }
 0x395   : > { %v1437_v43 = vmax.f32 %v1367_v32, 0.0 }
 0x396   : > { %v1992_v54 = vpop.f32.mrf.mxu1  ;;  %v7351_v17 = vpop.f32.mrf.mxu0 }
 0x397   : > { %v7355_v44 = vpack.c.bf16 %v1437_v43, %v1435_v28  ;;  %v1993_v41 = vadd.f32 %v1992_v54, %v1904_v35  ;;  %2174 = vmatmul.bf16.gmra.mxu3 %v7183_v42  ;;  %2461 = vmatmul.bf16.gmra.mxu2 %v6841_v0  ;;  %v4998_v0 = vld [vmem:[%s8892_s7 + $0x128] sm:$0xf]  ;;  %v5518_v35 = vld [vmem:[%s8892_s7 + $0x134] sm:$0xf0] }
 0x398   : > { %v4999_v62 = vor.u32 %v5518_v35, %v4998_v0 }
 0x399   : > { %2031 = vmatmul.bf16.gmra.mxu1 %v7355_v44  ;;  %2298 = vmatmul.bf16.gmra.mxu0 %v6896_v57  ;;  %v2612_v59 = vmax.f32 %v1993_v41, 0.0  ;;  %v1909_v41 = vadd.f32 %v6905_v8, %v7291_v58  ;;  %v5528_v8 = vld [vmem:[%s8892_s7 + $0x18c] sm:$0xf] }
 0x39a   : > { %v1369_v23 = vpop.f32.mrf.mxu3  ;;  %2335 = vmatpush.bf16.msra.mxu1 %v4999_v62 }
 0x39b   : > { %v1370_v3 = vadd.f32 %v1369_v23, %v7071_v16  ;;  %v7393_v0 = vpop.f32.mrf.mxu2 }
 0x39c   : > { %9026 = vst [vmem:[#allocation70_spill] sm:$0xff] %v7393_v0 }
 0x39d   : > { %v1439_v23 = vmax.f32 %v1370_v3, 0.0 }
 0x39e   : > { %v1994_v50 = vpop.f32.mrf.mxu1  ;;  %v7363_v49 = vpop.f32.mrf.mxu0 }
 0x39f   : > { %9022 = vst [vmem:[#allocation66_spill] sm:$0xff] %v7363_v49  ;;  %v1995_v12 = vadd.f32 %v1994_v50, %v1906_v55 }
 0x3a1   : > { %v2616_v32 = vmax.f32 %v1995_v12, 0.0 }
 0x3a2   : > { %v1371_v28 = vpop.f32.mrf.mxu3 }
 0x3a3   : > { %v1372_v43 = vadd.f32 %v1371_v28, %v7071_v16  ;;  %v7375_v54 = vpack.c.bf16 %v2616_v32, %v2612_v59  ;;  %v5048_v59 = vld [vmem:[%s8892_s7 + $0x198] sm:$0xf0] }
 0x3a4   : > { %v5051_v32 = vor.u32 %v5528_v8, %v5048_v59  ;;  %v1914_v8 = vadd.f32 %v6932_v38, %v7291_v58  ;;  %v7405_v59 = vpop.f32.mrf.mxu2 }
 0x3a5   : > { %9024 = vst [vmem:[#allocation68_spill] sm:$0xff] %v7375_v54  ;;  %v1441_v55 = vmax.f32 %v1372_v43, 0.0 }
 0x3a6   : > { %v1997_v50 = vpop.f32.mrf.mxu1  ;;  %v7379_v12 = vpop.f32.mrf.mxu0  ;;  %2510 = vmatpush.bf16.msrb.mxu3 %v5051_v32  ;;  %9029 = vst [vmem:[#allocation73_spill] sm:$0xff] %v7405_v59 }
 0x3a7   : > { %9025 = vst [vmem:[#allocation69_spill] sm:$0xff] %v7379_v12  ;;  %v7381_v56 = vpack.c.bf16 %v1441_v55, %v1439_v23  ;;  %v1998_v30 = vadd.f32 %v1997_v50, %v1909_v41  ;;  %2179 = vmatmul.bf16.gmra.mxu3 %v7205_v4  ;;  %2466 = vmatmul.bf16.gmra.mxu2 %v6856_v13 }
 0x3a8   : > { %v1911_v13 = vadd.f32 %v6926_v19, %v7291_v58 }
 0x3a9   : > { %2036 = vmatmul.bf16.gmra.mxu1 %v7381_v56  ;;  %2303 = vmatmul.bf16.gmra.mxu0 %v6907_v9  ;;  %v2620_v43 = vmax.f32 %v1998_v30, 0.0 }
 0x3aa   : > { %v1374_v3 = vpop.f32.mrf.mxu3 }
 0x3ab   : > { %v1375_v41 = vadd.f32 %v1374_v3, %v7071_v16  ;;  %v5158_v3 = vld [vmem:[#allocation10 + $0x70] sm:$0xf] }
 0x3ad   : > { %v1443_v32 = vmax.f32 %v1375_v41, 0.0  ;;  %v5556_v41 = vld [vmem:[#allocation10 + $0x64] sm:$0xf0] }
 0x3ae   : > { %v1999_v35 = vpop.f32.mrf.mxu1  ;;  %v7397_v28 = vpop.f32.mrf.mxu0 }
 0x3af   : > { %9027 = vst [vmem:[#allocation71_spill] sm:$0xff] %v7397_v28  ;;  %v2000_v62 = vadd.f32 %v1999_v35, %v1911_v13  ;;  %v5558_v35 = vld [vmem:[#allocation10 + $0x74] sm:$0xf0] }
 0x3b1   : > { %v2624_v23 = vmax.f32 %v2000_v62, 0.0  ;;  %v5159_v62 = vor.u32 %v5558_v35, %v5158_v3 }
 0x3b2   : > { %v1376_v55 = vpop.f32.mrf.mxu3 }
 0x3b3   : > { %v1377_v50 = vadd.f32 %v1376_v55, %v7071_v16  ;;  %v7401_v12 = vpack.c.bf16 %v2624_v23, %v2620_v43  ;;  %3178 = vmatpush.bf16.msrb.mxu0 %v5159_v62  ;;  %v5150_v43 = vld [vmem:[#allocation10 + $0x60] sm:$0xf]  ;;  %v1916_v55 = vadd.f32 %v6953_v52, %v7291_v58  ;;  %v5514_v52 = vld [vmem:[%s8892_s7 + $0x114] sm:$0xf0] }
 0x3b4   : > { %v5151_v23 = vor.u32 %v5556_v41, %v5150_v43  ;;  %v4982_v43 = vld [vmem:[%s8892_s7 + $0x108] sm:$0xf] }
 0x3b5   : > { %9028 = vst [vmem:[#allocation72_spill] sm:$0xff] %v7401_v12  ;;  %v1445_v19 = vmax.f32 %v1377_v50, 0.0 }
 0x3b6   : > { %v2002_v0 = vpop.f32.mrf.mxu1  ;;  %v7407_v49 = vpop.f32.mrf.mxu0 }
 0x3b7   : > { %9030 = vst [vmem:[#allocation74_spill] sm:$0xff] %v7407_v49  ;;  %v7409_v13 = vpack.c.bf16 %v1445_v19, %v1443_v32  ;;  %v2003_v30 = vadd.f32 %v2002_v0, %v1914_v8  ;;  %2184 = vmatmul.bf16.gmra.mxu3 %v7225_v39  ;;  %2471 = vmatmul.bf16.gmra.mxu2 %v6873_v36  ;;  %v7419_v36 = vpop.f32.mrf.mxu2  ;;  %v5142_v32 = vld [vmem:[#allocation10 + $0x50] sm:$0xf]  ;;  %v5554_v19 = vld [vmem:[#allocation10 + $0x54] sm:$0xf0] }
 0x3b8   : > { %3179 = vmatpush.bf16.msrb.mxu0 %v5151_v23  ;;  %9032 = vst [vmem:[#allocation76_spill] sm:$0xff] %v7419_v36  ;;  %v5143_v3 = vor.u32 %v5554_v19, %v5142_v32  ;;  %v4983_v23 = vor.u32 %v5514_v52, %v4982_v43  ;;  %v5552_v36 = vld [vmem:[#allocation10 + $0x44] sm:$0xf0] }
 0x3b9   : > { %2041 = vmatmul.bf16.gmra.mxu1 %v7409_v13  ;;  %2308 = vmatmul.bf16.gmra.mxu0 %v6934_v40  ;;  %v2628_v35 = vmax.f32 %v2003_v30, 0.0 }
 0x3ba   : > { %v1379_v38 = vpop.f32.mrf.mxu3  ;;  %2336 = vmatpush.bf16.msra.mxu1 %v4983_v23 }
 0x3bb   : > { %v1380_v59 = vadd.f32 %v1379_v38, %v7071_v16  ;;  %v1919_v38 = vadd.f32 %v6971_v15, %v7291_v58  ;;  %v5524_v15 = vld [vmem:[%s8892_s7 + $0x16c] sm:$0xf] }
 0x3bc   : > { %3180 = vmatpush.bf16.msrb.mxu0 %v5143_v3 }
 0x3be   : > { %v2004_v0 = vpop.f32.mrf.mxu1  ;;  %v7417_v50 = vpop.f32.mrf.mxu0 }
 0x3bf   : > { %9031 = vst [vmem:[#allocation75_spill] sm:$0xff] %v7417_v50  ;;  %v2005_v8 = vadd.f32 %v2004_v0, %v1916_v55  ;;  %v5134_v0 = vld [vmem:[#allocation10 + $0x40] sm:$0xf] }
 0x3c0   : > { %v5135_v30 = vor.u32 %v5552_v36, %v5134_v0  ;;  %v7439_v36 = vpop.f32.mrf.mxu2 }
 0x3c1   : > { %v2632_v62 = vmax.f32 %v2005_v8, 0.0  ;;  %v1447_v8 = vmax.f32 %v1380_v59, 0.0  ;;  %9034 = vst [vmem:[#allocation78_spill] sm:$0xff] %v7439_v36  ;;  %v5032_v59 = vld [vmem:[%s8892_s7 + $0x178] sm:$0xf0] }
 0x3c2   : > { %v1381_v41 = vpop.f32.mrf.mxu3  ;;  %3181 = vmatpush.bf16.msrb.mxu0 %v5135_v30  ;;  %v5035_v52 = vor.u32 %v5524_v15, %v5032_v59 }
 0x3c3   : > { %v1382_v55 = vadd.f32 %v1381_v41, %v7071_v16  ;;  %v7429_v32 = vpack.c.bf16 %v2632_v62, %v2628_v35  ;;  %v5126_v35 = vld [vmem:[#allocation10 + $0x30] sm:$0xf]  ;;  %v5550_v62 = vld [vmem:[#allocation10 + $0x34] sm:$0xf0]  ;;  %v5548_v41 = vld [vmem:[#allocation10 + $0x24] sm:$0xf0] }
 0x3c4   : > { %v5127_v43 = vor.u32 %v5550_v62, %v5126_v35  ;;  %2511 = vmatpush.bf16.msrb.mxu3 %v5035_v52 }
 0x3c5   : > { %9033 = vst [vmem:[#allocation77_spill] sm:$0xff] %v7429_v32  ;;  %v1449_v19 = vmax.f32 %v1382_v55, 0.0  ;;  %v1921_v55 = vadd.f32 %v7004_v60, %v7291_v58  ;;  %v5544_v60 = vld [vmem:[#allocation10 + $0x4] sm:$0xf0] }
 0x3c6   : > { %v2007_v50 = vpop.f32.mrf.mxu1  ;;  %v7433_v49 = vpop.f32.mrf.mxu0  ;;  %3182 = vmatpush.bf16.msrb.mxu0 %v5127_v43 }
 0x3c7   : > { %v7435_v28 = vpack.c.bf16 %v1449_v19, %v1447_v8  ;;  %v2008_v3 = vadd.f32 %v2007_v50, %v1919_v38  ;;  %2189 = vmatmul.bf16.gmra.mxu3 %v7247_v61  ;;  %2476 = vmatmul.bf16.gmra.mxu2 %v6896_v57  ;;  %v5118_v57 = vld [vmem:[#allocation10 + $0x20] sm:$0xf]  ;;  %v5110_v8 = vld [vmem:[#allocation10 + $0x10] sm:$0xf]  ;;  %v5546_v19 = vld [vmem:[#allocation10 + $0x14] sm:$0xf0] }
 0x3c8   : > { %v5119_v23 = vor.u32 %v5548_v41, %v5118_v57  ;;  %v5111_v35 = vor.u32 %v5546_v19, %v5110_v8  ;;  %v7454_v59 = vpop.f32.mrf.mxu2  ;;  %v5102_v57 = vld [vmem:[#allocation10] sm:$0xf] }
 0x3c9   : > { %2046 = vmatmul.bf16.gmra.mxu1 %v7435_v28  ;;  %2313 = vmatmul.bf16.gmra.mxu0 %v6973_v21  ;;  %v2636_v62 = vmax.f32 %v2008_v3, 0.0 }
 0x3ca   : > { %v1384_v50 = vpop.f32.mrf.mxu3  ;;  %3183 = vmatpush.bf16.msrb.mxu0 %v5119_v23  ;;  %v1924_v23 = vadd.f32 %v7022_v33, %v7291_v58  ;;  %v1926_v33 = vadd.f32 %v7031_v5, %v7291_v58  ;;  %v7480_v5 = vperm.slane %v7284_v48, 1  ;;  %v5016_v48 = vld [vmem:[%s8892_s7 + $0x158] sm:$0xf0] }
 0x3cb   : > { %v1385_v36 = vadd.f32 %v1384_v50, %v7071_v16 }
 0x3ce   : > { %v2009_v0 = vpop.f32.mrf.mxu1  ;;  %v7451_v30 = vpop.f32.mrf.mxu0  ;;  %3184 = vmatpush.bf16.msrb.mxu0 %v5111_v35 }
 0x3cf   : > { %9035 = vst [vmem:[#allocation79_spill] sm:$0xff] %v7451_v30  ;;  %v2010_v38 = vadd.f32 %v2009_v0, %v1921_v55  ;;  %v5103_v30 = vor.u32 %v5544_v60, %v5102_v57  ;;  %v1451_v55 = vmax.f32 %v1385_v36, 0.0  ;;  %v5222_v57 = vld [vmem:[#allocation10 + $0xf0] sm:$0xf] }
 0x3d0   : > { %v7471_v36 = vpop.f32.mrf.mxu2 }
 0x3d1   : > { %v2640_v15 = vmax.f32 %v2010_v38, 0.0  ;;  %9037 = vst [vmem:[#allocation81_spill] sm:$0xff] %v7471_v36 }
 0x3d2   : > { %v1386_v43 = vpop.f32.mrf.mxu3  ;;  %3185 = vmatpush.bf16.msrb.mxu0 %v5103_v30 }
 0x3d3   : > { %v1387_v52 = vadd.f32 %v1386_v43, %v7071_v16  ;;  %v7457_v41 = vpack.c.bf16 %v2640_v15, %v2636_v62 }
 0x3d5   : > { %9036 = vst [vmem:[#allocation80_spill] sm:$0xff] %v7457_v41  ;;  %v1453_v0 = vmax.f32 %v1387_v52, 0.0 }
 0x3d6   : > { %v2012_v3 = vpop.f32.mrf.mxu1  ;;  %v7461_v8 = vpop.f32.mrf.mxu0 }
 0x3d7   : > { %v7463_v50 = vpack.c.bf16 %v1453_v0, %v1451_v55  ;;  %v2013_v38 = vadd.f32 %v2012_v3, %v1924_v23  ;;  %2194 = vmatmul.bf16.gmra.mxu3 %v7269_v2  ;;  %2481 = vmatmul.bf16.gmra.mxu2 %v6907_v9  ;;  %v5574_v9 = vld [vmem:[#allocation10 + $0xf4] sm:$0xf0]  ;;  %v1929_v3 = vadd.f32 %v7049_v10, %v7291_v58 }
 0x3d8   : > { %v5223_v23 = vor.u32 %v5574_v9, %v5222_v57  ;;  %v5520_v10 = vld [vmem:[%s8892_s7 + $0x14c] sm:$0xf] }
 0x3d9   : > { %2051 = vmatmul.bf16.gmra.mxu1 %v7463_v50  ;;  %2318 = vmatmul.bf16.gmra.mxu0 %v7024_v37  ;;  %v2644_v15 = vmax.f32 %v2013_v38, 0.0 }
 0x3da   : > { %v1389_v19 = vpop.f32.mrf.mxu3  ;;  %3267 = vmatpush.bf16.msrb.mxu1 %v5223_v23  ;;  %v2074_v23 = vadd.f32 %v6929_v27, %v7480_v5  ;;  %v2077_v27 = vadd.f32 %v6945_v47, %v7480_v5 }
 0x3db   : > { %v1390_v43 = vadd.f32 %v1389_v19, %v7071_v16 }
 0x3de   : > { %v2014_v35 = vpop.f32.mrf.mxu1  ;;  %v7473_v62 = vpop.f32.mrf.mxu0 }
 0x3df   : > { %v2015_v30 = vadd.f32 %v2014_v35, %v1926_v33  ;;  %v1455_v33 = vmax.f32 %v1390_v43, 0.0  ;;  %v5019_v43 = vor.u32 %v5520_v10, %v5016_v48 }
 0x3e1   : > { %v2648_v52 = vmax.f32 %v2015_v30, 0.0  ;;  %v7486_v30 = vpop.f32.mrf.mxu2  ;;  %2512 = vmatpush.bf16.msrb.mxu3 %v5019_v43 }
 0x3e2   : > { %v1391_v60 = vpop.f32.mrf.mxu3  ;;  %9039 = vst [vmem:[#allocation83_spill] sm:$0xff] %v7486_v30 }
 0x3e3   : > { %v1392_v55 = vadd.f32 %v1391_v60, %v7071_v16  ;;  %v7477_v0 = vpack.c.bf16 %v2648_v52, %v2644_v15  ;;  %v2072_v16 = vadd.f32 %v6918_v14, %v7480_v5 }
 0x3e5   : > { %9038 = vst [vmem:[#allocation82_spill] sm:$0xff] %v7477_v0  ;;  %v1457_v38 = vmax.f32 %v1392_v55, 0.0 }
 0x3e6   : > { %v2017_v35 = vpop.f32.mrf.mxu1  ;;  %v7484_v19 = vpop.f32.mrf.mxu0 }
 0x3e7   : > { %v7488_v36 = vpack.c.bf16 %v1457_v38, %v1455_v33  ;;  %v2018_v57 = vadd.f32 %v2017_v35, %v1929_v3  ;;  %2199 = vmatmul.bf16.gmra.mxu3 %v7299_v22  ;;  %2486 = vmatmul.bf16.gmra.mxu2 %v6934_v40  ;;  %v1931_v40 = vadd.f32 %v7079_v63, %v7291_v58 }
 0x3e9   : > { %2056 = vmatmul.bf16.gmra.mxu1 %v7488_v36  ;;  %2323 = vmatmul.bf16.gmra.mxu0 %v7051_v34  ;;  %v7508_v55 = vpop.f32.mrf.mxu2  ;;  %v2652_v3 = vmax.f32 %v2018_v57, 0.0 }
 0x3ea   : > { %v2160_v15 = vpop.f32.mrf.mxu3 }
 0x3eb   : > { %v2161_v52 = vadd.f32 %v2160_v15, %v2072_v16  ;;  %v1934_v16 = vadd.f32 %v7097_v46, %v7291_v58 }
 0x3ed   : > { %v2597_v10 = vmax.f32 %v2161_v52, 0.0 }
 0x3ee   : > { %v2019_v14 = vpop.f32.mrf.mxu1  ;;  %v7504_v9 = vpop.f32.mrf.mxu0 }
 0x3ef   : > { %v2020_v60 = vadd.f32 %v2019_v14, %v1931_v40  ;;  %v1936_v14 = vadd.f32 %v7119_v25, %v7291_v58  ;;  %v1939_v25 = vadd.f32 %v7137_v31, %v7291_v58  ;;  %v5516_v31 = vld [vmem:[%s8892_s7 + $0x12c] sm:$0xf] }
 0x3f1   : > { %v2656_v33 = vmax.f32 %v2020_v60, 0.0  ;;  %v7524_v57 = vpop.f32.mrf.mxu2 }
 0x3f2   : > { %v2162_v38 = vpop.f32.mrf.mxu3  ;;  %9042 = vst [vmem:[#allocation86_spill] sm:$0xff] %v7524_v57 }
 0x3f3   : > { %v2163_v35 = vadd.f32 %v2162_v38, %v2074_v23  ;;  %v7510_v30 = vpack.c.bf16 %v2656_v33, %v2652_v3  ;;  %v5214_v38 = vld [vmem:[#allocation10 + $0xe0] sm:$0xf] }
 0x3f5   : > { %9040 = vst [vmem:[#allocation84_spill] sm:$0xff] %v7510_v30  ;;  %v2601_v63 = vmax.f32 %v2163_v35, 0.0  ;;  %v5572_v35 = vld [vmem:[#allocation10 + $0xe4] sm:$0xf0] }
 0x3f6   : > { %v2022_v48 = vpop.f32.mrf.mxu1  ;;  %v7514_v15 = vpop.f32.mrf.mxu0 }
 0x3f7   : > { %v7516_v43 = vpack.c.bf16 %v2601_v63, %v2597_v10  ;;  %v2023_v40 = vadd.f32 %v2022_v48, %v1934_v16  ;;  %2204 = vmatmul.bf16.gmra.mxu3 %v7327_v53  ;;  %2491 = vmatmul.bf16.gmra.mxu2 %v6973_v21  ;;  %v2079_v21 = vadd.f32 %v6962_v6, %v7480_v5 }
 0x3f8   : > { %v5215_v10 = vor.u32 %v5572_v35, %v5214_v38 }
 0x3f9   : > { %9041 = vst [vmem:[#allocation85_spill] sm:$0xff] %v7516_v43  ;;  %2337 = vmatmul.bf16.vlgmr.msra.gmra.mxu1 %v7099_v51  ;;  %3186 = vmatmul.bf16.vlgmr.msrb.gmra.mxu0 %v7320_v24  ;;  %v2660_v33 = vmax.f32 %v2023_v40, 0.0 }
 0x3fa   : > { %v2165_v46 = vpop.f32.mrf.mxu3  ;;  %3268 = vmatpush.bf16.msrb.mxu1 %v5215_v10  ;;  %v2084_v10 = vadd.f32 %v7013_v26, %v7480_v5 }
 0x3fb   : > { %v2166_v52 = vadd.f32 %v2165_v46, %v2077_v27  ;;  %v7536_v27 = vpop.f32.mrf.mxu2 }
 0x3fd   : > { %v2605_v46 = vmax.f32 %v2166_v52, 0.0  ;;  %v5000_v52 = vld [vmem:[%s8892_s7 + $0x138] sm:$0xf0] }
 0x3fe   : > { %v2024_v60 = vpop.f32.mrf.mxu1  ;;  %v7528_v23 = vpop.f32.mrf.mxu0 }
 0x3ff   : > { %v2025_v3 = vadd.f32 %v2024_v60, %v1936_v14 }
 0x401   : > { %v2664_v47 = vmax.f32 %v2025_v3, 0.0  ;;  %v2082_v3 = vadd.f32 %v6996_v45, %v7480_v5 }
 0x402   : > { %v2167_v16 = vpop.f32.mrf.mxu3 }
 0x403   : > { %v2168_v63 = vadd.f32 %v2167_v16, %v2079_v21  ;;  %v7532_v48 = vpack.c.bf16 %v2664_v47, %v2660_v33  ;;  %v5003_v33 = vor.u32 %v5516_v31, %v5000_v52  ;;  %v1941_v47 = vadd.f32 %v7153_v29, %v7291_v58  ;;  %v7558_v35 = vpop.f32.mrf.mxu2 }
 0x404   : > { %9045 = vst [vmem:[#allocation89_spill] sm:$0xff] %v7558_v35 }
 0x405   : > { %9043 = vst [vmem:[#allocation87_spill] sm:$0xff] %v7532_v48  ;;  %v2609_v14 = vmax.f32 %v2168_v63, 0.0  ;;  %2513 = vmatpush.bf16.msrb.mxu3 %v5003_v33 }
 0x406   : > { %v2027_v60 = vpop.f32.mrf.mxu1  ;;  %v7538_v57 = vpop.f32.mrf.mxu0 }
 0x407   : > { %v2028_v6 = vadd.f32 %v2027_v60, %v1939_v25  ;;  %2209 = vmatmul.bf16.gmra.mxu3 %v7355_v44  ;;  %2496 = vmatmul.bf16.gmra.mxu2 %v7024_v37  ;;  %v7542_v40 = vpack.c.bf16 %v2609_v14, %v2605_v46 }
 0x409   : > { %9044 = vst [vmem:[#allocation88_spill] sm:$0xff] %v7542_v40  ;;  %2342 = vmatmul.bf16.gmra.mxu1 %v7139_v7  ;;  %3191 = vmatmul.bf16.gmra.mxu0 %v7347_v20  ;;  %v2668_v63 = vmax.f32 %v2028_v6, 0.0  ;;  %v9049_v6 = vld [vmem:[#allocation30_spill] sm:$0xff] }
 0x40a   : > { %v2170_v21 = vpop.f32.mrf.mxu3 }
 0x40b   : > { %v2171_v37 = vadd.f32 %v2170_v21, %v2082_v3  ;;  %v1944_v3 = vadd.f32 %v7159_v11, %v7291_v58 }
 0x40d   : > { %v2613_v31 = vmax.f32 %v2171_v37, 0.0 }
 0x40e   : > { %v2029_v45 = vpop.f32.mrf.mxu1  ;;  %v7556_v38 = vpop.f32.mrf.mxu0 }
 0x40f   : > { %v2030_v16 = vadd.f32 %v2029_v45, %v1941_v47  ;;  %v2087_v47 = vadd.f32 %v9049_v6, %v7480_v5  ;;  %v7574_v45 = vpop.f32.mrf.mxu2 }
 0x410   : > { %9050 = vst [vmem:[#allocation30_spill] sm:$0xff] %v7574_v45 }
 0x411   : > { %v2672_v25 = vmax.f32 %v2030_v16, 0.0  ;;  %v9051_v16 = vld [vmem:[#allocation39_spill] sm:$0xff] }
 0x412   : > { %v2172_v46 = vpop.f32.mrf.mxu3 }
 0x413   : > { %v2173_v14 = vadd.f32 %v2172_v46, %v2084_v10  ;;  %v7562_v60 = vpack.c.bf16 %v2672_v25, %v2668_v63  ;;  %v1946_v10 = vadd.f32 %v9051_v16, %v7291_v58  ;;  %v9053_v46 = vld [vmem:[#allocation31_spill] sm:$0xff] }
 0x415   : > { %9046 = vst [vmem:[#allocation90_spill] sm:$0xff] %v7562_v60  ;;  %v2617_v29 = vmax.f32 %v2173_v14, 0.0  ;;  %v2089_v14 = vadd.f32 %v9053_v46, %v7480_v5  ;;  %v9059_v46 = vld [vmem:[#allocation32_spill] sm:$0xff] }
 0x416   : > { %v2032_v52 = vpop.f32.mrf.mxu1  ;;  %v7566_v21 = vpop.f32.mrf.mxu0 }
 0x417   : > { %9047 = vst [vmem:[#allocation91_spill] sm:$0xff] %v7566_v21  ;;  %v2033_v33 = vadd.f32 %v2032_v52, %v1944_v3  ;;  %2214 = vmatmul.bf16.gmra.mxu3 %v7381_v56  ;;  %2501 = vmatmul.bf16.gmra.mxu2 %v7051_v34  ;;  %v7570_v26 = vpack.c.bf16 %v2617_v29, %v2613_v31  ;;  %v5206_v29 = vld [vmem:[#allocation10 + $0xd0] sm:$0xf]  ;;  %v5570_v52 = vld [vmem:[#allocation10 + $0xd4] sm:$0xf0]  ;;  %v7584_v35 = vpop.f32.mrf.mxu2 }
 0x418   : > { %v5207_v45 = vor.u32 %v5570_v52, %v5206_v29  ;;  %9054 = vst [vmem:[#allocation31_spill] sm:$0xff] %v7584_v35  ;;  %v2092_v29 = vadd.f32 %v9059_v46, %v7480_v5 }
 0x419   : > { %9048 = vst [vmem:[#allocation92_spill] sm:$0xff] %v7570_v26  ;;  %2347 = vmatmul.bf16.gmra.mxu1 %v7161_v1  ;;  %3196 = vmatmul.bf16.gmra.mxu0 %v7375_v54  ;;  %v2676_v3 = vmax.f32 %v2033_v33, 0.0 }
 0x41a   : > { %v2175_v11 = vpop.f32.mrf.mxu3  ;;  %3269 = vmatpush.bf16.msrb.mxu1 %v5207_v45  ;;  %v5512_v45 = vld [vmem:[%s8892_s7 + $0x10c] sm:$0xf] }
 0x41b   : > { %v2176_v37 = vadd.f32 %v2175_v11, %v2087_v47  ;;  %v9056_v11 = vld [vmem:[#allocation41_spill] sm:$0xff] }
 0x41c   : > { %v1949_v16 = vadd.f32 %v9056_v11, %v7291_v58 }
 0x41e   : > { %v2034_v63 = vpop.f32.mrf.mxu1  ;;  %v7580_v25 = vpop.f32.mrf.mxu0 }
 0x41f   : > { %9052 = vst [vmem:[#allocation39_spill] sm:$0xff] %v7580_v25  ;;  %v2035_v34 = vadd.f32 %v2034_v63, %v1946_v10  ;;  %v2621_v25 = vmax.f32 %v2176_v37, 0.0  ;;  %v7607_v52 = vpop.f32.mrf.mxu2 }
 0x420   : > { %9061 = vst [vmem:[#allocation32_spill] sm:$0xff] %v7607_v52 }
 0x421   : > { %v2680_v31 = vmax.f32 %v2035_v34, 0.0 }
 0x422   : > { %v2177_v6 = vpop.f32.mrf.mxu3 }
 0x423   : > { %v2178_v21 = vadd.f32 %v2177_v6, %v2089_v14  ;;  %v7586_v47 = vpack.c.bf16 %v2680_v31, %v2676_v3 }
 0x425   : > { %9055 = vst [vmem:[#allocation93_spill] sm:$0xff] %v7586_v47  ;;  %v2625_v10 = vmax.f32 %v2178_v21, 0.0  ;;  %v4984_v21 = vld [vmem:[%s8892_s7 + $0x118] sm:$0xf0] }
 0x426   : > { %v2037_v63 = vpop.f32.mrf.mxu1  ;;  %v7590_v54 = vpop.f32.mrf.mxu0  ;;  %v4987_v14 = vor.u32 %v5512_v45, %v4984_v21 }
 0x427   : > { %9057 = vst [vmem:[#allocation41_spill] sm:$0xff] %v7590_v54  ;;  %v2038_v33 = vadd.f32 %v2037_v63, %v1949_v16  ;;  %2219 = vmatmul.bf16.gmra.mxu3 %v7409_v13  ;;  %v7593_v34 = vpack.c.bf16 %v2625_v10, %v2621_v25  ;;  %v9060_v25 = vld [vmem:[#allocation43_spill] sm:$0xff]  ;;  %v9063_v10 = vld [vmem:[#allocation33_spill] sm:$0xff]  ;;  %v7619_v52 = vpop.f32.mrf.mxu2 }
 0x428   : > { %2514 = vmatpush.bf16.msrb.mxu3 %v4987_v14  ;;  %v1951_v31 = vadd.f32 %v9060_v25, %v7291_v58  ;;  %v2094_v63 = vadd.f32 %v9063_v10, %v7480_v5  ;;  %9067 = vst [vmem:[#allocation95_spill] sm:$0xff] %v7619_v52  ;;  %v5568_v52 = vld [vmem:[#allocation10 + $0xc4] sm:$0xf0] }
 0x429   : > { %9058 = vst [vmem:[#allocation94_spill] sm:$0xff] %v7593_v34  ;;  %2352 = vmatmul.bf16.gmra.mxu1 %v7183_v42  ;;  %3201 = vmatmul.bf16.gmra.mxu0 %v7401_v12  ;;  %v2684_v46 = vmax.f32 %v2038_v33, 0.0  ;;  %v9069_v33 = vld [vmem:[#allocation34_spill] sm:$0xff] }
 0x42a   : > { %v2180_v37 = vpop.f32.mrf.mxu3 }
 0x42b   : > { %v2181_v3 = vadd.f32 %v2180_v37, %v2092_v29  ;;  %v9065_v29 = vld [vmem:[#allocation45_spill] sm:$0xff] }
 0x42c   : > { %v1954_v45 = vadd.f32 %v9065_v29, %v7291_v58  ;;  %v9072_v29 = vld [vmem:[#allocation35_spill] sm:$0xff] }
 0x42d   : > { %v2629_v21 = vmax.f32 %v2181_v3, 0.0 }
 0x42e   : > { %v2039_v6 = vpop.f32.mrf.mxu1  ;;  %v7609_v11 = vpop.f32.mrf.mxu0 }
 0x42f   : > { %9062 = vst [vmem:[#allocation43_spill] sm:$0xff] %v7609_v11  ;;  %v2040_v16 = vadd.f32 %v2039_v6, %v1951_v31 }
 0x431   : > { %v2688_v35 = vmax.f32 %v2040_v16, 0.0 }
 0x432   : > { %v2182_v54 = vpop.f32.mrf.mxu3 }
 0x433   : > { %v2183_v12 = vadd.f32 %v2182_v54, %v2094_v63  ;;  %v7613_v34 = vpack.c.bf16 %v2688_v35, %v2684_v46  ;;  %v2097_v54 = vadd.f32 %v9069_v33, %v7480_v5  ;;  %v5198_v33 = vld [vmem:[#allocation10 + $0xc0] sm:$0xf] }
 0x435   : > { %9064 = vst [vmem:[#allocation33_spill] sm:$0xff] %v7613_v34  ;;  %v2633_v37 = vmax.f32 %v2183_v12, 0.0  ;;  %v9070_v12 = vld [vmem:[#allocation47_spill] sm:$0xff] }
 0x436   : > { %v2042_v14 = vpop.f32.mrf.mxu1  ;;  %v7617_v25 = vpop.f32.mrf.mxu0  ;;  %v1956_v16 = vadd.f32 %v9070_v12, %v7291_v58 }
 0x437   : > { %9066 = vst [vmem:[#allocation45_spill] sm:$0xff] %v7617_v25  ;;  %v2043_v31 = vadd.f32 %v2042_v14, %v1954_v45  ;;  %2224 = vmatmul.bf16.gmra.mxu3 %v7435_v28  ;;  %v7622_v6 = vpack.c.bf16 %v2633_v37, %v2629_v21  ;;  %v2099_v45 = vadd.f32 %v9072_v29, %v7480_v5  ;;  %v7634_v21 = vpop.f32.mrf.mxu2 }
 0x438   : > { %9073 = vst [vmem:[#allocation47_spill] sm:$0xff] %v7634_v21 }
 0x439   : > { %9068 = vst [vmem:[#allocation96_spill] sm:$0xff] %v7622_v6  ;;  %2357 = vmatmul.bf16.gmra.mxu1 %v7205_v4  ;;  %3206 = vmatmul.bf16.gmra.mxu0 %v7429_v32  ;;  %v2692_v37 = vmax.f32 %v2043_v31, 0.0  ;;  %v5199_v32 = vor.u32 %v5568_v52, %v5198_v33  ;;  %v5278_v52 = vld [vmem:[#allocation10 + $0x160] sm:$0xf] }
 0x43a   : > { %v2185_v35 = vpop.f32.mrf.mxu3 }
 0x43b   : > { %v2186_v3 = vadd.f32 %v2185_v35, %v2097_v54  ;;  %v5286_v54 = vld [vmem:[#allocation10 + $0x170] sm:$0xf]  ;;  %v5590_v35 = vld [vmem:[#allocation10 + $0x174] sm:$0xf0]  ;;  %3270 = vmatpush.bf16.msrb.mxu1 %v5199_v32 }
 0x43c   : > { %v5287_v12 = vor.u32 %v5590_v35, %v5286_v54  ;;  %v9078_v32 = vld [vmem:[#allocation36_spill] sm:$0xff]  ;;  %v5270_v35 = vld [vmem:[#allocation10 + $0x150] sm:$0xf] }
 0x43e   : > { %v2044_v10 = vpop.f32.mrf.mxu1  ;;  %v7630_v63 = vpop.f32.mrf.mxu0  ;;  %3356 = vmatpush.bf16.msrb.mxu2 %v5287_v12  ;;  %v5586_v12 = vld [vmem:[#allocation10 + $0x154] sm:$0xf0] }
 0x43f   : > { %9071 = vst [vmem:[#allocation34_spill] sm:$0xff] %v7630_v63  ;;  %v2045_v46 = vadd.f32 %v2044_v10, %v1956_v16  ;;  %v9075_v16 = vld [vmem:[#allocation48_spill] sm:$0xff]  ;;  %v2637_v63 = vmax.f32 %v2186_v3, 0.0 }
 0x440   : > { %v1959_v10 = vadd.f32 %v9075_v16, %v7291_v58  ;;  %v5606_v3 = vld [vmem:[#allocation10 + $0x1f4] sm:$0xf0]  ;;  %v9080_v16 = vld [vmem:[#allocation50_spill] sm:$0xff] }
 0x441   : > { %v2696_v14 = vmax.f32 %v2045_v46, 0.0 }
 0x442   : > { %v2187_v25 = vpop.f32.mrf.mxu3 }
 0x443   : > { %v2188_v6 = vadd.f32 %v2187_v25, %v2099_v45  ;;  %v7636_v11 = vpack.c.bf16 %v2696_v14, %v2692_v37  ;;  %v5588_v25 = vld [vmem:[#allocation10 + $0x164] sm:$0xf0]  ;;  %v2102_v37 = vadd.f32 %v9078_v32, %v7480_v5  ;;  %v5262_v32 = vld [vmem:[#allocation10 + $0x140] sm:$0xf] }
 0x444   : > { %v5279_v45 = vor.u32 %v5588_v25, %v5278_v52 }
 0x445   : > { %9074 = vst [vmem:[#allocation35_spill] sm:$0xff] %v7636_v11  ;;  %v2641_v29 = vmax.f32 %v2188_v6, 0.0  ;;  %v5350_v6 = vld [vmem:[#allocation10 + $0x1f0] sm:$0xf] }
 0x446   : > { %v2047_v26 = vpop.f32.mrf.mxu1  ;;  %v7640_v21 = vpop.f32.mrf.mxu0  ;;  %v5351_v33 = vor.u32 %v5606_v3, %v5350_v6  ;;  %3357 = vmatpush.bf16.msrb.mxu2 %v5279_v45  ;;  %v9082_v45 = vld [vmem:[#allocation37_spill] sm:$0xff] }
 0x447   : > { %9076 = vst [vmem:[#allocation48_spill] sm:$0xff] %v7640_v21  ;;  %v2048_v31 = vadd.f32 %v2047_v26, %v1959_v10  ;;  %2229 = vmatmul.bf16.gmra.mxu3 %v7463_v50  ;;  %v7643_v46 = vpack.c.bf16 %v2641_v29, %v2637_v63  ;;  %v7649_v26 = vpop.f32.mrf.mxu2  ;;  %v5271_v63 = vor.u32 %v5586_v12, %v5270_v35  ;;  %v5584_v21 = vld [vmem:[#allocation10 + $0x144] sm:$0xf0]  ;;  %v5254_v35 = vld [vmem:[#allocation10 + $0x130] sm:$0xf] }
 0x448   : > { %9079 = vst [vmem:[#allocation36_spill] sm:$0xff] %v7649_v26  ;;  %3445 = vmatpush.bf16.msra.mxu3 %v5351_v33  ;;  %v1961_v10 = vadd.f32 %v9080_v16, %v7291_v58  ;;  %v2104_v6 = vadd.f32 %v9082_v45, %v7480_v5  ;;  %v5582_v12 = vld [vmem:[#allocation10 + $0x134] sm:$0xf0] }
 0x449   : > { %9077 = vst [vmem:[#allocation97_spill] sm:$0xff] %v7643_v46  ;;  %2362 = vmatmul.bf16.gmra.mxu1 %v7225_v39  ;;  %3211 = vmatmul.bf16.gmra.mxu0 %v7457_v41  ;;  %v5263_v41 = vor.u32 %v5584_v21, %v5262_v32  ;;  %v2700_v3 = vmax.f32 %v2048_v31, 0.0  ;;  %v5255_v16 = vor.u32 %v5582_v12, %v5254_v35  ;;  %v9089_v12 = vld [vmem:[#allocation54_spill] sm:$0xff] }
 0x44a   : > { %v2190_v14 = vpop.f32.mrf.mxu3  ;;  %3358 = vmatpush.bf16.msrb.mxu2 %v5271_v63 }
 0x44b   : > { %v2191_v54 = vadd.f32 %v2190_v14, %v2102_v37 }
 0x44e   : > { %v2049_v29 = vpop.f32.mrf.mxu1  ;;  %v7653_v52 = vpop.f32.mrf.mxu0  ;;  %3359 = vmatpush.bf16.msrb.mxu2 %v5263_v41  ;;  %v5246_v41 = vld [vmem:[#allocation10 + $0x120] sm:$0xf] }
 0x44f   : > { %9081 = vst [vmem:[#allocation50_spill] sm:$0xff] %v7653_v52  ;;  %v2050_v25 = vadd.f32 %v2049_v29, %v1961_v10  ;;  %v9084_v52 = vld [vmem:[#allocation52_spill] sm:$0xff]  ;;  %v7661_v10 = vpop.f32.mrf.mxu2  ;;  %v2645_v29 = vmax.f32 %v2191_v54, 0.0 }
 0x450   : > { %v1964_v63 = vadd.f32 %v9084_v52, %v7291_v58  ;;  %9085 = vst [vmem:[#allocation52_spill] sm:$0xff] %v7661_v10 }
 0x451   : > { %v2704_v37 = vmax.f32 %v2050_v25, 0.0  ;;  %v5580_v25 = vld [vmem:[#allocation10 + $0x124] sm:$0xf0] }
 0x452   : > { %v2192_v14 = vpop.f32.mrf.mxu3  ;;  %3360 = vmatpush.bf16.msrb.mxu2 %v5255_v16  ;;  %v1966_v16 = vadd.f32 %v9089_v12, %v7291_v58  ;;  %v5566_v12 = vld [vmem:[#allocation10 + $0xb4] sm:$0xf0] }
 0x453   : > { %v2193_v33 = vadd.f32 %v2192_v14, %v2104_v6  ;;  %v7657_v26 = vpack.c.bf16 %v2704_v37, %v2700_v3  ;;  %v5247_v6 = vor.u32 %v5580_v25, %v5246_v41  ;;  %v9088_v3 = vld [vmem:[#allocation38_spill] sm:$0xff]  ;;  %v5238_v14 = vld [vmem:[#allocation10 + $0x110] sm:$0xf]  ;;  %v5230_v41 = vld [vmem:[#allocation10 + $0x100] sm:$0xf] }
 0x454   : > { %v2107_v37 = vadd.f32 %v9088_v3, %v7480_v5  ;;  %v5576_v25 = vld [vmem:[#allocation10 + $0x104] sm:$0xf0] }
 0x455   : > { %9083 = vst [vmem:[#allocation37_spill] sm:$0xff] %v7657_v26  ;;  %v2649_v21 = vmax.f32 %v2193_v33, 0.0  ;;  %v5578_v33 = vld [vmem:[#allocation10 + $0x114] sm:$0xf0]  ;;  %v5231_v3 = vor.u32 %v5576_v25, %v5230_v41 }
 0x456   : > { %v2052_v32 = vpop.f32.mrf.mxu1  ;;  %v7663_v46 = vpop.f32.mrf.mxu0  ;;  %3361 = vmatpush.bf16.msrb.mxu2 %v5247_v6  ;;  %v5239_v35 = vor.u32 %v5578_v33, %v5238_v14  ;;  %v5190_v33 = vld [vmem:[#allocation10 + $0xb0] sm:$0xf] }
 0x457   : > { %9086 = vst [vmem:[#allocation98_spill] sm:$0xff] %v7663_v46  ;;  %v2053_v31 = vadd.f32 %v2052_v32, %v1964_v63  ;;  %2234 = vmatmul.bf16.gmra.mxu3 %v7488_v36  ;;  %v7666_v45 = vpack.c.bf16 %v2649_v21, %v2645_v29  ;;  %v7676_v21 = vpop.f32.mrf.mxu2  ;;  %v9092_v46 = vld [vmem:[#allocation40_spill] sm:$0xff] }
 0x458   : > { %9091 = vst [vmem:[#allocation54_spill] sm:$0xff] %v7676_v21  ;;  %v2109_v6 = vadd.f32 %v9092_v46, %v7480_v5 }
 0x459   : > { %9087 = vst [vmem:[#allocation99_spill] sm:$0xff] %v7666_v45  ;;  %2367 = vmatmul.bf16.gmra.mxu1 %v7247_v61  ;;  %3216 = vmatmul.bf16.gmra.mxu0 %v7477_v0 }
 0x45a   : > { %v2195_v54 = vpop.f32.mrf.mxu3  ;;  %3362 = vmatpush.bf16.msrb.mxu2 %v5239_v35  ;;  %v9093_v35 = vld [vmem:[#allocation56_spill] sm:$0xff] }
 0x45b   : > { %v2196_v52 = vadd.f32 %v2195_v54, %v2107_v37  ;;  %v2708_v37 = vmax.f32 %v2053_v31, 0.0  ;;  %v1969_v21 = vadd.f32 %v9093_v35, %v7291_v58 }
 0x45e   : > { %v2054_v63 = vpop.f32.mrf.mxu1  ;;  %v7674_v29 = vpop.f32.mrf.mxu0  ;;  %3363 = vmatpush.bf16.msrb.mxu2 %v5231_v3  ;;  %v5604_v3 = vld [vmem:[#allocation10 + $0x1e4] sm:$0xf0] }
 0x45f   : > { %9090 = vst [vmem:[#allocation38_spill] sm:$0xff] %v7674_v29  ;;  %v2055_v32 = vadd.f32 %v2054_v63, %v1966_v16  ;;  %v5191_v29 = vor.u32 %v5566_v12, %v5190_v33  ;;  %v2653_v16 = vmax.f32 %v2196_v52, 0.0  ;;  %v7691_v25 = vpop.f32.mrf.mxu2  ;;  %v5342_v52 = vld [vmem:[#allocation10 + $0x1e0] sm:$0xf]  ;;  %v9099_v33 = vld [vmem:[#allocation44_spill] sm:$0xff] }
 0x460   : > { %v2114_v12 = vadd.f32 %v9099_v33, %v7480_v5  ;;  %v9106_v33 = vld [vmem:[#allocation61_spill] sm:$0xff] }
 0x461   : > { %v2712_v54 = vmax.f32 %v2055_v32, 0.0  ;;  %3271 = vmatpush.bf16.msrb.mxu1 %v5191_v29 }
 0x462   : > { %v2197_v0 = vpop.f32.mrf.mxu3 }
 0x463   : > { %v2198_v14 = vadd.f32 %v2197_v0, %v2109_v6  ;;  %v7680_v45 = vpack.c.bf16 %v2712_v54, %v2708_v37  ;;  %v9096_v0 = vld [vmem:[#allocation42_spill] sm:$0xff]  ;;  %v5343_v37 = vor.u32 %v5604_v3, %v5342_v52 }
 0x464   : > { %v2112_v32 = vadd.f32 %v9096_v0, %v7480_v5 }
 0x465   : > { %v2657_v63 = vmax.f32 %v2198_v14, 0.0  ;;  %3446 = vmatpush.bf16.msra.mxu3 %v5343_v37 }
 0x466   : > { %v2057_v10 = vpop.f32.mrf.mxu1  ;;  %v7684_v41 = vpop.f32.mrf.mxu0 }
 0x467   : > { %9094 = vst [vmem:[#allocation40_spill] sm:$0xff] %v7684_v41  ;;  %v2058_v46 = vadd.f32 %v2057_v10, %v1969_v21  ;;  %2515 = vmatmul.bf16.vlgmr.msrb.gmra.mxu3 %v7099_v51  ;;  %v7687_v31 = vpack.c.bf16 %v2657_v63, %v2653_v16  ;;  %v9097_v10 = vld [vmem:[#allocation57_spill] sm:$0xff]  ;;  %v7701_v0 = vpop.f32.mrf.mxu2 }
 0x468   : > { %v1971_v51 = vadd.f32 %v9097_v10, %v7291_v58  ;;  %9100 = vst [vmem:[#allocation57_spill] sm:$0xff] %v7701_v0  ;;  %v7710_v58 = vld [vmem:[%s8893_s8] sm:$0xf]  ;;  %v9104_v10 = vld [vmem:[#allocation46_spill] sm:$0xff] }
 0x469   : > { %9095 = vst [vmem:[#allocation56_spill] sm:$0xff] %v7687_v31  ;;  %2372 = vmatmul.bf16.gmra.mxu1 %v7269_v2  ;;  %3221 = vmatmul.bf16.gmra.mxu0 %v7510_v30  ;;  %v2716_v35 = vmax.f32 %v2058_v46, 0.0  ;;  %v7713_v37 = vperm.slane %v7710_v58, 2  ;;  %v5564_v0 = vld [vmem:[#allocation10 + $0xa4] sm:$0xf0] }
 0x46a   : > { %v2200_v6 = vpop.f32.mrf.mxu3 }
 0x46b   : > { %v2201_v54 = vadd.f32 %v2200_v6, %v2112_v32 }
 0x46d   : > { %v2661_v32 = vmax.f32 %v2201_v54, 0.0  ;;  %v9105_v54 = vld [vmem:[#allocation59_spill] sm:$0xff] }
 0x46e   : > { %v2059_v29 = vpop.f32.mrf.mxu1  ;;  %v7697_v21 = vpop.f32.mrf.mxu0 }
 0x46f   : > { %9098 = vst [vmem:[#allocation42_spill] sm:$0xff] %v7697_v21  ;;  %v2060_v14 = vadd.f32 %v2059_v29, %v1971_v51  ;;  %v2117_v51 = vadd.f32 %v9104_v10, %v7480_v5  ;;  %v2250_v29 = vadd.f32 %v9105_v54, %v7713_v37 }
 0x471   : > { %v2720_v16 = vmax.f32 %v2060_v14, 0.0 }
 0x472   : > { %v2202_v63 = vpop.f32.mrf.mxu3 }
 0x473   : > { %v2203_v41 = vadd.f32 %v2202_v63, %v2114_v12  ;;  %v7703_v30 = vpack.c.bf16 %v2720_v16, %v2716_v35  ;;  %v2252_v12 = vadd.f32 %v9106_v33, %v7713_v37  ;;  %v7726_v35 = vpop.f32.mrf.mxu2 }
 0x474   : > { %9107 = vst [vmem:[#allocation46_spill] sm:$0xff] %v7726_v35 }
 0x475   : > { %9101 = vst [vmem:[#allocation44_spill] sm:$0xff] %v7703_v30  ;;  %v2665_v52 = vmax.f32 %v2203_v41, 0.0 }
 0x476   : > { %v2338_v3 = vpop.f32.mrf.mxu1  ;;  %v7705_v6 = vpop.f32.mrf.mxu0 }
 0x477   : > { %9102 = vst [vmem:[#allocation100_spill] sm:$0xff] %v7705_v6  ;;  %2520 = vmatmul.bf16.gmra.mxu3 %v7139_v7  ;;  %v7716_v46 = vpack.c.bf16 %v2665_v52, %v2661_v32  ;;  %v2339_v7 = vadd.f32 %v2338_v3, %v2250_v29  ;;  %v9108_v52 = vld [vmem:[#allocation49_spill] sm:$0xff] }
 0x478   : > { %v2119_v10 = vadd.f32 %v9108_v52, %v7480_v5  ;;  %v5182_v6 = vld [vmem:[#allocation10 + $0xa0] sm:$0xf] }
 0x479   : > { %9103 = vst [vmem:[#allocation101_spill] sm:$0xff] %v7716_v46  ;;  %2377 = vmatmul.bf16.gmra.mxu1 %v7299_v22  ;;  %3226 = vmatmul.bf16.gmra.mxu0 %v7532_v48  ;;  %v2598_v46 = vmax.f32 %v2339_v7, 0.0  ;;  %v5183_v54 = vor.u32 %v5564_v0, %v5182_v6 }
 0x47a   : > { %v2205_v41 = vpop.f32.mrf.mxu3 }
 0x47b   : > { %v2206_v14 = vadd.f32 %v2205_v41, %v2117_v51  ;;  %3272 = vmatpush.bf16.msrb.mxu1 %v5183_v54 }
 0x47d   : > { %v2669_v33 = vmax.f32 %v2206_v14, 0.0  ;;  %v9112_v14 = vld [vmem:[#allocation63_spill] sm:$0xff] }
 0x47e   : > { %v2340_v16 = vpop.f32.mrf.mxu1  ;;  %v7728_v63 = vpop.f32.mrf.mxu0 }
 0x47f   : > { %v2341_v32 = vadd.f32 %v2340_v16, %v2252_v12  ;;  %v7737_v12 = vpop.f32.mrf.mxu2  ;;  %v9111_v16 = vld [vmem:[#allocation51_spill] sm:$0xff] }
 0x480   : > { %v2122_v0 = vadd.f32 %v9111_v16, %v7480_v5 }
 0x481   : > { %v2602_v48 = vmax.f32 %v2341_v32, 0.0  ;;  %v2255_v32 = vadd.f32 %v9112_v14, %v7713_v37 }
 0x482   : > { %v2207_v21 = vpop.f32.mrf.mxu3 }
 0x483   : > { %v7732_v51 = vpack.c.bf16 %v2602_v48, %v2598_v46  ;;  %v2208_v41 = vadd.f32 %v2207_v21, %v2119_v10  ;;  %v5334_v48 = vld [vmem:[#allocation10 + $0x1d0] sm:$0xf]  ;;  %v5602_v21 = vld [vmem:[#allocation10 + $0x1d4] sm:$0xf0] }
 0x484   : > { %v5335_v46 = vor.u32 %v5602_v21, %v5334_v48 }
 0x485   : > { %9109 = vst [vmem:[#allocation59_spill] sm:$0xff] %v7732_v51  ;;  %v2673_v35 = vmax.f32 %v2208_v41, 0.0  ;;  %3364 = vmatmul.bf16.vlgmr.msrb.gmra.mxu2 %v7732_v51 }
 0x486   : > { %v2343_v3 = vpop.f32.mrf.mxu1  ;;  %v7735_v29 = vpop.f32.mrf.mxu0  ;;  %3447 = vmatpush.bf16.msra.mxu3 %v5335_v46 }
 0x487   : > { %2525 = vmatmul.bf16.gmra.mxu3 %v7161_v1  ;;  %v7740_v7 = vpack.c.bf16 %v2673_v35, %v2669_v33  ;;  %v2257_v1 = vadd.f32 %v7343_v18, %v7713_v37  ;;  %v2344_v35 = vadd.f32 %v2343_v3, %v2255_v32  ;;  %v9113_v33 = vld [vmem:[#allocation53_spill] sm:$0xff]  ;;  %v9117_v32 = vld [vmem:[#allocation55_spill] sm:$0xff] }
 0x488   : > { %v2124_v16 = vadd.f32 %v9113_v33, %v7480_v5 }
 0x489   : > { %9110 = vst [vmem:[#allocation61_spill] sm:$0xff] %v7740_v7  ;;  %2382 = vmatmul.bf16.gmra.mxu1 %v7327_v53  ;;  %3231 = vmatmul.bf16.gmra.mxu0 %v7562_v60  ;;  %v7754_v60 = vpop.f32.mrf.mxu2  ;;  %v2606_v7 = vmax.f32 %v2344_v35, 0.0 }
 0x48a   : > { %v2210_v6 = vpop.f32.mrf.mxu3 }
 0x48b   : > { %v2211_v52 = vadd.f32 %v2210_v6, %v2122_v0 }
 0x48d   : > { %v2677_v0 = vmax.f32 %v2211_v52, 0.0 }
 0x48e   : > { %v2345_v10 = vpop.f32.mrf.mxu1  ;;  %v7750_v54 = vpop.f32.mrf.mxu0 }
 0x48f   : > { %v2346_v41 = vadd.f32 %v2345_v10, %v2257_v1  ;;  %v2127_v1 = vadd.f32 %v9117_v32, %v7480_v5  ;;  %v9119_v10 = vld [vmem:[#allocation66_spill] sm:$0xff] }
 0x491   : > { %v2610_v48 = vmax.f32 %v2346_v41, 0.0  ;;  %v7770_v52 = vpop.f32.mrf.mxu2  ;;  %v2262_v41 = vadd.f32 %v9119_v10, %v7713_v37 }
 0x492   : > { %v2212_v21 = vpop.f32.mrf.mxu3  ;;  %9118 = vst [vmem:[#allocation53_spill] sm:$0xff] %v7770_v52 }
 0x493   : > { %v2213_v51 = vadd.f32 %v2212_v21, %v2124_v16  ;;  %v7756_v14 = vpack.c.bf16 %v2610_v48, %v2606_v7  ;;  %v9120_v21 = vld [vmem:[#allocation58_spill] sm:$0xff] }
 0x495   : > { %9114 = vst [vmem:[#allocation49_spill] sm:$0xff] %v7756_v14  ;;  %v2681_v6 = vmax.f32 %v2213_v51, 0.0  ;;  %3369 = vmatmul.bf16.gmra.mxu2 %v7756_v14  ;;  %v2260_v51 = vadd.f32 %v7351_v17, %v7713_v37 }
 0x496   : > { %v2348_v18 = vpop.f32.mrf.mxu1  ;;  %v7759_v3 = vpop.f32.mrf.mxu0 }
 0x497   : > { %9115 = vst [vmem:[#allocation51_spill] sm:$0xff] %v7759_v3  ;;  %2530 = vmatmul.bf16.gmra.mxu3 %v7183_v42  ;;  %v7762_v46 = vpack.c.bf16 %v2681_v6, %v2677_v0  ;;  %v2349_v42 = vadd.f32 %v2348_v18, %v2260_v51  ;;  %v2129_v0 = vadd.f32 %v9120_v21, %v7480_v5 }
 0x499   : > { %9116 = vst [vmem:[#allocation63_spill] sm:$0xff] %v7762_v46  ;;  %2387 = vmatmul.bf16.gmra.mxu1 %v7355_v44  ;;  %3236 = vmatmul.bf16.gmra.mxu0 %v7586_v47  ;;  %v2614_v6 = vmax.f32 %v2349_v42, 0.0  ;;  %v5174_v47 = vld [vmem:[#allocation10 + $0x90] sm:$0xf]  ;;  %v5562_v46 = vld [vmem:[#allocation10 + $0x94] sm:$0xf0] }
 0x49a   : > { %v2215_v7 = vpop.f32.mrf.mxu3  ;;  %v5175_v17 = vor.u32 %v5562_v46, %v5174_v47  ;;  %v9123_v42 = vld [vmem:[#allocation60_spill] sm:$0xff]  ;;  %v5600_v46 = vld [vmem:[#allocation10 + $0x1c4] sm:$0xf0] }
 0x49b   : > { %v2216_v35 = vadd.f32 %v2215_v7, %v2127_v1  ;;  %v7780_v1 = vpop.f32.mrf.mxu2  ;;  %v2132_v47 = vadd.f32 %v9123_v42, %v7480_v5  ;;  %v9127_v42 = vld [vmem:[#allocation62_spill] sm:$0xff] }
 0x49c   : > { %3273 = vmatpush.bf16.msrb.mxu1 %v5175_v17 }
 0x49d   : > { %v2685_v18 = vmax.f32 %v2216_v35, 0.0 }
 0x49e   : > { %v2350_v33 = vpop.f32.mrf.mxu1  ;;  %v7774_v16 = vpop.f32.mrf.mxu0 }
 0x49f   : > { %v2351_v48 = vadd.f32 %v2350_v33, %v2262_v41  ;;  %v9124_v33 = vld [vmem:[#allocation69_spill] sm:$0xff] }
 0x4a1   : > { %v2618_v32 = vmax.f32 %v2351_v48, 0.0  ;;  %v2265_v48 = vadd.f32 %v9124_v33, %v7713_v37 }
 0x4a2   : > { %v2217_v14 = vpop.f32.mrf.mxu3 }
 0x4a3   : > { %v2218_v3 = vadd.f32 %v2217_v14, %v2129_v0  ;;  %v7778_v52 = vpack.c.bf16 %v2618_v32, %v2614_v6  ;;  %v5326_v14 = vld [vmem:[#allocation10 + $0x1c0] sm:$0xf] }
 0x4a5   : > { %9121 = vst [vmem:[#allocation55_spill] sm:$0xff] %v7778_v52  ;;  %v2689_v7 = vmax.f32 %v2218_v3, 0.0  ;;  %3374 = vmatmul.bf16.gmra.mxu2 %v7778_v52  ;;  %v5327_v3 = vor.u32 %v5600_v46, %v5326_v14 }
 0x4a6   : > { %v2353_v51 = vpop.f32.mrf.mxu1  ;;  %v7783_v10 = vpop.f32.mrf.mxu0 }
 0x4a7   : > { %2535 = vmatmul.bf16.gmra.mxu3 %v7205_v4  ;;  %v7786_v41 = vpack.c.bf16 %v2689_v7, %v2685_v18  ;;  %v9125_v4 = vld [vmem:[#allocation71_spill] sm:$0xff]  ;;  %v2354_v6 = vadd.f32 %v2353_v51, %v2265_v48  ;;  %v7798_v18 = vpop.f32.mrf.mxu2  ;;  %v5557_v48 = vld [vmem:[#allocation10 + $0x74] sm:$0xf] }
 0x4a8   : > { %3448 = vmatpush.bf16.msra.mxu3 %v5327_v3  ;;  %v2267_v0 = vadd.f32 %v9125_v4, %v7713_v37  ;;  %v5160_v4 = vld [vmem:[#allocation10 + $0x78] sm:$0xf0] }
 0x4a9   : > { %9122 = vst [vmem:[#allocation66_spill] sm:$0xff] %v7786_v41  ;;  %2392 = vmatmul.bf16.gmra.mxu1 %v7381_v56  ;;  %3241 = vmatmul.bf16.gmra.mxu0 %v7613_v34  ;;  %v2134_v34 = vadd.f32 %v9127_v42, %v7480_v5  ;;  %v2622_v41 = vmax.f32 %v2354_v6, 0.0  ;;  %v9131_v6 = vld [vmem:[#allocation64_spill] sm:$0xff]  ;;  %v5555_v42 = vld [vmem:[#allocation10 + $0x64] sm:$0xf] }
 0x4aa   : > { %v2220_v35 = vpop.f32.mrf.mxu3 }
 0x4ab   : > { %v2221_v21 = vadd.f32 %v2220_v35, %v2132_v47 }
 0x4ad   : > { %v2693_v47 = vmax.f32 %v2221_v21, 0.0 }
 0x4ae   : > { %v2355_v32 = vpop.f32.mrf.mxu1  ;;  %v7796_v17 = vpop.f32.mrf.mxu0 }
 0x4af   : > { %9126 = vst [vmem:[#allocation58_spill] sm:$0xff] %v7796_v17  ;;  %v2356_v7 = vadd.f32 %v2355_v32, %v2267_v0  ;;  %v5163_v32 = vor.u32 %v5557_v48, %v5160_v4 }
 0x4b1   : > { %v2626_v14 = vmax.f32 %v2356_v7, 0.0  ;;  %v2137_v7 = vadd.f32 %v9131_v6, %v7480_v5  ;;  %3534 = vmatpush.bf16.msra.mxu0 %v5163_v32  ;;  %v9135_v32 = vld [vmem:[#allocation65_spill] sm:$0xff] }
 0x4b2   : > { %v2222_v46 = vpop.f32.mrf.mxu3  ;;  %v2139_v17 = vadd.f32 %v9135_v32, %v7480_v5 }
 0x4b3   : > { %v2223_v52 = vadd.f32 %v2222_v46, %v2134_v34  ;;  %v7802_v33 = vpack.c.bf16 %v2626_v14, %v2622_v41  ;;  %v7812_v34 = vpop.f32.mrf.mxu2  ;;  %v9133_v41 = vld [vmem:[#allocation74_spill] sm:$0xff]  ;;  %v5152_v14 = vld [vmem:[#allocation10 + $0x68] sm:$0xf0] }
 0x4b4   : > { %9132 = vst [vmem:[#allocation62_spill] sm:$0xff] %v7812_v34  ;;  %v2270_v21 = vadd.f32 %v9133_v41, %v7713_v37  ;;  %v5155_v46 = vor.u32 %v5555_v42, %v5152_v14  ;;  %v5560_v34 = vld [vmem:[#allocation10 + $0x84] sm:$0xf0] }
 0x4b5   : > { %9128 = vst [vmem:[#allocation60_spill] sm:$0xff] %v7802_v33  ;;  %v2697_v35 = vmax.f32 %v2223_v52, 0.0  ;;  %3379 = vmatmul.bf16.gmra.mxu2 %v7802_v33  ;;  %v5553_v33 = vld [vmem:[#allocation10 + $0x54] sm:$0xf] }
 0x4b6   : > { %v2358_v51 = vpop.f32.mrf.mxu1  ;;  %v7805_v3 = vpop.f32.mrf.mxu0  ;;  %3535 = vmatpush.bf16.msra.mxu0 %v5155_v46  ;;  %v5551_v46 = vld [vmem:[#allocation10 + $0x44] sm:$0xf] }
 0x4b7   : > { %9129 = vst [vmem:[#allocation69_spill] sm:$0xff] %v7805_v3  ;;  %2540 = vmatmul.bf16.gmra.mxu3 %v7225_v39  ;;  %v7808_v0 = vpack.c.bf16 %v2697_v35, %v2693_v47  ;;  %v9134_v47 = vld [vmem:[#allocation75_spill] sm:$0xff]  ;;  %v2359_v48 = vadd.f32 %v2358_v51, %v2270_v21 }
 0x4b8   : > { %v2272_v35 = vadd.f32 %v9134_v47, %v7713_v37 }
 0x4b9   : > { %9130 = vst [vmem:[#allocation71_spill] sm:$0xff] %v7808_v0  ;;  %2397 = vmatmul.bf16.gmra.mxu1 %v7409_v13  ;;  %3246 = vmatmul.bf16.gmra.mxu0 %v7636_v11  ;;  %v5144_v11 = vld [vmem:[#allocation10 + $0x58] sm:$0xf0]  ;;  %v2630_v41 = vmax.f32 %v2359_v48, 0.0 }
 0x4ba   : > { %v2225_v52 = vpop.f32.mrf.mxu3  ;;  %v5147_v3 = vor.u32 %v5553_v33, %v5144_v11 }
 0x4bb   : > { %v2226_v39 = vadd.f32 %v2225_v52, %v2137_v7  ;;  %v5166_v52 = vld [vmem:[#allocation10 + $0x80] sm:$0xf]  ;;  %v7824_v47 = vpop.f32.mrf.mxu2 }
 0x4bc   : > { %v5167_v14 = vor.u32 %v5560_v34, %v5166_v52  ;;  %3536 = vmatpush.bf16.msra.mxu0 %v5147_v3  ;;  %v5549_v3 = vld [vmem:[#allocation10 + $0x34] sm:$0xf]  ;;  %v5128_v34 = vld [vmem:[#allocation10 + $0x38] sm:$0xf0]  ;;  %v5598_v52 = vld [vmem:[#allocation10 + $0x1b4] sm:$0xf0] }
 0x4bd   : > { %v2701_v11 = vmax.f32 %v2226_v39, 0.0  ;;  %v5318_v39 = vld [vmem:[#allocation10 + $0x1b0] sm:$0xf] }
 0x4be   : > { %v2360_v4 = vpop.f32.mrf.mxu1  ;;  %v7820_v6 = vpop.f32.mrf.mxu0  ;;  %3274 = vmatpush.bf16.msrb.mxu1 %v5167_v14  ;;  %v5319_v14 = vor.u32 %v5598_v52, %v5318_v39  ;;  %v5112_v52 = vld [vmem:[#allocation10 + $0x18] sm:$0xf0] }
 0x4bf   : > { %v2361_v0 = vadd.f32 %v2360_v4, %v2272_v35  ;;  %v5136_v35 = vld [vmem:[#allocation10 + $0x48] sm:$0xf0] }
 0x4c0   : > { %v5139_v4 = vor.u32 %v5551_v46, %v5136_v35  ;;  %v5547_v46 = vld [vmem:[#allocation10 + $0x24] sm:$0xf]  ;;  %v5120_v35 = vld [vmem:[#allocation10 + $0x28] sm:$0xf0]  ;;  %3449 = vmatpush.bf16.msra.mxu3 %v5319_v14 }
 0x4c1   : > { %v2634_v7 = vmax.f32 %v2361_v0, 0.0 }
 0x4c2   : > { %v2227_v42 = vpop.f32.mrf.mxu3  ;;  %3537 = vmatpush.bf16.msra.mxu0 %v5139_v4  ;;  %v5123_v4 = vor.u32 %v5547_v46, %v5120_v35 }
 0x4c3   : > { %v2228_v51 = vadd.f32 %v2227_v42, %v2139_v17  ;;  %v7826_v21 = vpack.c.bf16 %v2634_v7, %v2630_v41  ;;  %v5131_v17 = vor.u32 %v5549_v3, %v5128_v34  ;;  %v9139_v41 = vld [vmem:[#allocation67_spill] sm:$0xff]  ;;  %v7842_v3 = vpop.f32.mrf.mxu2 }
 0x4c4   : > { %v2142_v7 = vadd.f32 %v9139_v41, %v7480_v5 }
 0x4c5   : > { %9136 = vst [vmem:[#allocation64_spill] sm:$0xff] %v7826_v21  ;;  %v2705_v33 = vmax.f32 %v2228_v51, 0.0  ;;  %3384 = vmatmul.bf16.gmra.mxu2 %v7826_v21  ;;  %v5543_v21 = vld [vmem:[#allocation10 + $0x4] sm:$0xf] }
 0x4c6   : > { %v2363_v48 = vpop.f32.mrf.mxu1  ;;  %v7829_v0 = vpop.f32.mrf.mxu0  ;;  %3538 = vmatpush.bf16.msra.mxu0 %v5131_v17  ;;  %v5545_v17 = vld [vmem:[#allocation10 + $0x14] sm:$0xf] }
 0x4c7   : > { %9137 = vst [vmem:[#allocation74_spill] sm:$0xff] %v7829_v0  ;;  %2545 = vmatmul.bf16.gmra.mxu3 %v7247_v61  ;;  %v7832_v32 = vpack.c.bf16 %v2705_v33, %v2701_v11  ;;  %v2275_v61 = vadd.f32 %v7433_v49, %v7713_v37  ;;  %v9140_v11 = vld [vmem:[#allocation79_spill] sm:$0xff]  ;;  %v9142_v49 = vld [vmem:[#allocation70_spill] sm:$0xff] }
 0x4c8   : > { %v2277_v33 = vadd.f32 %v9140_v11, %v7713_v37 }
 0x4c9   : > { %9138 = vst [vmem:[#allocation75_spill] sm:$0xff] %v7832_v32  ;;  %2402 = vmatmul.bf16.gmra.mxu1 %v7435_v28  ;;  %3251 = vmatmul.bf16.gmra.mxu0 %v7657_v26  ;;  %v2364_v34 = vadd.f32 %v2363_v48, %v2275_v61  ;;  %v5115_v32 = vor.u32 %v5545_v17, %v5112_v52  ;;  %v5104_v48 = vld [vmem:[#allocation10 + $0x8] sm:$0xf0] }
 0x4ca   : > { %v2230_v42 = vpop.f32.mrf.mxu3  ;;  %3539 = vmatpush.bf16.msra.mxu0 %v5123_v4  ;;  %v5107_v61 = vor.u32 %v5543_v21, %v5104_v48  ;;  %v2282_v52 = vadd.f32 %v7473_v62, %v7713_v37  ;;  %v5573_v48 = vld [vmem:[#allocation10 + $0xf4] sm:$0xf]  ;;  %v7875_v62 = vperm.slane %v7710_v58, 3  ;;  %v5310_v58 = vld [vmem:[#allocation10 + $0x1a0] sm:$0xf] }
 0x4cb   : > { %v2231_v51 = vadd.f32 %v2230_v42, %v2142_v7  ;;  %v2144_v7 = vadd.f32 %v9142_v49, %v7480_v5  ;;  %v2638_v42 = vmax.f32 %v2364_v34, 0.0 }
 0x4cd   : > { %v2709_v0 = vmax.f32 %v2231_v51, 0.0  ;;  %v2280_v51 = vadd.f32 %v7461_v8, %v7713_v37 }
 0x4ce   : > { %v2365_v41 = vpop.f32.mrf.mxu1  ;;  %v7844_v26 = vpop.f32.mrf.mxu0  ;;  %3540 = vmatpush.bf16.msra.mxu0 %v5115_v32  ;;  %v9143_v32 = vld [vmem:[#allocation73_spill] sm:$0xff] }
 0x4cf   : > { %9141 = vst [vmem:[#allocation65_spill] sm:$0xff] %v7844_v26  ;;  %v2366_v39 = vadd.f32 %v2365_v41, %v2277_v33  ;;  %v7853_v41 = vpop.f32.mrf.mxu2 }
 0x4d1   : > { %v2642_v14 = vmax.f32 %v2366_v39, 0.0  ;;  %v2147_v39 = vadd.f32 %v9143_v32, %v7480_v5 }
 0x4d2   : > { %v2232_v46 = vpop.f32.mrf.mxu3  ;;  %3541 = vmatpush.bf16.msra.mxu0 %v5107_v61  ;;  %v5224_v61 = vld [vmem:[#allocation10 + $0xf8] sm:$0xf0] }
 0x4d3   : > { %v2233_v35 = vadd.f32 %v2232_v46, %v2144_v7  ;;  %v7848_v11 = vpack.c.bf16 %v2642_v14, %v2638_v42  ;;  %v5227_v8 = vor.u32 %v5573_v48, %v5224_v61 }
 0x4d5   : > { %v2713_v26 = vmax.f32 %v2233_v35, 0.0  ;;  %3389 = vmatmul.bf16.gmra.mxu2 %v7848_v11  ;;  %3623 = vmatpush.bf16.msra.mxu1 %v5227_v8 }
 0x4d6   : > { %v2368_v4 = vpop.f32.mrf.mxu1  ;;  %v7851_v33 = vpop.f32.mrf.mxu0 }
 0x4d7   : > { %2550 = vmatmul.bf16.gmra.mxu3 %v7269_v2  ;;  %v7856_v34 = vpack.c.bf16 %v2713_v26, %v2709_v0  ;;  %v2369_v49 = vadd.f32 %v2368_v4, %v2280_v51  ;;  %v9144_v0 = vld [vmem:[#allocation76_spill] sm:$0xff]  ;;  %v7870_v14 = vpop.f32.mrf.mxu2 }
 0x4d8   : > { %v2149_v42 = vadd.f32 %v9144_v0, %v7480_v5  ;;  %v5596_v0 = vld [vmem:[#allocation10 + $0x1a4] sm:$0xf0] }
 0x4d9   : > { %2407 = vmatmul.bf16.gmra.mxu1 %v7463_v50  ;;  %3256 = vmatmul.bf16.gmra.mxu0 %v7680_v45  ;;  %v2646_v46 = vmax.f32 %v2369_v49, 0.0 }
 0x4da   : > { %v2235_v21 = vpop.f32.mrf.mxu3 }
 0x4db   : > { %v2236_v17 = vadd.f32 %v2235_v21, %v2147_v39 }
 0x4dd   : > { %v2717_v4 = vmax.f32 %v2236_v17, 0.0 }
 0x4de   : > { %v2370_v7 = vpop.f32.mrf.mxu1  ;;  %v7866_v2 = vpop.f32.mrf.mxu0 }
 0x4df   : > { %v2371_v26 = vadd.f32 %v2370_v7, %v2282_v52  ;;  %v9146_v7 = vld [vmem:[#allocation78_spill] sm:$0xff] }
 0x4e1   : > { %v2650_v35 = vmax.f32 %v2371_v26, 0.0  ;;  %v2428_v26 = vadd.f32 %v9146_v7, %v7875_v62 }
 0x4e2   : > { %v2237_v32 = vpop.f32.mrf.mxu3 }
 0x4e3   : > { %v2238_v39 = vadd.f32 %v2237_v32, %v2149_v42  ;;  %v7872_v21 = vpack.c.bf16 %v2650_v35, %v2646_v46  ;;  %v5311_v42 = vor.u32 %v5596_v0, %v5310_v58  ;;  %v2285_v46 = vadd.f32 %v7484_v19, %v7713_v37  ;;  %v7889_v35 = vpop.f32.mrf.mxu2 }
 0x4e5   : > { %v2721_v51 = vmax.f32 %v2238_v39, 0.0  ;;  %3394 = vmatmul.bf16.gmra.mxu2 %v7872_v21  ;;  %3450 = vmatpush.bf16.msra.mxu3 %v5311_v42 }
 0x4e6   : > { %v2373_v5 = vpop.f32.mrf.mxu1  ;;  %v7878_v52 = vpop.f32.mrf.mxu0 }
 0x4e7   : > { %2555 = vmatmul.bf16.gmra.mxu3 %v7299_v22  ;;  %v7881_v49 = vpack.c.bf16 %v2721_v51, %v2717_v4  ;;  %v2287_v22 = vadd.f32 %v7504_v9, %v7713_v37  ;;  %v2374_v61 = vadd.f32 %v2373_v5, %v2285_v46  ;;  %v2430_v4 = vadd.f32 %v7454_v59, %v7875_v62  ;;  %v9147_v59 = vld [vmem:[#allocation81_spill] sm:$0xff] }
 0x4e8   : > { %v2433_v46 = vadd.f32 %v9147_v59, %v7875_v62  ;;  %v5216_v59 = vld [vmem:[#allocation10 + $0xe8] sm:$0xf0] }
 0x4e9   : > { %9145 = vst [vmem:[#allocation67_spill] sm:$0xff] %v7881_v49  ;;  %2412 = vmatmul.bf16.gmra.mxu1 %v7488_v36  ;;  %3261 = vmatmul.bf16.gmra.mxu0 %v7703_v30  ;;  %v2654_v51 = vmax.f32 %v2374_v61, 0.0 }
 0x4ea   : > { %v2516_v17 = vpop.f32.mrf.mxu3 }
 0x4eb   : > { %v2517_v48 = vadd.f32 %v2516_v17, %v2428_v26  ;;  %v7899_v30 = vpop.f32.mrf.mxu2 }
 0x4ed   : > { %v2599_v26 = vmax.f32 %v2517_v48, 0.0  ;;  %v2290_v48 = vadd.f32 %v7514_v15, %v7713_v37 }
 0x4ee   : > { %v2375_v32 = vpop.f32.mrf.mxu1  ;;  %v7893_v8 = vpop.f32.mrf.mxu0 }
 0x4ef   : > { %v2376_v39 = vadd.f32 %v2375_v32, %v2287_v22  ;;  %v2292_v32 = vadd.f32 %v7528_v23, %v7713_v37 }
 0x4f1   : > { %v2658_v7 = vmax.f32 %v2376_v39, 0.0 }
 0x4f2   : > { %v2518_v58 = vpop.f32.mrf.mxu3 }
 0x4f3   : > { %v2519_v0 = vadd.f32 %v2518_v58, %v2430_v4  ;;  %v7897_v19 = vpack.c.bf16 %v2658_v7, %v2654_v51  ;;  %v7917_v7 = vpop.f32.mrf.mxu2  ;;  %v9148_v58 = vld [vmem:[#allocation83_spill] sm:$0xff] }
 0x4f5   : > { %v2603_v17 = vmax.f32 %v2519_v0, 0.0  ;;  %3399 = vmatmul.bf16.gmra.mxu2 %v7897_v19  ;;  %v2435_v0 = vadd.f32 %v9148_v58, %v7875_v62 }
 0x4f6   : > { %v2378_v9 = vpop.f32.mrf.mxu1  ;;  %v7902_v5 = vpop.f32.mrf.mxu0 }
 0x4f7   : > { %v7904_v42 = vpack.c.bf16 %v2603_v17, %v2599_v26  ;;  %2560 = vmatmul.bf16.gmra.mxu3 %v7327_v53  ;;  %v2379_v39 = vadd.f32 %v2378_v9, %v2290_v48  ;;  %v5571_v17 = vld [vmem:[#allocation10 + $0xe4] sm:$0xf] }
 0x4f8   : > { %v5219_v15 = vor.u32 %v5571_v17, %v5216_v59 }
 0x4f9   : > { %3275 = vmatmul.bf16.vlgmr.msrb.gmra.mxu1 %v7516_v43  ;;  %3542 = vmatmul.bf16.vlgmr.msra.gmra.mxu0 %v7320_v24  ;;  %v2662_v26 = vmax.f32 %v2379_v39, 0.0 }
 0x4fa   : > { %v2521_v22 = vpop.f32.mrf.mxu3  ;;  %3624 = vmatpush.bf16.msra.mxu1 %v5219_v15 }
 0x4fb   : > { %v2522_v61 = vadd.f32 %v2521_v22, %v2433_v46 }
 0x4fd   : > { %v2607_v23 = vmax.f32 %v2522_v61, 0.0  ;;  %v5594_v61 = vld [vmem:[#allocation10 + $0x194] sm:$0xf0] }
 0x4fe   : > { %v2380_v4 = vpop.f32.mrf.mxu1  ;;  %v7915_v51 = vpop.f32.mrf.mxu0 }
 0x4ff   : > { %v2381_v53 = vadd.f32 %v2380_v4, %v2292_v32 }
 0x501   : > { %v2666_v24 = vmax.f32 %v2381_v53, 0.0  ;;  %v2438_v53 = vadd.f32 %v7508_v55, %v7875_v62 }
 0x502   : > { %v2523_v43 = vpop.f32.mrf.mxu3 }
 0x503   : > { %v2524_v46 = vadd.f32 %v2523_v43, %v2435_v0  ;;  %v7921_v22 = vpack.c.bf16 %v2666_v24, %v2662_v26  ;;  %v5302_v43 = vld [vmem:[#allocation10 + $0x190] sm:$0xf]  ;;  %v2295_v26 = vadd.f32 %v7538_v57, %v7713_v37 }
 0x504   : > { %v5303_v0 = vor.u32 %v5594_v61, %v5302_v43 }
 0x505   : > { %9149 = vst [vmem:[#allocation79_spill] sm:$0xff] %v7921_v22  ;;  %v2611_v9 = vmax.f32 %v2524_v46, 0.0  ;;  %3404 = vmatmul.bf16.gmra.mxu2 %v7921_v22 }
 0x506   : > { %v2383_v48 = vpop.f32.mrf.mxu1  ;;  %v7924_v32 = vpop.f32.mrf.mxu0  ;;  %3451 = vmatpush.bf16.msra.mxu3 %v5303_v0 }
 0x507   : > { %9150 = vst [vmem:[#allocation70_spill] sm:$0xff] %v7924_v32  ;;  %2565 = vmatmul.bf16.gmra.mxu3 %v7355_v44  ;;  %v7927_v4 = vpack.c.bf16 %v2611_v9, %v2607_v23  ;;  %v2297_v44 = vadd.f32 %v7556_v38, %v7713_v37  ;;  %v2384_v17 = vadd.f32 %v2383_v48, %v2295_v26 }
 0x508   : > { %v7929_v39 = vpop.f32.mrf.mxu2 }
 0x509   : > { %9151 = vst [vmem:[#allocation73_spill] sm:$0xff] %v7927_v4  ;;  %3280 = vmatmul.bf16.gmra.mxu1 %v7542_v40  ;;  %3547 = vmatmul.bf16.gmra.mxu0 %v7347_v20  ;;  %v9153_v20 = vld [vmem:[#allocation86_spill] sm:$0xff]  ;;  %v2670_v9 = vmax.f32 %v2384_v17, 0.0  ;;  %v9157_v17 = vld [vmem:[#allocation92_spill] sm:$0xff] }
 0x50a   : > { %v2526_v58 = vpop.f32.mrf.mxu3  ;;  %v2440_v23 = vadd.f32 %v9153_v20, %v7875_v62 }
 0x50b   : > { %v2527_v24 = vadd.f32 %v2526_v58, %v2438_v53 }
 0x50d   : > { %v2615_v53 = vmax.f32 %v2527_v24, 0.0 }
 0x50e   : > { %v2385_v59 = vpop.f32.mrf.mxu1  ;;  %v7939_v15 = vpop.f32.mrf.mxu0 }
 0x50f   : > { %9152 = vst [vmem:[#allocation76_spill] sm:$0xff] %v7939_v15  ;;  %v2386_v55 = vadd.f32 %v2385_v59, %v2297_v44  ;;  %v2443_v44 = vadd.f32 %v7536_v27, %v7875_v62  ;;  %v9158_v59 = vld [vmem:[#allocation68_spill] sm:$0xff]  ;;  %v9163_v27 = vld [vmem:[#allocation89_spill] sm:$0xff] }
 0x510   : > { %v7941_v46 = vpop.f32.mrf.mxu2  ;;  %v5208_v15 = vld [vmem:[#allocation10 + $0xd8] sm:$0xf0] }
 0x511   : > { %v2674_v43 = vmax.f32 %v2386_v55, 0.0 }
 0x512   : > { %v2528_v61 = vpop.f32.mrf.mxu3 }
 0x513   : > { %v2529_v40 = vadd.f32 %v2528_v61, %v2440_v23  ;;  %v7945_v57 = vpack.c.bf16 %v2674_v43, %v2670_v9  ;;  %v9160_v23 = vld [vmem:[#allocation39_spill] sm:$0xff] }
 0x514   : > { %v2302_v9 = vadd.f32 %v9160_v23, %v7713_v37 }
 0x515   : > { %9154 = vst [vmem:[#allocation78_spill] sm:$0xff] %v7945_v57  ;;  %v2619_v58 = vmax.f32 %v2529_v40, 0.0  ;;  %3409 = vmatmul.bf16.gmra.mxu2 %v7945_v57  ;;  %v9159_v40 = vld [vmem:[#allocation91_spill] sm:$0xff] }
 0x516   : > { %v2388_v38 = vpop.f32.mrf.mxu1  ;;  %v7948_v48 = vpop.f32.mrf.mxu0  ;;  %v2300_v55 = vadd.f32 %v9159_v40, %v7713_v37 }
 0x517   : > { %9155 = vst [vmem:[#allocation81_spill] sm:$0xff] %v7948_v48  ;;  %2570 = vmatmul.bf16.gmra.mxu3 %v7381_v56  ;;  %v7951_v0 = vpack.c.bf16 %v2619_v58, %v2615_v53  ;;  %v5569_v48 = vld [vmem:[#allocation10 + $0xd4] sm:$0xf] }
 0x518   : > { %v7953_v26 = vpop.f32.mrf.mxu2  ;;  %v2389_v56 = vadd.f32 %v2388_v38, %v2300_v55  ;;  %v5211_v40 = vor.u32 %v5569_v48, %v5208_v15  ;;  %v5294_v48 = vld [vmem:[#allocation10 + $0x180] sm:$0xf] }
 0x519   : > { %9156 = vst [vmem:[#allocation83_spill] sm:$0xff] %v7951_v0  ;;  %3285 = vmatmul.bf16.gmra.mxu1 %v9157_v17  ;;  %3552 = vmatmul.bf16.gmra.mxu0 %v9158_v59  ;;  %v2445_v17 = vadd.f32 %v9163_v27, %v7875_v62 }
 0x51a   : > { %v2531_v24 = vpop.f32.mrf.mxu3  ;;  %v2678_v57 = vmax.f32 %v2389_v56, 0.0  ;;  %3625 = vmatpush.bf16.msra.mxu1 %v5211_v40 }
 0x51b   : > { %v2532_v20 = vadd.f32 %v2531_v24, %v2443_v44 }
 0x51d   : > { %v2623_v38 = vmax.f32 %v2532_v20, 0.0 }
 0x51e   : > { %v2390_v43 = vpop.f32.mrf.mxu1  ;;  %v7963_v61 = vpop.f32.mrf.mxu0 }
 0x51f   : > { %9161 = vst [vmem:[#allocation86_spill] sm:$0xff] %v7963_v61  ;;  %v2391_v53 = vadd.f32 %v2390_v43, %v2302_v9 }
 0x520   : > { %v7965_v58 = vpop.f32.mrf.mxu2 }
 0x521   : > { %9162 = vst [vmem:[#allocation68_spill] sm:$0xff] %v7965_v58  ;;  %v2682_v59 = vmax.f32 %v2391_v53, 0.0  ;;  %v9168_v53 = vld [vmem:[#allocation30_spill] sm:$0xff] }
 0x522   : > { %v2533_v22 = vpop.f32.mrf.mxu3  ;;  %v2448_v15 = vadd.f32 %v9168_v53, %v7875_v62 }
 0x523   : > { %v2534_v44 = vadd.f32 %v2533_v22, %v2445_v17  ;;  %v7969_v24 = vpack.c.bf16 %v2682_v59, %v2678_v57  ;;  %v9169_v22 = vld [vmem:[#allocation94_spill] sm:$0xff]  ;;  %v9170_v57 = vld [vmem:[#allocation72_spill] sm:$0xff]  ;;  %v9171_v59 = vld [vmem:[#allocation41_spill] sm:$0xff] }
 0x524   : > { %v5592_v17 = vld [vmem:[#allocation10 + $0x184] sm:$0xf0]  ;;  %v2305_v40 = vadd.f32 %v9171_v59, %v7713_v37 }
 0x525   : > { %9164 = vst [vmem:[#allocation91_spill] sm:$0xff] %v7969_v24  ;;  %v2627_v55 = vmax.f32 %v2534_v44, 0.0  ;;  %3414 = vmatmul.bf16.gmra.mxu2 %v7969_v24  ;;  %v5295_v27 = vor.u32 %v5592_v17, %v5294_v48 }
 0x526   : > { %v2393_v23 = vpop.f32.mrf.mxu1  ;;  %v7972_v9 = vpop.f32.mrf.mxu0 }
 0x527   : > { %9165 = vst [vmem:[#allocation39_spill] sm:$0xff] %v7972_v9  ;;  %2575 = vmatmul.bf16.gmra.mxu3 %v7409_v13  ;;  %v7975_v43 = vpack.c.bf16 %v2627_v55, %v2623_v38  ;;  %v9172_v13 = vld [vmem:[#allocation43_spill] sm:$0xff]  ;;  %v2394_v55 = vadd.f32 %v2393_v23, %v2305_v40 }
 0x528   : > { %v7977_v56 = vpop.f32.mrf.mxu2  ;;  %3452 = vmatpush.bf16.msra.mxu3 %v5295_v27  ;;  %v2307_v38 = vadd.f32 %v9172_v13, %v7713_v37  ;;  %v9180_v13 = vld [vmem:[#allocation32_spill] sm:$0xff] }
 0x529   : > { %9166 = vst [vmem:[#allocation89_spill] sm:$0xff] %v7975_v43  ;;  %3290 = vmatmul.bf16.gmra.mxu1 %v9169_v22  ;;  %3557 = vmatmul.bf16.gmra.mxu0 %v9170_v57  ;;  %v9175_v57 = vld [vmem:[#allocation31_spill] sm:$0xff] }
 0x52a   : > { %9167 = vst [vmem:[#allocation102_spill] sm:$0xff] %v7977_v56  ;;  %v2536_v20 = vpop.f32.mrf.mxu3  ;;  %v2450_v61 = vadd.f32 %v9175_v57, %v7875_v62  ;;  %v2686_v56 = vmax.f32 %v2394_v55, 0.0  ;;  %v9181_v55 = vld [vmem:[#allocation96_spill] sm:$0xff]  ;;  %v9184_v57 = vld [vmem:[#allocation34_spill] sm:$0xff] }
 0x52b   : > { %v2537_v44 = vadd.f32 %v2536_v20, %v2448_v15 }
 0x52d   : > { %v2631_v15 = vmax.f32 %v2537_v44, 0.0 }
 0x52e   : > { %v2395_v24 = vpop.f32.mrf.mxu1  ;;  %v7987_v9 = vpop.f32.mrf.mxu0 }
 0x52f   : > { %9173 = vst [vmem:[#allocation30_spill] sm:$0xff] %v7987_v9  ;;  %v2396_v53 = vadd.f32 %v2395_v24, %v2307_v38  ;;  %v2453_v38 = vadd.f32 %v9180_v13, %v7875_v62  ;;  %v9187_v13 = vld [vmem:[#allocation95_spill] sm:$0xff]  ;;  %v5567_v9 = vld [vmem:[#allocation10 + $0xc4] sm:$0xf] }
 0x530   : > { %v7989_v22 = vpop.f32.mrf.mxu2 }
 0x531   : > { %9174 = vst [vmem:[#allocation72_spill] sm:$0xff] %v7989_v22  ;;  %v2690_v48 = vmax.f32 %v2396_v53, 0.0 }
 0x532   : > { %v2538_v17 = vpop.f32.mrf.mxu3 }
 0x533   : > { %v2539_v32 = vadd.f32 %v2538_v17, %v2450_v61  ;;  %v7993_v59 = vpack.c.bf16 %v2690_v48, %v2686_v56  ;;  %v9182_v61 = vld [vmem:[#allocation77_spill] sm:$0xff]  ;;  %v2312_v48 = vadd.f32 %v9184_v57, %v7713_v37  ;;  %v5589_v57 = vld [vmem:[#allocation10 + $0x174] sm:$0xf] }
 0x535   : > { %9176 = vst [vmem:[#allocation41_spill] sm:$0xff] %v7993_v59  ;;  %v2635_v20 = vmax.f32 %v2539_v32, 0.0  ;;  %3419 = vmatmul.bf16.gmra.mxu2 %v7993_v59  ;;  %v9183_v32 = vld [vmem:[#allocation45_spill] sm:$0xff] }
 0x536   : > { %v2398_v23 = vpop.f32.mrf.mxu1  ;;  %v7996_v27 = vpop.f32.mrf.mxu0  ;;  %v2310_v44 = vadd.f32 %v9183_v32, %v7713_v37 }
 0x537   : > { %9177 = vst [vmem:[#allocation43_spill] sm:$0xff] %v7996_v27  ;;  %2580 = vmatmul.bf16.gmra.mxu3 %v7435_v28  ;;  %v7999_v24 = vpack.c.bf16 %v2635_v20, %v2631_v15 }
 0x538   : > { %v8001_v40 = vpop.f32.mrf.mxu2  ;;  %v2399_v28 = vadd.f32 %v2398_v23, %v2310_v44  ;;  %v5288_v23 = vld [vmem:[#allocation10 + $0x178] sm:$0xf0] }
 0x539   : > { %9178 = vst [vmem:[#allocation31_spill] sm:$0xff] %v7999_v24  ;;  %3295 = vmatmul.bf16.gmra.mxu1 %v9181_v55  ;;  %3562 = vmatmul.bf16.gmra.mxu0 %v9182_v61  ;;  %v2455_v55 = vadd.f32 %v9187_v13, %v7875_v62  ;;  %v5291_v44 = vor.u32 %v5589_v57, %v5288_v23  ;;  %v9194_v13 = vld [vmem:[#allocation80_spill] sm:$0xff] }
 0x53a   : > { %9179 = vst [vmem:[#allocation103_spill] sm:$0xff] %v8001_v40  ;;  %v2541_v56 = vpop.f32.mrf.mxu3  ;;  %v2694_v27 = vmax.f32 %v2399_v28, 0.0  ;;  %v5200_v40 = vld [vmem:[#allocation10 + $0xc8] sm:$0xf0]  ;;  %v5587_v28 = vld [vmem:[#allocation10 + $0x164] sm:$0xf] }
 0x53b   : > { %v2542_v53 = vadd.f32 %v2541_v56, %v2453_v38  ;;  %v5203_v32 = vor.u32 %v5567_v9, %v5200_v40  ;;  %3712 = vmatpush.bf16.msra.mxu2 %v5291_v44  ;;  %v9192_v40 = vld [vmem:[#allocation47_spill] sm:$0xff]  ;;  %v5585_v44 = vld [vmem:[#allocation10 + $0x154] sm:$0xf] }
 0x53d   : > { %3626 = vmatpush.bf16.msra.mxu1 %v5203_v32  ;;  %v5352_v32 = vld [vmem:[#allocation10 + $0x1f8] sm:$0xf0] }
 0x53e   : > { %v2400_v17 = vpop.f32.mrf.mxu1  ;;  %v8011_v15 = vpop.f32.mrf.mxu0 }
 0x53f   : > { %9185 = vst [vmem:[#allocation32_spill] sm:$0xff] %v8011_v15  ;;  %v2401_v20 = vadd.f32 %v2400_v17, %v2312_v48  ;;  %v2639_v15 = vmax.f32 %v2542_v53, 0.0  ;;  %v9193_v53 = vld [vmem:[#allocation97_spill] sm:$0xff] }
 0x540   : > { %v8013_v59 = vpop.f32.mrf.mxu2 }
 0x541   : > { %9186 = vst [vmem:[#allocation77_spill] sm:$0xff] %v8013_v59  ;;  %v2698_v61 = vmax.f32 %v2401_v20, 0.0  ;;  %v5280_v20 = vld [vmem:[#allocation10 + $0x168] sm:$0xf0] }
 0x542   : > { %v2543_v22 = vpop.f32.mrf.mxu3 }
 0x543   : > { %v2544_v38 = vadd.f32 %v2543_v22, %v2455_v55  ;;  %v8017_v56 = vpack.c.bf16 %v2698_v61, %v2694_v27  ;;  %v5283_v27 = vor.u32 %v5587_v28, %v5280_v20  ;;  %v2458_v55 = vadd.f32 %v9192_v40, %v7875_v62  ;;  %v5605_v61 = vld [vmem:[#allocation10 + $0x1f4] sm:$0xf]  ;;  %v9196_v20 = vld [vmem:[#allocation50_spill] sm:$0xff] }
 0x544   : > { %v5355_v57 = vor.u32 %v5605_v61, %v5352_v32  ;;  %v2317_v40 = vadd.f32 %v9196_v20, %v7713_v37  ;;  %v5264_v61 = vld [vmem:[#allocation10 + $0x148] sm:$0xf0] }
 0x545   : > { %9188 = vst [vmem:[#allocation45_spill] sm:$0xff] %v8017_v56  ;;  %v2643_v48 = vmax.f32 %v2544_v38, 0.0  ;;  %3424 = vmatmul.bf16.gmra.mxu2 %v8017_v56 }
 0x546   : > { %v2403_v17 = vpop.f32.mrf.mxu1  ;;  %v8020_v59 = vpop.f32.mrf.mxu0  ;;  %3713 = vmatpush.bf16.msra.mxu2 %v5283_v27  ;;  %3801 = vmatpush.bf16.msrb.mxu3 %v5355_v57 }
 0x547   : > { %9189 = vst [vmem:[#allocation34_spill] sm:$0xff] %v8020_v59  ;;  %2585 = vmatmul.bf16.gmra.mxu3 %v7463_v50  ;;  %v8023_v9 = vpack.c.bf16 %v2643_v48, %v2639_v15  ;;  %v9195_v50 = vld [vmem:[#allocation48_spill] sm:$0xff]  ;;  %v5272_v48 = vld [vmem:[#allocation10 + $0x158] sm:$0xf0] }
 0x548   : > { %v8025_v22 = vpop.f32.mrf.mxu2  ;;  %v2315_v23 = vadd.f32 %v9195_v50, %v7713_v37  ;;  %v5275_v28 = vor.u32 %v5585_v44, %v5272_v48 }
 0x549   : > { %9190 = vst [vmem:[#allocation95_spill] sm:$0xff] %v8023_v9  ;;  %3300 = vmatmul.bf16.gmra.mxu1 %v9193_v53  ;;  %3567 = vmatmul.bf16.gmra.mxu0 %v9194_v13 }
 0x54a   : > { %9191 = vst [vmem:[#allocation104_spill] sm:$0xff] %v8025_v22  ;;  %v2546_v38 = vpop.f32.mrf.mxu3  ;;  %v2404_v56 = vadd.f32 %v2403_v17, %v2315_v23  ;;  %3714 = vmatpush.bf16.msra.mxu2 %v5275_v28  ;;  %v5583_v22 = vld [vmem:[#allocation10 + $0x144] sm:$0xf]  ;;  %v5581_v17 = vld [vmem:[#allocation10 + $0x134] sm:$0xf] }
 0x54b   : > { %v2547_v15 = vadd.f32 %v2546_v38, %v2458_v55  ;;  %v5267_v32 = vor.u32 %v5583_v22, %v5264_v61  ;;  %v9199_v55 = vld [vmem:[#allocation36_spill] sm:$0xff]  ;;  %v5256_v23 = vld [vmem:[#allocation10 + $0x138] sm:$0xf0]  ;;  %v5248_v22 = vld [vmem:[#allocation10 + $0x128] sm:$0xf0] }
 0x54c   : > { %v2460_v38 = vadd.f32 %v9199_v55, %v7875_v62  ;;  %v2702_v50 = vmax.f32 %v2404_v56, 0.0  ;;  %v5579_v56 = vld [vmem:[#allocation10 + $0x124] sm:$0xf]  ;;  %v9204_v55 = vld [vmem:[#allocation52_spill] sm:$0xff] }
 0x54d   : > { %v2647_v28 = vmax.f32 %v2547_v15, 0.0  ;;  %v9205_v15 = vld [vmem:[#allocation99_spill] sm:$0xff] }
 0x54e   : > { %v2405_v53 = vpop.f32.mrf.mxu1  ;;  %v8035_v59 = vpop.f32.mrf.mxu0  ;;  %3715 = vmatpush.bf16.msra.mxu2 %v5267_v32  ;;  %v5251_v32 = vor.u32 %v5579_v56, %v5248_v22 }
 0x54f   : > { %9197 = vst [vmem:[#allocation47_spill] sm:$0xff] %v8035_v59  ;;  %v2406_v13 = vadd.f32 %v2405_v53, %v2317_v40  ;;  %v5259_v59 = vor.u32 %v5581_v17, %v5256_v23  ;;  %v5240_v17 = vld [vmem:[#allocation10 + $0x118] sm:$0xf0] }
 0x550   : > { %v8037_v27 = vpop.f32.mrf.mxu2 }
 0x551   : > { %9198 = vst [vmem:[#allocation80_spill] sm:$0xff] %v8037_v27  ;;  %v2706_v57 = vmax.f32 %v2406_v13, 0.0 }
 0x552   : > { %v2548_v44 = vpop.f32.mrf.mxu3  ;;  %3716 = vmatpush.bf16.msra.mxu2 %v5259_v59  ;;  %v9207_v59 = vld [vmem:[#allocation98_spill] sm:$0xff] }
 0x553   : > { %v2549_v48 = vadd.f32 %v2548_v44, %v2460_v38  ;;  %v8041_v20 = vpack.c.bf16 %v2706_v57, %v2702_v50  ;;  %v2463_v38 = vadd.f32 %v9204_v55, %v7875_v62  ;;  %v9206_v50 = vld [vmem:[#allocation82_spill] sm:$0xff]  ;;  %v2320_v44 = vadd.f32 %v9207_v59, %v7713_v37  ;;  %v5232_v59 = vld [vmem:[#allocation10 + $0x108] sm:$0xf0] }
 0x555   : > { %9200 = vst [vmem:[#allocation48_spill] sm:$0xff] %v8041_v20  ;;  %v2651_v53 = vmax.f32 %v2549_v48, 0.0  ;;  %3429 = vmatmul.bf16.gmra.mxu2 %v8041_v20  ;;  %v5577_v48 = vld [vmem:[#allocation10 + $0x114] sm:$0xf] }
 0x556   : > { %v2408_v40 = vpop.f32.mrf.mxu1  ;;  %v8044_v27 = vpop.f32.mrf.mxu0  ;;  %3717 = vmatpush.bf16.msra.mxu2 %v5251_v32  ;;  %v5243_v23 = vor.u32 %v5577_v48, %v5240_v17 }
 0x557   : > { %9201 = vst [vmem:[#allocation50_spill] sm:$0xff] %v8044_v27  ;;  %2590 = vmatmul.bf16.gmra.mxu3 %v7488_v36  ;;  %v8047_v13 = vpack.c.bf16 %v2651_v53, %v2647_v28  ;;  %v9208_v28 = vld [vmem:[#allocation38_spill] sm:$0xff]  ;;  %v2409_v56 = vadd.f32 %v2408_v40, %v2320_v44 }
 0x558   : > { %v8049_v61 = vpop.f32.mrf.mxu2  ;;  %v2322_v53 = vadd.f32 %v9208_v28, %v7713_v37  ;;  %v5575_v27 = vld [vmem:[#allocation10 + $0x104] sm:$0xf] }
 0x559   : > { %9202 = vst [vmem:[#allocation36_spill] sm:$0xff] %v8047_v13  ;;  %3305 = vmatmul.bf16.gmra.mxu1 %v9205_v15  ;;  %3572 = vmatmul.bf16.gmra.mxu0 %v9206_v50  ;;  %v5565_v15 = vld [vmem:[#allocation10 + $0xb4] sm:$0xf]  ;;  %v5192_v50 = vld [vmem:[#allocation10 + $0xb8] sm:$0xf0]  ;;  %v2710_v48 = vmax.f32 %v2409_v56, 0.0  ;;  %v5235_v58 = vor.u32 %v5575_v27, %v5232_v59 }
 0x55a   : > { %9203 = vst [vmem:[#allocation105_spill] sm:$0xff] %v8049_v61  ;;  %v2551_v57 = vpop.f32.mrf.mxu3  ;;  %3718 = vmatpush.bf16.msra.mxu2 %v5243_v23  ;;  %v5195_v61 = vor.u32 %v5565_v15, %v5192_v50  ;;  %v5603_v15 = vld [vmem:[#allocation10 + $0x1e4] sm:$0xf]  ;;  %v5344_v50 = vld [vmem:[#allocation10 + $0x1e8] sm:$0xf0]  ;;  %v9212_v59 = vld [vmem:[#allocation40_spill] sm:$0xff] }
 0x55b   : > { %v2552_v36 = vadd.f32 %v2551_v57, %v2463_v38  ;;  %v9210_v38 = vld [vmem:[#allocation54_spill] sm:$0xff] }
 0x55c   : > { %v2465_v57 = vadd.f32 %v9210_v38, %v7875_v62  ;;  %3627 = vmatpush.bf16.msra.mxu1 %v5195_v61  ;;  %v5347_v61 = vor.u32 %v5603_v15, %v5344_v50  ;;  %v2325_v38 = vadd.f32 %v9212_v59, %v7713_v37  ;;  %v9216_v15 = vld [vmem:[#allocation57_spill] sm:$0xff] }
 0x55d   : > { %v2655_v23 = vmax.f32 %v2552_v36, 0.0  ;;  %v2470_v50 = vadd.f32 %v9216_v15, %v7875_v62 }
 0x55e   : > { %v2410_v22 = vpop.f32.mrf.mxu1  ;;  %v8059_v20 = vpop.f32.mrf.mxu0  ;;  %3719 = vmatpush.bf16.msra.mxu2 %v5235_v58  ;;  %v9211_v58 = vld [vmem:[#allocation84_spill] sm:$0xff]  ;;  %3802 = vmatpush.bf16.msrb.mxu3 %v5347_v61 }
 0x55f   : > { %9209 = vst [vmem:[#allocation52_spill] sm:$0xff] %v8059_v20  ;;  %v2411_v55 = vadd.f32 %v2410_v22, %v2322_v53 }
 0x560   : > { %v8061_v32 = vpop.f32.mrf.mxu2 }
 0x561   : > { %v2714_v17 = vmax.f32 %v2411_v55, 0.0  ;;  %v2468_v55 = vadd.f32 %v7691_v25, %v7875_v62 }
 0x562   : > { %v2553_v28 = vpop.f32.mrf.mxu3 }
 0x563   : > { %v2554_v40 = vadd.f32 %v2553_v28, %v2465_v57  ;;  %v8065_v44 = vpack.c.bf16 %v2714_v17, %v2710_v48  ;;  %v9213_v48 = vld [vmem:[#allocation42_spill] sm:$0xff] }
 0x564   : > { %v2327_v17 = vadd.f32 %v9213_v48, %v7713_v37 }
 0x565   : > { %v2659_v53 = vmax.f32 %v2554_v40, 0.0  ;;  %3434 = vmatmul.bf16.gmra.mxu2 %v8065_v44  ;;  %v8083_v40 = vld [vmem:[#allocation11] sm:$0x3] }
 0x566   : > { %v2413_v22 = vpop.f32.mrf.mxu1  ;;  %v8068_v20 = vpop.f32.mrf.mxu0  ;;  %9214 = vst [vmem:[#allocation82_spill] sm:$0xff] %v8083_v40 }
 0x567   : > { %3453 = vmatmul.bf16.vlgmr.msra.gmra.mxu3 %v7904_v42  ;;  %v8071_v56 = vpack.c.bf16 %v2659_v53, %v2655_v23  ;;  %v2414_v28 = vadd.f32 %v2413_v22, %v2325_v38  ;;  %v9218_v22 = vld [vmem:[#allocation100_spill] sm:$0xff] }
 0x568   : > { %v8073_v27 = vpop.f32.mrf.mxu2 }
 0x569   : > { %3310 = vmatmul.bf16.gmra.mxu1 %v7687_v31  ;;  %3577 = vmatmul.bf16.gmra.mxu0 %v9211_v58  ;;  %v8090_v58 = vperm.slane %v8083_v40, 0  ;;  %v2718_v61 = vmax.f32 %v2414_v28, 0.0  ;;  %v9225_v40 = vld [vmem:[#allocation59_spill] sm:$0xff] }
 0x56a   : > { %v2556_v36 = vpop.f32.mrf.mxu3 }
 0x56b   : > { %v2557_v57 = vadd.f32 %v2556_v36, %v2468_v55  ;;  %v3188_v38 = vadd.f32 %v9218_v22, %v8090_v58  ;;  %v3190_v22 = vadd.f32 %v7728_v63, %v8090_v58 }
 0x56d   : > { %v2663_v48 = vmax.f32 %v2557_v57, 0.0 }
 0x56e   : > { %v2415_v23 = vpop.f32.mrf.mxu1  ;;  %v8085_v53 = vpop.f32.mrf.mxu0 }
 0x56f   : > { %9215 = vst [vmem:[#allocation98_spill] sm:$0xff] %v8085_v53  ;;  %v2416_v25 = vadd.f32 %v2415_v23, %v2327_v17 }
 0x570   : > { %v8092_v59 = vpop.f32.mrf.mxu2 }
 0x571   : > { %v2722_v31 = vmax.f32 %v2416_v25, 0.0  ;;  %v9221_v25 = vld [vmem:[#allocation46_spill] sm:$0xff] }
 0x572   : > { %v2558_v55 = vpop.f32.mrf.mxu3 }
 0x573   : > { %v2559_v36 = vadd.f32 %v2558_v55, %v2470_v50  ;;  %v8094_v37 = vpack.c.bf16 %v2722_v31, %v2718_v61  ;;  %v2473_v31 = vadd.f32 %v9221_v25, %v7875_v62  ;;  %v9222_v50 = vld [vmem:[#allocation101_spill] sm:$0xff]  ;;  %v9223_v61 = vld [vmem:[#allocation87_spill] sm:$0xff]  ;;  %v2475_v25 = vadd.f32 %v7737_v12, %v7875_v62  ;;  %v5601_v12 = vld [vmem:[#allocation10 + $0x1d4] sm:$0xf] }
 0x575   : > { %9217 = vst [vmem:[#allocation38_spill] sm:$0xff] %v8094_v37  ;;  %v2667_v53 = vmax.f32 %v2559_v36, 0.0  ;;  %3439 = vmatmul.bf16.gmra.mxu2 %v8094_v37 }
 0x576   : > { %v3276_v17 = vpop.f32.mrf.mxu1  ;;  %v8099_v23 = vpop.f32.mrf.mxu0 }
 0x577   : > { %9219 = vst [vmem:[#allocation54_spill] sm:$0xff] %v8099_v23  ;;  %v8101_v15 = vadd.f32 %v3276_v17, %v3188_v38  ;;  %3458 = vmatmul.bf16.gmra.mxu3 %v7927_v4  ;;  %v8104_v28 = vpack.c.bf16 %v2667_v53, %v2663_v48  ;;  %v5563_v53 = vld [vmem:[#allocation10 + $0xa4] sm:$0xf]  ;;  %v5184_v48 = vld [vmem:[#allocation10 + $0xa8] sm:$0xf0] }
 0x578   : > { %v8110_v55 = vpop.f32.mrf.mxu2  ;;  %v5187_v37 = vor.u32 %v5563_v53, %v5184_v48  ;;  %v5336_v53 = vld [vmem:[#allocation10 + $0x1d8] sm:$0xf0]  ;;  %v9229_v48 = vld [vmem:[#allocation90_spill] sm:$0xff] }
 0x579   : > { %9220 = vst [vmem:[#allocation84_spill] sm:$0xff] %v8104_v28  ;;  %3315 = vmatmul.bf16.gmra.mxu1 %v9222_v50  ;;  %3582 = vmatmul.bf16.gmra.mxu0 %v9223_v61 }
 0x57a   : > { %v2561_v57 = vpop.f32.mrf.mxu3  ;;  %3628 = vmatpush.bf16.msra.mxu1 %v5187_v37 }
 0x57b   : > { %v2562_v36 = vadd.f32 %v2561_v57, %v2473_v31  ;;  %v3193_v31 = vadd.f32 %v7735_v29, %v8090_v58  ;;  %v2478_v29 = vadd.f32 %v7754_v60, %v7875_v62 }
 0x57d   : > { %v2671_v57 = vmax.f32 %v2562_v36, 0.0  ;;  %v9228_v36 = vld [vmem:[#allocation61_spill] sm:$0xff] }
 0x57e   : > { %v3278_v38 = vpop.f32.mrf.mxu1  ;;  %v8114_v17 = vpop.f32.mrf.mxu0 }
 0x57f   : > { %9224 = vst [vmem:[#allocation40_spill] sm:$0xff] %v8114_v17  ;;  %v8116_v4 = vadd.f32 %v3278_v38, %v3190_v22 }
 0x580   : > { %v8122_v23 = vpop.f32.mrf.mxu2 }
 0x582   : > { %v2563_v50 = vpop.f32.mrf.mxu3 }
 0x583   : > { %v2564_v61 = vadd.f32 %v2563_v50, %v2475_v25  ;;  %v5339_v50 = vor.u32 %v5601_v12, %v5336_v53 }
 0x585   : > { %v2675_v63 = vmax.f32 %v2564_v61, 0.0  ;;  %3720 = vmatmul.bf16.vlgmr.msra.gmra.mxu2 %v9225_v40  ;;  %3803 = vmatpush.bf16.msrb.mxu3 %v5339_v50  ;;  %v3195_v61 = vadd.f32 %v7750_v54, %v8090_v58 }
 0x586   : > { %v3281_v22 = vpop.f32.mrf.mxu1  ;;  %v8125_v38 = vpop.f32.mrf.mxu0 }
 0x587   : > { %9226 = vst [vmem:[#allocation42_spill] sm:$0xff] %v8125_v38  ;;  %v8127_v17 = vadd.f32 %v3281_v22, %v3193_v31  ;;  %3463 = vmatmul.bf16.gmra.mxu3 %v7951_v0  ;;  %v8130_v37 = vpack.c.bf16 %v2675_v63, %v2671_v57  ;;  %v9231_v63 = vld [vmem:[#allocation53_spill] sm:$0xff] }
 0x588   : > { %v8140_v0 = vpop.f32.mrf.mxu2  ;;  %v2480_v60 = vadd.f32 %v9231_v63, %v7875_v62 }
 0x589   : > { %9227 = vst [vmem:[#allocation57_spill] sm:$0xff] %v8130_v37  ;;  %3320 = vmatmul.bf16.gmra.mxu1 %v9228_v36  ;;  %3587 = vmatmul.bf16.gmra.mxu0 %v9229_v48  ;;  %v9232_v48 = vld [vmem:[#allocation51_spill] sm:$0xff] }
 0x58a   : > { %v2566_v40 = vpop.f32.mrf.mxu3  ;;  %v3198_v36 = vadd.f32 %v9232_v48, %v8090_v58  ;;  %v3200_v48 = vadd.f32 %v7774_v16, %v8090_v58 }
 0x58b   : > { %v2567_v25 = vadd.f32 %v2566_v40, %v2478_v29  ;;  %v9233_v40 = vld [vmem:[#allocation49_spill] sm:$0xff] }
 0x58d   : > { %v2679_v50 = vmax.f32 %v2567_v25, 0.0  ;;  %v9238_v25 = vld [vmem:[#allocation93_spill] sm:$0xff] }
 0x58e   : > { %v3283_v31 = vpop.f32.mrf.mxu1  ;;  %v8138_v22 = vpop.f32.mrf.mxu0 }
 0x58f   : > { %9230 = vst [vmem:[#allocation100_spill] sm:$0xff] %v8138_v22  ;;  %v8142_v57 = vadd.f32 %v3283_v31, %v3195_v61  ;;  %v2483_v31 = vadd.f32 %v7780_v1, %v7875_v62  ;;  %v2485_v1 = vadd.f32 %v7798_v18, %v7875_v62  ;;  %v5599_v18 = vld [vmem:[#allocation10 + $0x1c4] sm:$0xf] }
 0x590   : > { %v8158_v63 = vpop.f32.mrf.mxu2 }
 0x591   : > { %9236 = vst [vmem:[#allocation59_spill] sm:$0xff] %v8158_v63  ;;  %v9241_v63 = vld [vmem:[#allocation55_spill] sm:$0xff] }
 0x592   : > { %v2568_v12 = vpop.f32.mrf.mxu3 }
 0x593   : > { %v2569_v53 = vadd.f32 %v2568_v12, %v2480_v60  ;;  %v9237_v60 = vld [vmem:[#allocation63_spill] sm:$0xff] }
 0x595   : > { %v2683_v29 = vmax.f32 %v2569_v53, 0.0  ;;  %3725 = vmatmul.bf16.gmra.mxu2 %v9233_v40 }
 0x596   : > { %v3286_v54 = vpop.f32.mrf.mxu1  ;;  %v8149_v38 = vpop.f32.mrf.mxu0 }
 0x597   : > { %9234 = vst [vmem:[#allocation46_spill] sm:$0xff] %v8149_v38  ;;  %v8151_v22 = vadd.f32 %v3286_v54, %v3198_v36  ;;  %3468 = vmatmul.bf16.gmra.mxu3 %v7975_v43  ;;  %v8154_v61 = vpack.c.bf16 %v2683_v29, %v2679_v50  ;;  %v5561_v50 = vld [vmem:[#allocation10 + $0x94] sm:$0xf]  ;;  %v5176_v29 = vld [vmem:[#allocation10 + $0x98] sm:$0xf0] }
 0x598   : > { %v5179_v43 = vor.u32 %v5561_v50, %v5176_v29  ;;  %v5328_v50 = vld [vmem:[#allocation10 + $0x1c8] sm:$0xf0] }
 0x599   : > { %9235 = vst [vmem:[#allocation87_spill] sm:$0xff] %v8154_v61  ;;  %3325 = vmatmul.bf16.gmra.mxu1 %v9237_v60  ;;  %3592 = vmatmul.bf16.gmra.mxu0 %v9238_v25  ;;  %v8170_v60 = vpop.f32.mrf.mxu2  ;;  %v5331_v29 = vor.u32 %v5599_v18, %v5328_v50 }
 0x59a   : > { %v2571_v12 = vpop.f32.mrf.mxu3  ;;  %3629 = vmatpush.bf16.msra.mxu1 %v5179_v43  ;;  %9240 = vst [vmem:[#allocation53_spill] sm:$0xff] %v8170_v60 }
 0x59b   : > { %v2572_v53 = vadd.f32 %v2571_v12, %v2483_v31  ;;  %v3203_v31 = vadd.f32 %v7783_v10, %v8090_v58  ;;  %v9245_v10 = vld [vmem:[#allocation66_spill] sm:$0xff]  ;;  %3804 = vmatpush.bf16.msrb.mxu3 %v5331_v29 }
 0x59d   : > { %v2687_v16 = vmax.f32 %v2572_v53, 0.0  ;;  %v9246_v53 = vld [vmem:[#allocation33_spill] sm:$0xff] }
 0x59e   : > { %v3288_v36 = vpop.f32.mrf.mxu1  ;;  %v8164_v40 = vpop.f32.mrf.mxu0 }
 0x59f   : > { %9239 = vst [vmem:[#allocation90_spill] sm:$0xff] %v8164_v40  ;;  %v8166_v54 = vadd.f32 %v3288_v36, %v3200_v48 }
 0x5a2   : > { %v2573_v38 = vpop.f32.mrf.mxu3 }
 0x5a3   : > { %v2574_v25 = vadd.f32 %v2573_v38, %v2485_v1  ;;  %v9244_v38 = vld [vmem:[#allocation62_spill] sm:$0xff] }
 0x5a4   : > { %v2488_v1 = vadd.f32 %v9244_v38, %v7875_v62  ;;  %v9250_v38 = vld [vmem:[#allocation69_spill] sm:$0xff] }
 0x5a5   : > { %v2691_v12 = vmax.f32 %v2574_v25, 0.0  ;;  %3730 = vmatmul.bf16.gmra.mxu2 %v9241_v63 }
 0x5a6   : > { %v3291_v48 = vpop.f32.mrf.mxu1  ;;  %v8175_v36 = vpop.f32.mrf.mxu0 }
 0x5a7   : > { %9242 = vst [vmem:[#allocation51_spill] sm:$0xff] %v8175_v36  ;;  %v8177_v40 = vadd.f32 %v3291_v48, %v3203_v31  ;;  %3473 = vmatmul.bf16.gmra.mxu3 %v7999_v24  ;;  %v8180_v43 = vpack.c.bf16 %v2691_v12, %v2687_v16  ;;  %v9247_v31 = vld [vmem:[#allocation58_spill] sm:$0xff]  ;;  %v8188_v36 = vpop.f32.mrf.mxu2  ;;  %v2490_v12 = vadd.f32 %v7824_v47, %v7875_v62  ;;  %v5614_v47 = vld [vmem:[#allocation13 + $0x38] sm:$0xff] }
 0x5a8   : > { %v3205_v48 = vadd.f32 %v9247_v31, %v8090_v58  ;;  %9248 = vst [vmem:[#allocation93_spill] sm:$0xff] %v8188_v36  ;;  %4118 = vmatpush.bf16.msrb.mxu0 %v5614_v47 }
 0x5a9   : > { %9243 = vst [vmem:[#allocation49_spill] sm:$0xff] %v8180_v43  ;;  %3330 = vmatmul.bf16.gmra.mxu1 %v9245_v10  ;;  %3597 = vmatmul.bf16.gmra.mxu0 %v9246_v53  ;;  %v3208_v53 = vadd.f32 %v9250_v38, %v8090_v58  ;;  %v5613_v38 = vld [vmem:[#allocation13 + $0x30] sm:$0xff] }
 0x5aa   : > { %v2576_v63 = vpop.f32.mrf.mxu3 }
 0x5ab   : > { %v2577_v25 = vadd.f32 %v2576_v63, %v2488_v1  ;;  %v9251_v63 = vld [vmem:[#allocation60_spill] sm:$0xff] }
 0x5ac   : > { %4119 = vmatpush.bf16.msrb.mxu0 %v5613_v38 }
 0x5ad   : > { %v2695_v29 = vmax.f32 %v2577_v25, 0.0  ;;  %v9256_v25 = vld [vmem:[#allocation35_spill] sm:$0xff] }
 0x5ae   : > { %v3293_v24 = vpop.f32.mrf.mxu1  ;;  %v8190_v60 = vpop.f32.mrf.mxu0 }
 0x5af   : > { %9249 = vst [vmem:[#allocation55_spill] sm:$0xff] %v8190_v60  ;;  %v8192_v16 = vadd.f32 %v3293_v24, %v3205_v48  ;;  %v8201_v36 = vpop.f32.mrf.mxu2  ;;  %v2493_v48 = vadd.f32 %v7842_v3, %v7875_v62 }
 0x5b0   : > { %9253 = vst [vmem:[#allocation33_spill] sm:$0xff] %v8201_v36 }
 0x5b2   : > { %v2578_v18 = vpop.f32.mrf.mxu3 }
 0x5b3   : > { %v2579_v50 = vadd.f32 %v2578_v18, %v2490_v12  ;;  %v9255_v12 = vld [vmem:[#allocation71_spill] sm:$0xff] }
 0x5b5   : > { %v2699_v1 = vmax.f32 %v2579_v50, 0.0  ;;  %3735 = vmatmul.bf16.gmra.mxu2 %v9251_v63 }
 0x5b6   : > { %v3296_v31 = vpop.f32.mrf.mxu1  ;;  %v8199_v10 = vpop.f32.mrf.mxu0 }
 0x5b7   : > { %9252 = vst [vmem:[#allocation62_spill] sm:$0xff] %v8199_v10  ;;  %v8203_v60 = vadd.f32 %v3296_v31, %v3208_v53  ;;  %3478 = vmatmul.bf16.gmra.mxu3 %v8023_v9  ;;  %v8206_v24 = vpack.c.bf16 %v2699_v1, %v2695_v29  ;;  %v3210_v53 = vadd.f32 %v7820_v6, %v8090_v58  ;;  %v5559_v1 = vld [vmem:[#allocation10 + $0x84] sm:$0xf]  ;;  %v5168_v9 = vld [vmem:[#allocation10 + $0x88] sm:$0xf0] }
 0x5b8   : > { %v5171_v3 = vor.u32 %v5559_v1, %v5168_v9  ;;  %v5612_v10 = vld [vmem:[#allocation13 + $0x28] sm:$0xff]  ;;  %v5611_v6 = vld [vmem:[#allocation13 + $0x20] sm:$0xff] }
 0x5b9   : > { %9254 = vst [vmem:[#allocation58_spill] sm:$0xff] %v8206_v24  ;;  %3335 = vmatmul.bf16.gmra.mxu1 %v9255_v12  ;;  %3602 = vmatmul.bf16.gmra.mxu0 %v9256_v25  ;;  %v2495_v25 = vadd.f32 %v7853_v41, %v7875_v62  ;;  %v8220_v12 = vpop.f32.mrf.mxu2  ;;  %v5597_v41 = vld [vmem:[#allocation10 + $0x1b4] sm:$0xf] }
 0x5ba   : > { %v2581_v18 = vpop.f32.mrf.mxu3  ;;  %3630 = vmatpush.bf16.msra.mxu1 %v5171_v3  ;;  %4120 = vmatpush.bf16.msrb.mxu0 %v5612_v10  ;;  %v5320_v3 = vld [vmem:[#allocation10 + $0x1b8] sm:$0xf0] }
 0x5bb   : > { %v2582_v50 = vadd.f32 %v2581_v18, %v2493_v48  ;;  %v9258_v18 = vld [vmem:[#allocation74_spill] sm:$0xff] }
 0x5bd   : > { %v2703_v38 = vmax.f32 %v2582_v50, 0.0  ;;  %v2498_v50 = vadd.f32 %v7870_v14, %v7875_v62  ;;  %v2500_v14 = vadd.f32 %v7889_v35, %v7875_v62 }
 0x5be   : > { %v3298_v63 = vpop.f32.mrf.mxu1  ;;  %v8214_v31 = vpop.f32.mrf.mxu0  ;;  %4121 = vmatpush.bf16.msrb.mxu0 %v5611_v6 }
 0x5bf   : > { %9257 = vst [vmem:[#allocation69_spill] sm:$0xff] %v8214_v31  ;;  %v8216_v29 = vadd.f32 %v3298_v63, %v3210_v53  ;;  %v3213_v31 = vadd.f32 %v9258_v18, %v8090_v58  ;;  %v9259_v63 = vld [vmem:[#allocation64_spill] sm:$0xff]  ;;  %v9263_v18 = vld [vmem:[#allocation37_spill] sm:$0xff] }
 0x5c2   : > { %v2583_v47 = vpop.f32.mrf.mxu3 }
 0x5c3   : > { %v2584_v48 = vadd.f32 %v2583_v47, %v2495_v25  ;;  %v5323_v25 = vor.u32 %v5597_v41, %v5320_v3  ;;  %v5610_v47 = vld [vmem:[#allocation13 + $0x18] sm:$0xff]  ;;  %v5608_v3 = vld [vmem:[#allocation13 + $0x8] sm:$0xff] }
 0x5c4   : > { %4122 = vmatpush.bf16.msrb.mxu0 %v5610_v47  ;;  %v5607_v47 = vld [vmem:[#allocation13] sm:$0xff] }
 0x5c5   : > { %v2707_v53 = vmax.f32 %v2584_v48, 0.0  ;;  %3740 = vmatmul.bf16.gmra.mxu2 %v9259_v63  ;;  %v9262_v48 = vld [vmem:[#allocation75_spill] sm:$0xff]  ;;  %3805 = vmatpush.bf16.msrb.mxu3 %v5323_v25 }
 0x5c6   : > { %v3301_v36 = vpop.f32.mrf.mxu1  ;;  %v8227_v1 = vpop.f32.mrf.mxu0  ;;  %v5609_v63 = vld [vmem:[#allocation13 + $0x10] sm:$0xff] }
 0x5c7   : > { %v8225_v9 = vadd.f32 %v3301_v36, %v3213_v31  ;;  %9260 = vst [vmem:[#allocation60_spill] sm:$0xff] %v8227_v1  ;;  %3483 = vmatmul.bf16.gmra.mxu3 %v8047_v13  ;;  %v8230_v10 = vpack.c.bf16 %v2707_v53, %v2703_v38  ;;  %v8236_v36 = vpop.f32.mrf.mxu2  ;;  %v9264_v13 = vld [vmem:[#allocation65_spill] sm:$0xff] }
 0x5c8   : > { %v3215_v38 = vadd.f32 %v9264_v13, %v8090_v58  ;;  %4123 = vmatpush.bf16.msrb.mxu0 %v5609_v63 }
 0x5c9   : > { %9261 = vst [vmem:[#allocation35_spill] sm:$0xff] %v8230_v10  ;;  %3340 = vmatmul.bf16.gmra.mxu1 %v9262_v48  ;;  %3607 = vmatmul.bf16.gmra.mxu0 %v9263_v18 }
 0x5ca   : > { %v2586_v6 = vpop.f32.mrf.mxu3 }
 0x5cb   : > { %v2587_v31 = vadd.f32 %v2586_v6, %v2498_v50  ;;  %v3218_v50 = vadd.f32 %v7851_v33, %v8090_v58 }
 0x5cc   : > { %4124 = vmatpush.bf16.msrb.mxu0 %v5608_v3 }
 0x5cd   : > { %v2711_v13 = vmax.f32 %v2587_v31, 0.0 }
 0x5ce   : > { %v3303_v53 = vpop.f32.mrf.mxu1  ;;  %v8244_v48 = vpop.f32.mrf.mxu0 }
 0x5cf   : > { %v8240_v41 = vadd.f32 %v3303_v53, %v3215_v38  ;;  %v8248_v6 = vpop.f32.mrf.mxu2  ;;  %v2503_v53 = vadd.f32 %v7899_v30, %v7875_v62  ;;  %v2505_v30 = vadd.f32 %v7917_v7, %v7875_v62  ;;  %v5312_v62 = vld [vmem:[#allocation10 + $0x1a8] sm:$0xf0] }
 0x5d0   : > { %4125 = vmatpush.bf16.msrb.mxu0 %v5607_v47 }
 0x5d2   : > { %v2588_v18 = vpop.f32.mrf.mxu3 }
 0x5d3   : > { %v2589_v25 = vadd.f32 %v2588_v18, %v2500_v14 }
 0x5d5   : > { %v2715_v1 = vmax.f32 %v2589_v25, 0.0  ;;  %3745 = vmatmul.bf16.gmra.mxu2 %v7848_v11  ;;  %v3220_v11 = vadd.f32 %v7866_v2, %v8090_v58 }
 0x5d6   : > { %v3306_v63 = vpop.f32.mrf.mxu1  ;;  %v8260_v31 = vpop.f32.mrf.mxu0 }
 0x5d7   : > { %v8251_v38 = vadd.f32 %v3306_v63, %v3218_v50  ;;  %3488 = vmatmul.bf16.gmra.mxu3 %v8071_v56  ;;  %v8254_v35 = vpack.c.bf16 %v2715_v1, %v2711_v13  ;;  %v8264_v18 = vpop.f32.mrf.mxu2  ;;  %v8268_v1 = vld [vmem:[#allocation13 + $0x78] sm:$0xff]  ;;  %v3223_v50 = vadd.f32 %v7878_v52, %v8090_v58 }
 0x5d8   : > { %4207 = vmatpush.bf16.msrb.mxu1 %v8268_v1  ;;  %v9267_v52 = vld [vmem:[#allocation44_spill] sm:$0xff] }
 0x5d9   : > { %9265 = vst [vmem:[#allocation74_spill] sm:$0xff] %v8254_v35  ;;  %3345 = vmatmul.bf16.gmra.mxu1 %v7856_v34  ;;  %3612 = vmatmul.bf16.gmra.mxu0 %v7680_v45 }
 0x5da   : > { %v2591_v33 = vpop.f32.mrf.mxu3 }
 0x5db   : > { %v2592_v3 = vadd.f32 %v2591_v33, %v2503_v53 }
 0x5dd   : > { %v2719_v13 = vmax.f32 %v2592_v3, 0.0 }
 0x5de   : > { %v3308_v14 = vpop.f32.mrf.mxu1  ;;  %v8275_v63 = vpop.f32.mrf.mxu0 }
 0x5df   : > { %v8266_v25 = vadd.f32 %v3308_v14, %v3220_v11  ;;  %v5595_v11 = vld [vmem:[#allocation10 + $0x1a4] sm:$0xf] }
 0x5e0   : > { %v5315_v14 = vor.u32 %v5595_v11, %v5312_v62 }
 0x5e2   : > { %v2593_v45 = vpop.f32.mrf.mxu3  ;;  %3806 = vmatpush.bf16.msrb.mxu3 %v5315_v14  ;;  %v3228_v14 = vadd.f32 %v7902_v5, %v8090_v58 }
 0x5e3   : > { %v2594_v47 = vadd.f32 %v2593_v45, %v2505_v30  ;;  %v8283_v30 = vpop.f32.mrf.mxu2 }
 0x5e5   : > { %v2723_v2 = vmax.f32 %v2594_v47, 0.0  ;;  %3750 = vmatmul.bf16.gmra.mxu2 %v7872_v21  ;;  %v3225_v21 = vadd.f32 %v7893_v8, %v8090_v58 }
 0x5e6   : > { %v3311_v53 = vpop.f32.mrf.mxu1  ;;  %v8289_v47 = vpop.f32.mrf.mxu0 }
 0x5e7   : > { %v8278_v33 = vadd.f32 %v3311_v53, %v3223_v50  ;;  %3493 = vmatmul.bf16.gmra.mxu3 %v8104_v28  ;;  %v8281_v7 = vpack.c.bf16 %v2723_v2, %v2719_v13  ;;  %9268 = vst [vmem:[#allocation37_spill] sm:$0xff] %v8289_v47  ;;  %v3366_v50 = vadd.f32 %v7929_v39, %v8101_v15 }
 0x5e8   : > { %v3368_v53 = vadd.f32 %v7941_v46, %v8116_v4  ;;  %v9270_v4 = vld [vmem:[#allocation85_spill] sm:$0xff] }
 0x5e9   : > { %9266 = vst [vmem:[#allocation64_spill] sm:$0xff] %v8281_v7  ;;  %3350 = vmatmul.bf16.gmra.mxu1 %v7881_v49  ;;  %3617 = vmatmul.bf16.gmra.mxu0 %v9267_v52 }
 0x5ea   : > { %v3454_v3 = vpop.f32.mrf.mxu3 }
 0x5eb   : > { %v3455_v2 = vadd.f32 %v3454_v3, %v3366_v50  ;;  %v8297_v62 = vpop.f32.mrf.mxu2  ;;  %v3230_v3 = vadd.f32 %v7915_v51, %v8090_v58  ;;  %v9271_v50 = vld [vmem:[#allocation68_spill] sm:$0xff] }
 0x5ed   : > { %v3890_v8 = vmax.f32 %v3455_v2, 0.0  ;;  %v3373_v2 = vadd.f32 %v9271_v50, %v8142_v57  ;;  %v9275_v50 = vld [vmem:[#allocation88_spill] sm:$0xff] }
 0x5ee   : > { %v3313_v45 = vpop.f32.mrf.mxu1  ;;  %v8305_v15 = vpop.f32.mrf.mxu0 }
 0x5ef   : > { %v8293_v13 = vadd.f32 %v3313_v45, %v3225_v21  ;;  %9269 = vst [vmem:[#allocation65_spill] sm:$0xff] %v8305_v15 }
 0x5f2   : > { %v3456_v11 = vpop.f32.mrf.mxu3 }
 0x5f3   : > { %v3457_v52 = vadd.f32 %v3456_v11, %v3368_v53  ;;  %v8310_v5 = vpop.f32.mrf.mxu2  ;;  %v9273_v11 = vld [vmem:[#allocation70_spill] sm:$0xff] }
 0x5f5   : > { %v3892_v49 = vmax.f32 %v3457_v52, 0.0  ;;  %3755 = vmatmul.bf16.gmra.mxu2 %v7897_v19  ;;  %v3371_v19 = vadd.f32 %v7953_v26, %v8127_v17  ;;  %v3233_v52 = vadd.f32 %v9273_v11, %v8090_v58  ;;  %v9274_v26 = vld [vmem:[#allocation79_spill] sm:$0xff] }
 0x5f6   : > { %v3316_v28 = vpop.f32.mrf.mxu1  ;;  %v8321_v53 = vpop.f32.mrf.mxu0 }
 0x5f7   : > { %v3954_v47 = vpack.c.bf16 %v3892_v49, %v3890_v8  ;;  %v8302_v39 = vadd.f32 %v3316_v28, %v3228_v14  ;;  %3498 = vmatmul.bf16.gmra.mxu3 %v8130_v37  ;;  %v8316_v28 = vld [vmem:[#allocation13 + $0x70] sm:$0xff]  ;;  %9272 = vst [vmem:[#allocation44_spill] sm:$0xff] %v8321_v53 }
 0x5f8   : > { %4208 = vmatpush.bf16.msrb.mxu1 %v8316_v28 }
 0x5f9   : > { %3631 = vmatmul.bf16.vlgmr.msra.gmra.mxu1 %v9270_v4  ;;  %4126 = vmatmul.bf16.vlgmr.msrb.gmra.mxu0 %v3954_v47 }
 0x5fa   : > { %v3459_v46 = vpop.f32.mrf.mxu3 }
 0x5fb   : > { %v3460_v45 = vadd.f32 %v3459_v46, %v3371_v19  ;;  %v8326_v4 = vpop.f32.mrf.mxu2 }
 0x5fd   : > { %v3894_v14 = vmax.f32 %v3460_v45, 0.0  ;;  %v9276_v45 = vld [vmem:[#allocation76_spill] sm:$0xff] }
 0x5fe   : > { %v3318_v21 = vpop.f32.mrf.mxu1 }
 0x5ff   : > { %v8314_v49 = vadd.f32 %v3318_v21, %v3230_v3  ;;  %v5593_v3 = vld [vmem:[#allocation10 + $0x194] sm:$0xf]  ;;  %v5304_v21 = vld [vmem:[#allocation10 + $0x198] sm:$0xf0] }
 0x600   : > { %v5307_v19 = vor.u32 %v5593_v3, %v5304_v21  ;;  %v9279_v3 = vld [vmem:[#allocation72_spill] sm:$0xff] }
 0x601   : > { %v3378_v21 = vadd.f32 %v9279_v3, %v8166_v54 }
 0x602   : > { %v3461_v47 = vpop.f32.mrf.mxu3  ;;  %3807 = vmatpush.bf16.msrb.mxu3 %v5307_v19  ;;  %v9280_v19 = vld [vmem:[#allocation81_spill] sm:$0xff] }
 0x603   : > { %v3462_v51 = vadd.f32 %v3461_v47, %v3373_v2  ;;  %v3235_v47 = vadd.f32 %v9276_v45, %v8090_v58 }
 0x605   : > { %v3896_v8 = vmax.f32 %v3462_v51, 0.0  ;;  %3760 = vmatmul.bf16.gmra.mxu2 %v9274_v26  ;;  %v8334_v51 = vpop.f32.mrf.mxu0 }
 0x606   : > { %v3321_v17 = vpop.f32.mrf.mxu1  ;;  %9277 = vst [vmem:[#allocation85_spill] sm:$0xff] %v8334_v51  ;;  %v9281_v51 = vld [vmem:[#allocation78_spill] sm:$0xff] }
 0x607   : > { %v8328_v46 = vadd.f32 %v3321_v17, %v3233_v52  ;;  %3503 = vmatmul.bf16.gmra.mxu3 %v8154_v61  ;;  %v3956_v57 = vpack.c.bf16 %v3896_v8, %v3894_v14  ;;  %v9278_v52 = vld [vmem:[#allocation102_spill] sm:$0xff]  ;;  %v8340_v14 = vpop.f32.mrf.mxu2  ;;  %v3238_v61 = vadd.f32 %v9280_v19, %v8090_v58 }
 0x608   : > { %v3376_v26 = vadd.f32 %v9278_v52, %v8151_v22  ;;  %v9284_v52 = vld [vmem:[#allocation86_spill] sm:$0xff] }
 0x609   : > { %3636 = vmatmul.bf16.gmra.mxu1 %v9275_v50  ;;  %4131 = vmatmul.bf16.gmra.mxu0 %v3956_v57 }
 0x60a   : > { %v3464_v2 = vpop.f32.mrf.mxu3 }
 0x60b   : > { %v3465_v8 = vadd.f32 %v3464_v2, %v3376_v26  ;;  %v3240_v26 = vadd.f32 %v9284_v52, %v8090_v58 }
 0x60d   : > { %v3898_v45 = vmax.f32 %v3465_v8, 0.0  ;;  %v8347_v15 = vpop.f32.mrf.mxu0 }
 0x60e   : > { %v3323_v11 = vpop.f32.mrf.mxu1  ;;  %9282 = vst [vmem:[#allocation68_spill] sm:$0xff] %v8347_v15 }
 0x60f   : > { %v8338_v17 = vadd.f32 %v3323_v11, %v3235_v47  ;;  %v9283_v47 = vld [vmem:[#allocation92_spill] sm:$0xff]  ;;  %v8353_v11 = vpop.f32.mrf.mxu2 }
 0x612   : > { %v3466_v57 = vpop.f32.mrf.mxu3 }
 0x613   : > { %v3467_v50 = vadd.f32 %v3466_v57, %v3378_v21 }
 0x615   : > { %v3900_v37 = vmax.f32 %v3467_v50, 0.0  ;;  %3765 = vmatmul.bf16.gmra.mxu2 %v9281_v51  ;;  %v9285_v51 = vld [vmem:[#allocation103_spill] sm:$0xff] }
 0x616   : > { %v3326_v53 = vpop.f32.mrf.mxu1  ;;  %v3381_v3 = vadd.f32 %v9285_v51, %v8177_v40  ;;  %v9289_v40 = vld [vmem:[#allocation91_spill] sm:$0xff]  ;;  %v5591_v51 = vld [vmem:[#allocation10 + $0x184] sm:$0xf] }
 0x617   : > { %v8349_v22 = vadd.f32 %v3326_v53, %v3238_v61  ;;  %3508 = vmatmul.bf16.gmra.mxu3 %v8180_v43  ;;  %v3958_v2 = vpack.c.bf16 %v3900_v37, %v3898_v45  ;;  %v5620_v61 = vld [vmem:[#allocation13 + $0x68] sm:$0xff]  ;;  %v8361_v53 = vpop.f32.mrf.mxu0  ;;  %v9287_v37 = vld [vmem:[#allocation77_spill] sm:$0xff]  ;;  %v8367_v52 = vpop.f32.mrf.mxu2 }
 0x618   : > { %9286 = vst [vmem:[#allocation70_spill] sm:$0xff] %v8361_v53  ;;  %v3383_v50 = vadd.f32 %v9287_v37, %v8192_v16  ;;  %4209 = vmatpush.bf16.msrb.mxu1 %v5620_v61  ;;  %v5296_v16 = vld [vmem:[#allocation10 + $0x188] sm:$0xf0]  ;;  %v9290_v37 = vld [vmem:[#allocation94_spill] sm:$0xff]  ;;  %v9296_v53 = vld [vmem:[#allocation41_spill] sm:$0xff] }
 0x619   : > { %3641 = vmatmul.bf16.gmra.mxu1 %v9283_v47  ;;  %4136 = vmatmul.bf16.gmra.mxu0 %v3958_v2  ;;  %v9288_v2 = vld [vmem:[#allocation39_spill] sm:$0xff] }
 0x61a   : > { %v3469_v54 = vpop.f32.mrf.mxu3  ;;  %v3243_v47 = vadd.f32 %v9288_v2, %v8090_v58 }
 0x61b   : > { %v3470_v57 = vadd.f32 %v3469_v54, %v3381_v3  ;;  %v5299_v3 = vor.u32 %v5591_v51, %v5296_v16 }
 0x61d   : > { %v3902_v43 = vmax.f32 %v3470_v57, 0.0  ;;  %3808 = vmatpush.bf16.msrb.mxu3 %v5299_v3  ;;  %v9292_v57 = vld [vmem:[#allocation30_spill] sm:$0xff] }
 0x61e   : > { %v3328_v8 = vpop.f32.mrf.mxu1 }
 0x61f   : > { %v8359_v21 = vadd.f32 %v3328_v8, %v3240_v26 }
 0x621   : > { %5646 = vmatpush.bf16.msra.mxu3 %v8268_v1  ;;  %v9295_v1 = vld [vmem:[#allocation43_spill] sm:$0xff] }
 0x622   : > { %v3471_v19 = vpop.f32.mrf.mxu3 }
 0x623   : > { %v3472_v45 = vadd.f32 %v3471_v19, %v3383_v50  ;;  %v8374_v19 = vpop.f32.mrf.mxu0 }
 0x624   : > { %9291 = vst [vmem:[#allocation79_spill] sm:$0xff] %v8374_v19 }
 0x625   : > { %v3904_v15 = vmax.f32 %v3472_v45, 0.0  ;;  %3770 = vmatmul.bf16.gmra.mxu2 %v9289_v40  ;;  %v3245_v45 = vadd.f32 %v9292_v57, %v8090_v58  ;;  %5647 = vmatpush.bf16.msra.mxu3 %v8316_v28 }
 0x626   : > { %v3331_v26 = vpop.f32.mrf.mxu1 }
 0x627   : > { %v8370_v8 = vadd.f32 %v3331_v26, %v3243_v47  ;;  %3513 = vmatmul.bf16.gmra.mxu3 %v8206_v24  ;;  %v3960_v54 = vpack.c.bf16 %v3904_v15, %v3902_v43  ;;  %v8379_v47 = vpop.f32.mrf.mxu2  ;;  %v9293_v43 = vld [vmem:[#allocation104_spill] sm:$0xff] }
 0x628   : > { %v3386_v15 = vadd.f32 %v9293_v43, %v8203_v60 }
 0x629   : > { %3646 = vmatmul.bf16.gmra.mxu1 %v9290_v37  ;;  %4141 = vmatmul.bf16.gmra.mxu0 %v3960_v54  ;;  %v9294_v54 = vld [vmem:[#allocation80_spill] sm:$0xff]  ;;  %v3248_v37 = vadd.f32 %v9295_v1, %v8090_v58 }
 0x62a   : > { %v3474_v50 = vpop.f32.mrf.mxu3  ;;  %v3388_v51 = vadd.f32 %v9294_v54, %v8216_v29  ;;  %5648 = vmatpush.bf16.msra.mxu3 %v5620_v61  ;;  %v9297_v29 = vld [vmem:[#allocation96_spill] sm:$0xff] }
 0x62b   : > { %v3475_v26 = vadd.f32 %v3474_v50, %v3386_v15  ;;  %v8390_v57 = vpop.f32.mrf.mxu0 }
 0x62d   : > { %v3906_v24 = vmax.f32 %v3475_v26, 0.0 }
 0x62e   : > { %v3333_v2 = vpop.f32.mrf.mxu1 }
 0x62f   : > { %v8383_v40 = vadd.f32 %v3333_v2, %v3245_v45  ;;  %v8396_v50 = vpop.f32.mrf.mxu2  ;;  %v9298_v2 = vld [vmem:[#allocation32_spill] sm:$0xff] }
 0x630   : > { %v3250_v43 = vadd.f32 %v9298_v2, %v8090_v58 }
 0x632   : > { %v3476_v16 = vpop.f32.mrf.mxu3 }
 0x633   : > { %v3477_v3 = vadd.f32 %v3476_v16, %v3388_v51  ;;  %v8401_v26 = vpop.f32.mrf.mxu0  ;;  %v5619_v16 = vld [vmem:[#allocation13 + $0x60] sm:$0xff] }
 0x634   : > { %4210 = vmatpush.bf16.msrb.mxu1 %v5619_v16  ;;  %5649 = vmatpush.bf16.msra.mxu3 %v5619_v16 }
 0x635   : > { %v3908_v19 = vmax.f32 %v3477_v3, 0.0  ;;  %3775 = vmatmul.bf16.gmra.mxu2 %v9296_v53  ;;  %v9299_v53 = vld [vmem:[#allocation105_spill] sm:$0xff] }
 0x636   : > { %v3336_v60 = vpop.f32.mrf.mxu1  ;;  %v3391_v54 = vadd.f32 %v9299_v53, %v8225_v9  ;;  %v9304_v53 = vld [vmem:[#allocation47_spill] sm:$0xff] }
 0x637   : > { %v8393_v45 = vadd.f32 %v3336_v60, %v3248_v37  ;;  %3518 = vmatmul.bf16.gmra.mxu3 %v8230_v10  ;;  %v3962_v28 = vpack.c.bf16 %v3908_v19, %v3906_v24  ;;  %v3393_v24 = vadd.f32 %v8061_v32, %v8240_v41  ;;  %v8409_v1 = vpop.f32.mrf.mxu2  ;;  %v9300_v60 = vld [vmem:[#allocation34_spill] sm:$0xff]  ;;  %v9301_v10 = vld [vmem:[#allocation45_spill] sm:$0xff] }
 0x638   : > { %v9303_v41 = vld [vmem:[#allocation97_spill] sm:$0xff] }
 0x639   : > { %3651 = vmatmul.bf16.gmra.mxu1 %v9297_v29  ;;  %4146 = vmatmul.bf16.gmra.mxu0 %v3962_v28  ;;  %v3253_v28 = vadd.f32 %v9300_v60, %v8090_v58 }
 0x63a   : > { %v3479_v61 = vpop.f32.mrf.mxu3 }
 0x63b   : > { %v3480_v3 = vadd.f32 %v3479_v61, %v3391_v54  ;;  %v8417_v32 = vpop.f32.mrf.mxu0  ;;  %v3255_v54 = vadd.f32 %v9304_v53, %v8090_v58  ;;  %v9306_v53 = vld [vmem:[#allocation48_spill] sm:$0xff] }
 0x63c   : > { %9302 = vst [vmem:[#allocation88_spill] sm:$0xff] %v8417_v32 }
 0x63d   : > { %v3910_v29 = vmax.f32 %v3480_v3, 0.0 }
 0x63e   : > { %v3338_v15 = vpop.f32.mrf.mxu1 }
 0x63f   : > { %v8405_v51 = vadd.f32 %v3338_v15, %v3250_v43  ;;  %v8422_v16 = vpop.f32.mrf.mxu2 }
 0x642   : > { %v3481_v19 = vpop.f32.mrf.mxu3 }
 0x643   : > { %v3482_v37 = vadd.f32 %v3481_v19, %v3393_v24 }
 0x645   : > { %v3912_v2 = vmax.f32 %v3482_v37, 0.0  ;;  %3780 = vmatmul.bf16.gmra.mxu2 %v9301_v10  ;;  %v3396_v10 = vadd.f32 %v8073_v27, %v8251_v38  ;;  %v3398_v37 = vadd.f32 %v8092_v59, %v8266_v25  ;;  %v9307_v59 = vld [vmem:[#allocation99_spill] sm:$0xff] }
 0x646   : > { %v3341_v9 = vpop.f32.mrf.mxu1 }
 0x647   : > { %v8414_v43 = vadd.f32 %v3341_v9, %v3253_v28  ;;  %3523 = vmatmul.bf16.gmra.mxu3 %v8254_v35  ;;  %v3964_v61 = vpack.c.bf16 %v3912_v2, %v3910_v29  ;;  %v8430_v28 = vpop.f32.mrf.mxu0  ;;  %v9305_v2 = vld [vmem:[#allocation50_spill] sm:$0xff]  ;;  %v8435_v32 = vpop.f32.mrf.mxu2 }
 0x648   : > { %v3258_v9 = vadd.f32 %v9305_v2, %v8090_v58  ;;  %v3403_v2 = vadd.f32 %v8122_v23, %v8293_v13  ;;  %v9309_v23 = vld [vmem:[#allocation56_spill] sm:$0xff] }
 0x649   : > { %3656 = vmatmul.bf16.gmra.mxu1 %v9303_v41  ;;  %4151 = vmatmul.bf16.gmra.mxu0 %v3964_v61 }
 0x64a   : > { %v3484_v15 = vpop.f32.mrf.mxu3 }
 0x64b   : > { %v3485_v19 = vadd.f32 %v3484_v15, %v3396_v10  ;;  %v9308_v15 = vld [vmem:[#allocation52_spill] sm:$0xff] }
 0x64d   : > { %v3914_v61 = vmax.f32 %v3485_v19, 0.0  ;;  %v3401_v19 = vadd.f32 %v8110_v55, %v8278_v33 }
 0x64e   : > { %v3343_v3 = vpop.f32.mrf.mxu1 }
 0x64f   : > { %v8426_v24 = vadd.f32 %v3343_v3, %v3255_v54  ;;  %v3260_v54 = vadd.f32 %v9308_v15, %v8090_v58  ;;  %v8443_v3 = vpop.f32.mrf.mxu0 }
 0x652   : > { %v3486_v60 = vpop.f32.mrf.mxu3 }
 0x653   : > { %v3487_v29 = vadd.f32 %v3486_v60, %v3398_v37  ;;  %v8449_v60 = vpop.f32.mrf.mxu2 }
 0x655   : > { %v3916_v41 = vmax.f32 %v3487_v29, 0.0  ;;  %3785 = vmatmul.bf16.gmra.mxu2 %v9306_v53 }
 0x656   : > { %v3346_v35 = vpop.f32.mrf.mxu1 }
 0x657   : > { %v8437_v27 = vadd.f32 %v3346_v35, %v3258_v9  ;;  %3528 = vmatmul.bf16.gmra.mxu3 %v8281_v7  ;;  %v3966_v38 = vpack.c.bf16 %v3916_v41, %v3914_v61  ;;  %v5618_v35 = vld [vmem:[#allocation13 + $0x58] sm:$0xff]  ;;  %v3263_v41 = vadd.f32 %v8068_v20, %v8090_v58  ;;  %v8456_v33 = vpop.f32.mrf.mxu0  ;;  %v9310_v20 = vld [vmem:[#allocation98_spill] sm:$0xff] }
 0x658   : > { %4211 = vmatpush.bf16.msrb.mxu1 %v5618_v35  ;;  %5650 = vmatpush.bf16.msra.mxu3 %v5618_v35 }
 0x659   : > { %3661 = vmatmul.bf16.gmra.mxu1 %v9307_v59  ;;  %4156 = vmatmul.bf16.gmra.mxu0 %v3966_v38 }
 0x65a   : > { %v3489_v25 = vpop.f32.mrf.mxu3 }
 0x65b   : > { %v3490_v29 = vadd.f32 %v3489_v25, %v3401_v19  ;;  %v8462_v15 = vpop.f32.mrf.mxu2 }
 0x65d   : > { %v3918_v53 = vmax.f32 %v3490_v29, 0.0  ;;  %v9311_v29 = vld [vmem:[#allocation82_spill] sm:$0xff] }
 0x65e   : > { %v3348_v10 = vpop.f32.mrf.mxu1 }
 0x65f   : > { %v8447_v37 = vadd.f32 %v3348_v10, %v3260_v54  ;;  %v3265_v54 = vadd.f32 %v9310_v20, %v8090_v58  ;;  %v5630_v10 = vld [vmem:[#allocation16 + $0x38] sm:$0xff]  ;;  %v9313_v58 = vld [vmem:[#allocation54_spill] sm:$0xff] }
 0x660   : > { %4412 = vmatpush.bf16.msrb.mxu2 %v5630_v10  ;;  %v9315_v10 = vld [vmem:[#allocation73_spill] sm:$0xff] }
 0x662   : > { %v3491_v9 = vpop.f32.mrf.mxu3 }
 0x663   : > { %v3492_v61 = vadd.f32 %v3491_v9, %v3403_v2  ;;  %v8473_v2 = vpop.f32.mrf.mxu0 }
 0x665   : > { %v3920_v38 = vmax.f32 %v3492_v61, 0.0  ;;  %3790 = vmatmul.bf16.gmra.mxu2 %v8065_v44  ;;  %v3406_v44 = vadd.f32 %v8140_v0, %v8302_v39  ;;  %v9312_v61 = vld [vmem:[#allocation59_spill] sm:$0xff] }
 0x666   : > { %v3351_v55 = vpop.f32.mrf.mxu1 }
 0x667   : > { %v8458_v59 = vadd.f32 %v3351_v55, %v3263_v41  ;;  %3809 = vmatmul.bf16.vlgmr.msrb.gmra.mxu3 %v7904_v42  ;;  %v3968_v25 = vpack.c.bf16 %v3920_v38, %v3918_v53  ;;  %v8471_v42 = vperm.slane %v9311_v29, 1  ;;  %v3408_v41 = vadd.f32 %v9312_v61, %v8314_v49  ;;  %v9318_v29 = vld [vmem:[#allocation40_spill] sm:$0xff] }
 0x669   : > { %3666 = vmatmul.bf16.gmra.mxu1 %v9309_v23  ;;  %4161 = vmatmul.bf16.gmra.mxu0 %v3968_v25  ;;  %v3544_v55 = vadd.f32 %v9313_v58, %v8471_v42  ;;  %v8479_v25 = vpop.f32.mrf.mxu2  ;;  %v9314_v23 = vld [vmem:[#allocation38_spill] sm:$0xff]  ;;  %v3546_v61 = vadd.f32 %v9318_v29, %v8471_v42  ;;  %v5617_v58 = vld [vmem:[#allocation13 + $0x50] sm:$0xff] }
 0x66a   : > { %v3494_v13 = vpop.f32.mrf.mxu3  ;;  %4212 = vmatpush.bf16.msrb.mxu1 %v5617_v58  ;;  %5651 = vmatpush.bf16.msra.mxu3 %v5617_v58  ;;  %v5629_v58 = vld [vmem:[#allocation16 + $0x30] sm:$0xff] }
 0x66b   : > { %v3495_v9 = vadd.f32 %v3494_v13, %v3406_v44  ;;  %v8486_v44 = vpop.f32.mrf.mxu0  ;;  %4413 = vmatpush.bf16.msrb.mxu2 %v5629_v58  ;;  %v9330_v58 = vld [vmem:[#allocation63_spill] sm:$0xff] }
 0x66c   : > { %9317 = vst [vmem:[#allocation76_spill] sm:$0xff] %v8486_v44 }
 0x66d   : > { %v3922_v0 = vmax.f32 %v3495_v9, 0.0  ;;  %v9319_v9 = vld [vmem:[#allocation53_spill] sm:$0xff] }
 0x66e   : > { %v3353_v19 = vpop.f32.mrf.mxu1 }
 0x66f   : > { %v8468_v35 = vadd.f32 %v3353_v19, %v3265_v54  ;;  %v9316_v19 = vld [vmem:[#allocation101_spill] sm:$0xff] }
 0x672   : > { %v3496_v53 = vpop.f32.mrf.mxu3 }
 0x673   : > { %v3497_v38 = vadd.f32 %v3496_v53, %v3408_v41  ;;  %v3411_v53 = vadd.f32 %v9319_v9, %v8328_v46  ;;  %v9325_v9 = vld [vmem:[#allocation100_spill] sm:$0xff] }
 0x675   : > { %v3924_v39 = vmax.f32 %v3497_v38, 0.0  ;;  %3795 = vmatmul.bf16.gmra.mxu2 %v9314_v23  ;;  %v9320_v23 = vld [vmem:[#allocation93_spill] sm:$0xff] }
 0x676   : > { %v3632_v20 = vpop.f32.mrf.mxu1 }
 0x677   : > { %v8482_v54 = vadd.f32 %v3632_v20, %v3544_v55  ;;  %3814 = vmatmul.bf16.gmra.mxu3 %v9315_v10  ;;  %v3970_v13 = vpack.c.bf16 %v3924_v39, %v3922_v0  ;;  %v3413_v0 = vadd.f32 %v9320_v23, %v8338_v17  ;;  %v9321_v10 = vld [vmem:[#allocation42_spill] sm:$0xff] }
 0x679   : > { %3671 = vmatmul.bf16.gmra.mxu1 %v9316_v19  ;;  %4166 = vmatmul.bf16.gmra.mxu0 %v3970_v13  ;;  %v3549_v13 = vadd.f32 %v9321_v10, %v8471_v42  ;;  %v8498_v19 = vpop.f32.mrf.mxu0 }
 0x67a   : > { %v3499_v49 = vpop.f32.mrf.mxu3  ;;  %9322 = vst [vmem:[#allocation102_spill] sm:$0xff] %v8498_v19 }
 0x67b   : > { %v3500_v55 = vadd.f32 %v3499_v49, %v3411_v53  ;;  %v3551_v53 = vadd.f32 %v9325_v9, %v8471_v42 }
 0x67d   : > { %v3926_v29 = vmax.f32 %v3500_v55, 0.0  ;;  %v9327_v55 = vld [vmem:[#allocation33_spill] sm:$0xff] }
 0x67e   : > { %v3634_v41 = vpop.f32.mrf.mxu1 }
 0x67f   : > { %v8492_v38 = vadd.f32 %v3634_v41, %v3546_v61  ;;  %v9323_v61 = vld [vmem:[#allocation83_spill] sm:$0xff]  ;;  %v9324_v41 = vld [vmem:[#allocation61_spill] sm:$0xff] }
 0x682   : > { %v3501_v39 = vpop.f32.mrf.mxu3 }
 0x683   : > { %v3502_v20 = vadd.f32 %v3501_v39, %v3413_v0  ;;  %v8506_v0 = vpop.f32.mrf.mxu0  ;;  %v3416_v39 = vadd.f32 %v9327_v55, %v8349_v22  ;;  %v3421_v55 = vadd.f32 %v8236_v36, %v8370_v8  ;;  %v9333_v8 = vld [vmem:[#allocation31_spill] sm:$0xff] }
 0x684   : > { %9326 = vst [vmem:[#allocation72_spill] sm:$0xff] %v8506_v0  ;;  %v9329_v0 = vld [vmem:[#allocation89_spill] sm:$0xff] }
 0x685   : > { %v3928_v7 = vmax.f32 %v3502_v20, 0.0 }
 0x686   : > { %v3637_v44 = vpop.f32.mrf.mxu1 }
 0x687   : > { %v8500_v46 = vadd.f32 %v3637_v44, %v3549_v13  ;;  %3819 = vmatmul.bf16.gmra.mxu3 %v9323_v61  ;;  %v3972_v49 = vpack.c.bf16 %v3928_v7, %v3926_v29  ;;  %v3418_v7 = vadd.f32 %v8220_v12, %v8359_v21  ;;  %v9328_v29 = vld [vmem:[#allocation46_spill] sm:$0xff] }
 0x688   : > { %v3554_v61 = vadd.f32 %v9328_v29, %v8471_v42  ;;  %v9331_v12 = vld [vmem:[#allocation90_spill] sm:$0xff] }
 0x689   : > { %3676 = vmatmul.bf16.gmra.mxu1 %v9324_v41  ;;  %4171 = vmatmul.bf16.gmra.mxu0 %v3972_v49  ;;  %v3556_v21 = vadd.f32 %v9331_v12, %v8471_v42 }
 0x68a   : > { %v3504_v17 = vpop.f32.mrf.mxu3 }
 0x68b   : > { %v3505_v44 = vadd.f32 %v3504_v17, %v3416_v39 }
 0x68d   : > { %v3930_v49 = vmax.f32 %v3505_v44, 0.0  ;;  %v5616_v44 = vld [vmem:[#allocation13 + $0x48] sm:$0xff] }
 0x68e   : > { %v3639_v23 = vpop.f32.mrf.mxu1  ;;  %4213 = vmatpush.bf16.msrb.mxu1 %v5616_v44  ;;  %5652 = vmatpush.bf16.msra.mxu3 %v5616_v44  ;;  %v3426_v44 = vadd.f32 %v8264_v18, %v8393_v45  ;;  %v9337_v18 = vld [vmem:[#allocation95_spill] sm:$0xff] }
 0x68f   : > { %v8510_v20 = vadd.f32 %v3639_v23, %v3551_v53  ;;  %v8519_v53 = vpop.f32.mrf.mxu0 }
 0x692   : > { %v3506_v10 = vpop.f32.mrf.mxu3 }
 0x693   : > { %v3507_v13 = vadd.f32 %v3506_v10, %v3418_v7 }
 0x695   : > { %v3932_v41 = vmax.f32 %v3507_v13, 0.0 }
 0x696   : > { %v3642_v9 = vpop.f32.mrf.mxu1 }
 0x697   : > { %v8516_v19 = vadd.f32 %v3642_v9, %v3554_v61  ;;  %3824 = vmatmul.bf16.gmra.mxu3 %v9329_v0  ;;  %v3974_v22 = vpack.c.bf16 %v3932_v41, %v3930_v49  ;;  %v3423_v0 = vadd.f32 %v8248_v6, %v8383_v40  ;;  %v8530_v13 = vpop.f32.mrf.mxu0  ;;  %v9332_v61 = vld [vmem:[#allocation51_spill] sm:$0xff] }
 0x698   : > { %v3559_v49 = vadd.f32 %v9332_v61, %v8471_v42  ;;  %v9335_v40 = vld [vmem:[#allocation55_spill] sm:$0xff] }
 0x699   : > { %3681 = vmatmul.bf16.gmra.mxu1 %v9330_v58  ;;  %4176 = vmatmul.bf16.gmra.mxu0 %v3974_v22  ;;  %v3561_v12 = vadd.f32 %v9335_v40, %v8471_v42  ;;  %v9338_v40 = vld [vmem:[#allocation71_spill] sm:$0xff] }
 0x69a   : > { %v3509_v17 = vpop.f32.mrf.mxu3 }
 0x69b   : > { %v3510_v7 = vadd.f32 %v3509_v17, %v3421_v55  ;;  %v9334_v17 = vld [vmem:[#allocation66_spill] sm:$0xff] }
 0x69d   : > { %v3934_v41 = vmax.f32 %v3510_v7, 0.0 }
 0x69e   : > { %v3644_v23 = vpop.f32.mrf.mxu1 }
 0x69f   : > { %v8526_v39 = vadd.f32 %v3644_v23, %v3556_v21  ;;  %v8540_v21 = vpop.f32.mrf.mxu0  ;;  %v5628_v23 = vld [vmem:[#allocation16 + $0x28] sm:$0xff] }
 0x6a0   : > { %4414 = vmatpush.bf16.msrb.mxu2 %v5628_v23  ;;  %v3431_v23 = vadd.f32 %v8297_v62, %v8414_v43  ;;  %v9341_v43 = vld [vmem:[#allocation36_spill] sm:$0xff] }
 0x6a2   : > { %v3511_v10 = vpop.f32.mrf.mxu3 }
 0x6a3   : > { %v3512_v29 = vadd.f32 %v3511_v10, %v3423_v0  ;;  %v3428_v10 = vadd.f32 %v8283_v30, %v8405_v51  ;;  %v9339_v30 = vld [vmem:[#allocation69_spill] sm:$0xff] }
 0x6a4   : > { %v3566_v51 = vadd.f32 %v9339_v30, %v8471_v42  ;;  %v5627_v30 = vld [vmem:[#allocation16 + $0x20] sm:$0xff] }
 0x6a5   : > { %v3936_v9 = vmax.f32 %v3512_v29, 0.0  ;;  %4415 = vmatpush.bf16.msrb.mxu2 %v5627_v30 }
 0x6a6   : > { %v3647_v22 = vpop.f32.mrf.mxu1 }
 0x6a7   : > { %v8534_v36 = vadd.f32 %v3647_v22, %v3559_v49  ;;  %3829 = vmatmul.bf16.gmra.mxu3 %v9333_v8  ;;  %v3976_v58 = vpack.c.bf16 %v3936_v9, %v3934_v41  ;;  %v9336_v49 = vld [vmem:[#allocation62_spill] sm:$0xff] }
 0x6a8   : > { %v3564_v41 = vadd.f32 %v9336_v49, %v8471_v42 }
 0x6a9   : > { %3686 = vmatmul.bf16.gmra.mxu1 %v9334_v17  ;;  %4181 = vmatmul.bf16.gmra.mxu0 %v3976_v58  ;;  %v8550_v58 = vpop.f32.mrf.mxu0 }
 0x6aa   : > { %v3514_v6 = vpop.f32.mrf.mxu3 }
 0x6ab   : > { %v3515_v0 = vadd.f32 %v3514_v6, %v3426_v44  ;;  %v5615_v44 = vld [vmem:[#allocation13 + $0x40] sm:$0xff] }
 0x6ac   : > { %4214 = vmatpush.bf16.msrb.mxu1 %v5615_v44  ;;  %5653 = vmatpush.bf16.msra.mxu3 %v5615_v44 }
 0x6ad   : > { %v3938_v9 = vmax.f32 %v3515_v0, 0.0 }
 0x6ae   : > { %v3649_v55 = vpop.f32.mrf.mxu1 }
 0x6af   : > { %v8544_v7 = vadd.f32 %v3649_v55, %v3561_v12 }
 0x6b1   : > { %v8562_v0 = vpop.f32.mrf.mxu0 }
 0x6b2   : > { %v3516_v29 = vpop.f32.mrf.mxu3 }
 0x6b3   : > { %v3517_v61 = vadd.f32 %v3516_v29, %v3428_v10  ;;  %v3433_v29 = vadd.f32 %v8310_v5, %v8426_v24  ;;  %v3571_v24 = vadd.f32 %v8244_v48, %v8471_v42 }
 0x6b5   : > { %v3940_v22 = vmax.f32 %v3517_v61, 0.0 }
 0x6b6   : > { %v3652_v8 = vpop.f32.mrf.mxu1 }
 0x6b7   : > { %v8552_v17 = vadd.f32 %v3652_v8, %v3564_v41  ;;  %3834 = vmatmul.bf16.gmra.mxu3 %v9337_v18  ;;  %v3978_v45 = vpack.c.bf16 %v3940_v22, %v3938_v9  ;;  %v9340_v41 = vld [vmem:[#allocation60_spill] sm:$0xff] }
 0x6b8   : > { %v3569_v9 = vadd.f32 %v9340_v41, %v8471_v42 }
 0x6b9   : > { %3691 = vmatmul.bf16.gmra.mxu1 %v9338_v40  ;;  %4186 = vmatmul.bf16.gmra.mxu0 %v3978_v45  ;;  %v9342_v40 = vld [vmem:[#allocation75_spill] sm:$0xff]  ;;  %v8572_v5 = vpop.f32.mrf.mxu0 }
 0x6ba   : > { %v3519_v6 = vpop.f32.mrf.mxu3 }
 0x6bb   : > { %v3520_v10 = vadd.f32 %v3519_v6, %v3431_v23 }
 0x6bd   : > { %v3942_v22 = vmax.f32 %v3520_v10, 0.0  ;;  %v3438_v10 = vadd.f32 %v8340_v14, %v8447_v37  ;;  %v3576_v14 = vadd.f32 %v8275_v63, %v8471_v42 }
 0x6be   : > { %v3654_v12 = vpop.f32.mrf.mxu1 }
 0x6bf   : > { %v8560_v55 = vadd.f32 %v3654_v12, %v3566_v51  ;;  %v3436_v12 = vadd.f32 %v8326_v4, %v8437_v27 }
 0x6c1   : > { %v8584_v41 = vpop.f32.mrf.mxu0 }
 0x6c2   : > { %v3521_v61 = vpop.f32.mrf.mxu3 }
 0x6c3   : > { %v3522_v49 = vadd.f32 %v3521_v61, %v3433_v29 }
 0x6c5   : > { %v3944_v8 = vmax.f32 %v3522_v49, 0.0  ;;  %v3574_v49 = vadd.f32 %v8260_v31, %v8471_v42  ;;  %v3441_v31 = vadd.f32 %v8353_v11, %v8458_v59  ;;  %v9345_v59 = vld [vmem:[#allocation67_spill] sm:$0xff] }
 0x6c6   : > { %v3657_v18 = vpop.f32.mrf.mxu1 }
 0x6c7   : > { %v8568_v62 = vadd.f32 %v3657_v18, %v3569_v9  ;;  %3839 = vmatmul.bf16.gmra.mxu3 %v9341_v43  ;;  %v3980_v45 = vpack.c.bf16 %v3944_v8, %v3942_v22 }
 0x6c9   : > { %3696 = vmatmul.bf16.gmra.mxu1 %v9342_v40  ;;  %4191 = vmatmul.bf16.gmra.mxu0 %v3980_v45  ;;  %v8592_v18 = vpop.f32.mrf.mxu0 }
 0x6ca   : > { %v3524_v6 = vpop.f32.mrf.mxu3 }
 0x6cb   : > { %v3525_v44 = vadd.f32 %v3524_v6, %v3436_v12 }
 0x6cd   : > { %v3946_v48 = vmax.f32 %v3525_v44, 0.0  ;;  %v9344_v44 = vld [vmem:[#allocation84_spill] sm:$0xff] }
 0x6ce   : > { %v3659_v51 = vpop.f32.mrf.mxu1 }
 0x6cf   : > { %v8578_v23 = vadd.f32 %v3659_v51, %v3571_v24 }
 0x6d1   : > { %v8605_v11 = vpop.f32.mrf.mxu0 }
 0x6d2   : > { %v3526_v29 = vpop.f32.mrf.mxu3 }
 0x6d3   : > { %v3527_v61 = vadd.f32 %v3526_v29, %v3438_v10 }
 0x6d5   : > { %v3948_v9 = vmax.f32 %v3527_v61, 0.0  ;;  %v5626_v61 = vld [vmem:[#allocation16 + $0x18] sm:$0xff] }
 0x6d6   : > { %v3662_v22 = vpop.f32.mrf.mxu1  ;;  %4416 = vmatpush.bf16.msrb.mxu2 %v5626_v61 }
 0x6d7   : > { %v8586_v8 = vadd.f32 %v3662_v22, %v3574_v49  ;;  %3844 = vmatmul.bf16.gmra.mxu3 %v8071_v56  ;;  %v3982_v4 = vpack.c.bf16 %v3948_v9, %v3946_v48  ;;  %v3443_v56 = vadd.f32 %v8367_v52, %v8468_v35  ;;  %v9346_v52 = vld [vmem:[#allocation65_spill] sm:$0xff]  ;;  %v3722_v48 = vadd.f32 %v8379_v47, %v8482_v54  ;;  %v8621_v47 = vpop.f32.mrf.mxu2 }
 0x6d8   : > { %v3581_v35 = vadd.f32 %v9346_v52, %v8471_v42 }
 0x6d9   : > { %3701 = vmatmul.bf16.gmra.mxu1 %v7856_v34  ;;  %4196 = vmatmul.bf16.gmra.mxu0 %v3982_v4  ;;  %v9343_v34 = vld [vmem:[#allocation37_spill] sm:$0xff]  ;;  %v3724_v4 = vadd.f32 %v8396_v50, %v8492_v38 }
 0x6da   : > { %v3529_v27 = vpop.f32.mrf.mxu3  ;;  %v3579_v24 = vadd.f32 %v9343_v34, %v8471_v42 }
 0x6db   : > { %v3530_v45 = vadd.f32 %v3529_v27, %v3441_v31 }
 0x6dd   : > { %v3950_v30 = vmax.f32 %v3530_v45, 0.0 }
 0x6de   : > { %v3664_v37 = vpop.f32.mrf.mxu1 }
 0x6df   : > { %v8596_v43 = vadd.f32 %v3664_v37, %v3576_v14  ;;  %v9347_v37 = vld [vmem:[#allocation44_spill] sm:$0xff]  ;;  %v3743_v52 = vpop.f32.mrf.mxu2 }
 0x6e0   : > { %v3584_v31 = vadd.f32 %v9347_v37, %v8471_v42 }
 0x6e2   : > { %v3531_v40 = vpop.f32.mrf.mxu3 }
 0x6e3   : > { %v3532_v6 = vadd.f32 %v3531_v40, %v3443_v56 }
 0x6e5   : > { %v3952_v51 = vmax.f32 %v3532_v6, 0.0 }
 0x6e6   : > { %v3667_v63 = vpop.f32.mrf.mxu1 }
 0x6e7   : > { %v8602_v12 = vadd.f32 %v3667_v63, %v3579_v24  ;;  %3849 = vmatmul.bf16.gmra.mxu3 %v9344_v44  ;;  %v3984_v10 = vpack.c.bf16 %v3952_v51, %v3950_v30  ;;  %v9348_v24 = vld [vmem:[#allocation57_spill] sm:$0xff]  ;;  %v3727_v51 = vadd.f32 %v8409_v1, %v8500_v46 }
 0x6e8   : > { %v9349_v30 = vld [vmem:[#allocation85_spill] sm:$0xff] }
 0x6e9   : > { %3706 = vmatmul.bf16.gmra.mxu1 %v9345_v59  ;;  %4201 = vmatmul.bf16.gmra.mxu0 %v3984_v10  ;;  %v3586_v50 = vadd.f32 %v9349_v30, %v8471_v42  ;;  %v3729_v10 = vadd.f32 %v8422_v16, %v8510_v20  ;;  %v5625_v16 = vld [vmem:[#allocation16 + $0x10] sm:$0xff]  ;;  %v3746_v20 = vpop.f32.mrf.mxu2  ;;  %v9353_v30 = vld [vmem:[#allocation79_spill] sm:$0xff] }
 0x6ea   : > { %v3810_v29 = vpop.f32.mrf.mxu3  ;;  %4417 = vmatpush.bf16.msrb.mxu2 %v5625_v16 }
 0x6eb   : > { %v3811_v22 = vadd.f32 %v3810_v29, %v3722_v48 }
 0x6ed   : > { %v3891_v45 = vmax.f32 %v3811_v22, 0.0 }
 0x6ee   : > { %v3669_v49 = vpop.f32.mrf.mxu1 }
 0x6ef   : > { %v8612_v9 = vadd.f32 %v3669_v49, %v3581_v35  ;;  %v9350_v35 = vld [vmem:[#allocation68_spill] sm:$0xff] }
 0x6f0   : > { %v3589_v61 = vadd.f32 %v9350_v35, %v8471_v42  ;;  %v3596_v35 = vadd.f32 %v8390_v57, %v8471_v42 }
 0x6f2   : > { %v3812_v27 = vpop.f32.mrf.mxu3 }
 0x6f3   : > { %v3813_v14 = vadd.f32 %v3812_v27, %v3724_v4  ;;  %v9351_v27 = vld [vmem:[#allocation87_spill] sm:$0xff] }
 0x6f5   : > { %v3893_v56 = vmax.f32 %v3813_v14, 0.0  ;;  %v9352_v14 = vld [vmem:[#allocation70_spill] sm:$0xff] }
 0x6f6   : > { %v3672_v40 = vpop.f32.mrf.mxu1  ;;  %v3591_v37 = vadd.f32 %v9352_v14, %v8471_v42 }
 0x6f7   : > { %v3955_v6 = vpack.c.bf16 %v3893_v56, %v3891_v45  ;;  %v8618_v34 = vadd.f32 %v3672_v40, %v3584_v31  ;;  %3854 = vmatmul.bf16.gmra.mxu3 %v9348_v24  ;;  %v3732_v45 = vadd.f32 %v8435_v32, %v8516_v19  ;;  %v3748_v19 = vpop.f32.mrf.mxu2 }
 0x6f9   : > { %4215 = vmatmul.bf16.vlgmr.msrb.gmra.mxu1 %v3955_v6  ;;  %v3734_v6 = vadd.f32 %v8449_v60, %v8526_v39  ;;  %v3737_v39 = vadd.f32 %v8462_v15, %v8534_v36 }
 0x6fa   : > { %v3815_v54 = vpop.f32.mrf.mxu3 }
 0x6fb   : > { %v3816_v44 = vadd.f32 %v3815_v54, %v3727_v51 }
 0x6fd   : > { %v3895_v49 = vmax.f32 %v3816_v44, 0.0 }
 0x6fe   : > { %v3674_v38 = vpop.f32.mrf.mxu1 }
 0x6ff   : > { %v8627_v63 = vadd.f32 %v3674_v38, %v3586_v50  ;;  %v3594_v50 = vadd.f32 %v9353_v30, %v8471_v42  ;;  %v3744_v30 = vadd.f32 %v3743_v52, %v8560_v55  ;;  %v3747_v52 = vadd.f32 %v3746_v20, %v8568_v62 }
 0x702   : > { %v3817_v59 = vpop.f32.mrf.mxu3 }
 0x703   : > { %v3818_v29 = vadd.f32 %v3817_v59, %v3729_v10  ;;  %v9354_v59 = vld [vmem:[#allocation49_spill] sm:$0xff] }
 0x705   : > { %v3897_v48 = vmax.f32 %v3818_v29, 0.0 }
 0x706   : > { %v3677_v22 = vpop.f32.mrf.mxu1 }
 0x707   : > { %v8633_v4 = vadd.f32 %v3677_v22, %v3589_v61  ;;  %3859 = vmatmul.bf16.gmra.mxu3 %v9351_v27  ;;  %v3957_v1 = vpack.c.bf16 %v3897_v48, %v3895_v49  ;;  %v3739_v48 = vadd.f32 %v8479_v25, %v8544_v7  ;;  %v3751_v22 = vpop.f32.mrf.mxu2  ;;  %v5624_v7 = vld [vmem:[#allocation16 + $0x8] sm:$0xff] }
 0x708   : > { %4418 = vmatpush.bf16.msrb.mxu2 %v5624_v7 }
 0x709   : > { %4220 = vmatmul.bf16.gmra.mxu1 %v3957_v1 }
 0x70a   : > { %v3820_v46 = vpop.f32.mrf.mxu3 }
 0x70b   : > { %v3821_v40 = vadd.f32 %v3820_v46, %v3732_v45  ;;  %v3599_v46 = vadd.f32 %v8401_v26, %v8471_v42 }
 0x70d   : > { %v3899_v38 = vmax.f32 %v3821_v40, 0.0  ;;  %v9356_v40 = vld [vmem:[#allocation88_spill] sm:$0xff] }
 0x70e   : > { %v3679_v31 = vpop.f32.mrf.mxu1  ;;  %v3601_v25 = vadd.f32 %v9356_v40, %v8471_v42  ;;  %v3611_v40 = vadd.f32 %v8473_v2, %v8471_v42 }
 0x70f   : > { %v8640_v56 = vadd.f32 %v3679_v31, %v3591_v37  ;;  %v9355_v31 = vld [vmem:[#allocation58_spill] sm:$0xff]  ;;  %v3753_v45 = vpop.f32.mrf.mxu2 }
 0x712   : > { %v3822_v24 = vpop.f32.mrf.mxu3 }
 0x713   : > { %v3823_v54 = vadd.f32 %v3822_v24, %v3734_v6  ;;  %v3742_v24 = vadd.f32 %v8621_v47, %v8552_v17 }
 0x715   : > { %v3901_v51 = vmax.f32 %v3823_v54, 0.0 }
 0x716   : > { %v3682_v44 = vpop.f32.mrf.mxu1 }
 0x717   : > { %v8646_v10 = vadd.f32 %v3682_v44, %v3594_v50  ;;  %3864 = vmatmul.bf16.gmra.mxu3 %v9354_v59  ;;  %v3959_v32 = vpack.c.bf16 %v3901_v51, %v3899_v38  ;;  %v3604_v51 = vadd.f32 %v8430_v28, %v8471_v42 }
 0x719   : > { %4225 = vmatmul.bf16.gmra.mxu1 %v3959_v32  ;;  %v3756_v32 = vpop.f32.mrf.mxu2 }
 0x71a   : > { %v3825_v29 = vpop.f32.mrf.mxu3 }
 0x71b   : > { %v3826_v49 = vadd.f32 %v3825_v29, %v3737_v39  ;;  %v3606_v39 = vadd.f32 %v8443_v3, %v8471_v42  ;;  %v9358_v3 = vld [vmem:[#allocation74_spill] sm:$0xff] }
 0x71d   : > { %v3903_v14 = vmax.f32 %v3826_v49, 0.0 }
 0x71e   : > { %v3684_v60 = vpop.f32.mrf.mxu1 }
 0x71f   : > { %v8653_v61 = vadd.f32 %v3684_v60, %v3596_v35  ;;  %v9357_v60 = vld [vmem:[#allocation35_spill] sm:$0xff] }
 0x721   : > { %v3758_v28 = vpop.f32.mrf.mxu2 }
 0x722   : > { %v3827_v27 = vpop.f32.mrf.mxu3 }
 0x723   : > { %v3828_v1 = vadd.f32 %v3827_v27, %v3739_v48  ;;  %v3749_v27 = vadd.f32 %v3748_v19, %v8578_v23  ;;  %v5623_v23 = vld [vmem:[#allocation16] sm:$0xff] }
 0x724   : > { %4419 = vmatpush.bf16.msrb.mxu2 %v5623_v23 }
 0x725   : > { %v3905_v37 = vmax.f32 %v3828_v1, 0.0 }
 0x726   : > { %v3687_v16 = vpop.f32.mrf.mxu1 }
 0x727   : > { %v8659_v57 = vadd.f32 %v3687_v16, %v3599_v46  ;;  %3869 = vmatmul.bf16.gmra.mxu3 %v9355_v31  ;;  %v3961_v15 = vpack.c.bf16 %v3905_v37, %v3903_v14  ;;  %v3609_v14 = vadd.f32 %v8456_v33, %v8471_v42 }
 0x729   : > { %4230 = vmatmul.bf16.gmra.mxu1 %v3961_v15  ;;  %v3761_v62 = vpop.f32.mrf.mxu2 }
 0x72a   : > { %v3830_v36 = vpop.f32.mrf.mxu3 }
 0x72b   : > { %v3831_v54 = vadd.f32 %v3830_v36, %v3742_v24 }
 0x72d   : > { %v3907_v44 = vmax.f32 %v3831_v54, 0.0 }
 0x72e   : > { %v3689_v6 = vpop.f32.mrf.mxu1 }
 0x72f   : > { %v8666_v26 = vadd.f32 %v3689_v6, %v3601_v25  ;;  %v3752_v25 = vadd.f32 %v3751_v22, %v8586_v8  ;;  %v3754_v6 = vadd.f32 %v3753_v45, %v8596_v43  ;;  %v9361_v22 = vld [vmem:[#allocation102_spill] sm:$0xff] }
 0x732   : > { %v3832_v50 = vpop.f32.mrf.mxu3 }
 0x733   : > { %v3833_v38 = vadd.f32 %v3832_v50, %v3744_v30  ;;  %v3763_v30 = vpop.f32.mrf.mxu2  ;;  %v9359_v50 = vld [vmem:[#allocation76_spill] sm:$0xff] }
 0x734   : > { %v3764_v23 = vadd.f32 %v3763_v30, %v8627_v63 }
 0x735   : > { %v3909_v59 = vmax.f32 %v3833_v38, 0.0  ;;  %v3614_v38 = vadd.f32 %v9359_v50, %v8471_v42  ;;  %v8712_v50 = vld [vmem:[#allocation14] ss:$0 sm:$0xff] }
 0x736   : > { %v3692_v29 = vpop.f32.mrf.mxu1 }
 0x737   : > { %v8671_v35 = vadd.f32 %v3692_v29, %v3604_v51  ;;  %3874 = vmatmul.bf16.gmra.mxu3 %v9357_v60  ;;  %v3963_v17 = vpack.c.bf16 %v3909_v59, %v3907_v44  ;;  %v9360_v60 = vld [vmem:[#allocation64_spill] sm:$0xff] }
 0x739   : > { %4235 = vmatmul.bf16.gmra.mxu1 %v3963_v17  ;;  %v3616_v17 = vadd.f32 %v9361_v22, %v8471_v42 }
 0x73a   : > { %v3835_v47 = vpop.f32.mrf.mxu3 }
 0x73b   : > { %v3836_v48 = vadd.f32 %v3835_v47, %v3747_v52  ;;  %v3766_v43 = vpop.f32.mrf.mxu2  ;;  %v3757_v47 = vadd.f32 %v3756_v32, %v8602_v12  ;;  %v3759_v52 = vadd.f32 %v3758_v28, %v8612_v9  ;;  %v3621_v12 = vadd.f32 %v8519_v53, %v8471_v42 }
 0x73c   : > { %v3762_v9 = vadd.f32 %v3761_v62, %v8618_v34  ;;  %v4130_v34 = vadd.f32 %v8712_v50, %v8540_v21  ;;  %v3767_v30 = vadd.f32 %v3766_v43, %v8633_v4  ;;  %v8720_v21 = vpop.f32.mrf.mxu0  ;;  %v4133_v4 = vadd.f32 %v8712_v50, %v8550_v58 }
 0x73d   : > { %v3911_v37 = vmax.f32 %v3836_v48, 0.0  ;;  %v4135_v43 = vadd.f32 %v8712_v50, %v8562_v0 }
 0x73e   : > { %v3694_v55 = vpop.f32.mrf.mxu1 }
 0x73f   : > { %v8677_v49 = vadd.f32 %v3694_v55, %v3606_v39 }
 0x742   : > { %v3837_v1 = vpop.f32.mrf.mxu3 }
 0x743   : > { %v3838_v46 = vadd.f32 %v3837_v1, %v3749_v27  ;;  %v9362_v1 = vld [vmem:[#allocation72_spill] sm:$0xff] }
 0x745   : > { %v3913_v16 = vmax.f32 %v3838_v46, 0.0  ;;  %v3619_v46 = vadd.f32 %v9362_v1, %v8471_v42  ;;  %v4128_v42 = vadd.f32 %v8712_v50, %v8530_v13 }
 0x746   : > { %v3697_v31 = vpop.f32.mrf.mxu1 }
 0x747   : > { %v3965_v15 = vpack.c.bf16 %v3913_v16, %v3911_v37  ;;  %v8682_v36 = vadd.f32 %v3697_v31, %v3609_v14  ;;  %3879 = vmatmul.bf16.gmra.mxu3 %v9358_v3  ;;  %v3768_v3 = vpop.f32.mrf.mxu2 }
 0x749   : > { %4240 = vmatmul.bf16.gmra.mxu1 %v3965_v15 }
 0x74a   : > { %v3840_v20 = vpop.f32.mrf.mxu3 }
 0x74b   : > { %v3841_v33 = vadd.f32 %v3840_v20, %v3752_v25 }
 0x74d   : > { %v3915_v51 = vmax.f32 %v3841_v33, 0.0 }
 0x74e   : > { %v3699_v19 = vpop.f32.mrf.mxu1 }
 0x74f   : > { %v8688_v7 = vadd.f32 %v3699_v19, %v3611_v40  ;;  %v3771_v19 = vpop.f32.mrf.mxu2 }
 0x752   : > { %v3842_v24 = vpop.f32.mrf.mxu3 }
 0x753   : > { %v3843_v54 = vadd.f32 %v3842_v24, %v3754_v6 }
 0x755   : > { %v3917_v44 = vmax.f32 %v3843_v54, 0.0 }
 0x756   : > { %v3702_v59 = vpop.f32.mrf.mxu1 }
 0x757   : > { %v3967_v2 = vpack.c.bf16 %v3917_v44, %v3915_v51  ;;  %v8693_v29 = vadd.f32 %v3702_v59, %v3614_v38  ;;  %3884 = vmatmul.bf16.gmra.mxu3 %v9360_v60  ;;  %v3773_v53 = vpop.f32.mrf.mxu2 }
 0x759   : > { %4245 = vmatmul.bf16.gmra.mxu1 %v3967_v2 }
 0x75a   : > { %v3845_v8 = vpop.f32.mrf.mxu3 }
 0x75b   : > { %v3846_v55 = vadd.f32 %v3845_v8, %v3757_v47  ;;  %v3769_v8 = vadd.f32 %v3768_v3, %v8640_v56 }
 0x75d   : > { %v3919_v14 = vmax.f32 %v3846_v55, 0.0 }
 0x75e   : > { %v3704_v45 = vpop.f32.mrf.mxu1 }
 0x75f   : > { %v8699_v39 = vadd.f32 %v3704_v45, %v3616_v17  ;;  %v3776_v13 = vpop.f32.mrf.mxu2 }
 0x762   : > { %v3847_v48 = vpop.f32.mrf.mxu3 }
 0x763   : > { %v3848_v27 = vadd.f32 %v3847_v48, %v3759_v52 }
 0x765   : > { %v3921_v37 = vmax.f32 %v3848_v27, 0.0 }
 0x766   : > { %v3707_v16 = vpop.f32.mrf.mxu1 }
 0x767   : > { %v3969_v31 = vpack.c.bf16 %v3921_v37, %v3919_v14  ;;  %v8704_v15 = vadd.f32 %v3707_v16, %v3619_v46  ;;  %v3772_v46 = vadd.f32 %v3771_v19, %v8646_v10  ;;  %v3778_v37 = vpop.f32.mrf.mxu2  ;;  %v4138_v10 = vadd.f32 %v8712_v50, %v8572_v5 }
 0x769   : > { %4250 = vmatmul.bf16.gmra.mxu1 %v3969_v31 }
 0x76a   : > { %v3850_v20 = vpop.f32.mrf.mxu3 }
 0x76b   : > { %v3851_v40 = vadd.f32 %v3850_v20, %v3762_v9  ;;  %v3774_v20 = vadd.f32 %v3773_v53, %v8653_v61  ;;  %v4140_v61 = vadd.f32 %v8712_v50, %v8584_v41 }
 0x76d   : > { %v3923_v6 = vmax.f32 %v3851_v40, 0.0 }
 0x76e   : > { %v3709_v32 = vpop.f32.mrf.mxu1 }
 0x76f   : > { %v8709_v28 = vadd.f32 %v3709_v32, %v3621_v12  ;;  %v4149_v12 = vpop.f32.mrf.mxu0 }
 0x772   : > { %v3852_v25 = vpop.f32.mrf.mxu3 }
 0x773   : > { %v3853_v33 = vadd.f32 %v3852_v25, %v3764_v23 }
 0x775   : > { %v3925_v24 = vmax.f32 %v3853_v33, 0.0  ;;  %v3781_v33 = vpop.f32.mrf.mxu2 }
 0x776   : > { %v4216_v54 = vpop.f32.mrf.mxu1 }
 0x777   : > { %v3971_v38 = vpack.c.bf16 %v3925_v24, %v3923_v6  ;;  %v4217_v62 = vadd.f32 %v4216_v54, %v4128_v42  ;;  %v8730_v19 = vpop.f32.mrf.mxu0 }
 0x779   : > { %4255 = vmatmul.bf16.gmra.mxu1 %v3971_v38  ;;  %v4296_v59 = vmax.f32 %v4217_v62, 0.0  ;;  %v3777_v38 = vadd.f32 %v3776_v13, %v8659_v57  ;;  %v3779_v62 = vadd.f32 %v3778_v37, %v8666_v26  ;;  %v4143_v57 = vadd.f32 %v8712_v50, %v8592_v18 }
 0x77a   : > { %v3855_v51 = vpop.f32.mrf.mxu3 }
 0x77b   : > { %v3856_v2 = vadd.f32 %v3855_v51, %v3767_v30 }
 0x77d   : > { %v3927_v47 = vmax.f32 %v3856_v2, 0.0 }
 0x77e   : > { %v4218_v63 = vpop.f32.mrf.mxu1 }
 0x77f   : > { %v4219_v44 = vadd.f32 %v4218_v63, %v4130_v34 }
 0x781   : > { %v4297_v60 = vmax.f32 %v4219_v44, 0.0 }
 0x782   : > { %v3857_v22 = vpop.f32.mrf.mxu3 }
 0x783   : > { %v4328_v17 = vpack.c.bf16 %v4297_v60, %v4296_v59  ;;  %v3858_v45 = vadd.f32 %v3857_v22, %v3769_v8  ;;  %v3783_v59 = vpop.f32.mrf.mxu2  ;;  %v4154_v60 = vpop.f32.mrf.mxu0 }
 0x785   : > { %v3929_v55 = vmax.f32 %v3858_v45, 0.0  ;;  %4420 = vmatmul.bf16.vlgmr.msrb.gmra.mxu2 %v4328_v17  ;;  %v4145_v17 = vadd.f32 %v8712_v50, %v8605_v11 }
 0x786   : > { %v4221_v52 = vpop.f32.mrf.mxu1 }
 0x787   : > { %v3973_v48 = vpack.c.bf16 %v3929_v55, %v3927_v47  ;;  %v4222_v56 = vadd.f32 %v4221_v52, %v4133_v4  ;;  %v3782_v55 = vadd.f32 %v3781_v33, %v8671_v35 }
 0x789   : > { %4260 = vmatmul.bf16.gmra.mxu1 %v3973_v48  ;;  %v4298_v16 = vmax.f32 %v4222_v56, 0.0 }
 0x78a   : > { %v3860_v27 = vpop.f32.mrf.mxu3 }
 0x78b   : > { %v3861_v31 = vadd.f32 %v3860_v27, %v3772_v46  ;;  %v3786_v26 = vpop.f32.mrf.mxu2  ;;  %v8741_v52 = vpop.f32.mrf.mxu0 }
 0x78d   : > { %v3931_v23 = vmax.f32 %v3861_v31, 0.0 }
 0x78e   : > { %v4223_v1 = vpop.f32.mrf.mxu1 }
 0x78f   : > { %v4224_v14 = vadd.f32 %v4223_v1, %v4135_v43  ;;  %v3784_v43 = vadd.f32 %v3783_v59, %v8677_v49  ;;  %v3787_v49 = vadd.f32 %v3786_v26, %v8682_v36  ;;  %v4153_v36 = vadd.f32 %v8712_v50, %v8730_v19 }
 0x791   : > { %v4299_v3 = vmax.f32 %v4224_v14, 0.0 }
 0x792   : > { %v3862_v32 = vpop.f32.mrf.mxu3 }
 0x793   : > { %v3863_v9 = vadd.f32 %v3862_v32, %v3774_v20  ;;  %v4329_v40 = vpack.c.bf16 %v4299_v3, %v4298_v16  ;;  %v3788_v16 = vpop.f32.mrf.mxu2  ;;  %v4159_v31 = vpop.f32.mrf.mxu0  ;;  %v4148_v3 = vadd.f32 %v8712_v50, %v8720_v21  ;;  %v4150_v20 = vadd.f32 %v8712_v50, %v4149_v12 }
 0x795   : > { %v3933_v58 = vmax.f32 %v3863_v9, 0.0  ;;  %4425 = vmatmul.bf16.gmra.mxu2 %v4329_v40 }
 0x796   : > { %v4226_v25 = vpop.f32.mrf.mxu1 }
 0x797   : > { %v3975_v0 = vpack.c.bf16 %v3933_v58, %v3931_v23  ;;  %v4227_v24 = vadd.f32 %v4226_v25, %v4138_v10 }
 0x799   : > { %4265 = vmatmul.bf16.gmra.mxu1 %v3975_v0  ;;  %v4300_v42 = vmax.f32 %v4227_v24, 0.0  ;;  %v3789_v0 = vadd.f32 %v3788_v16, %v8688_v7 }
 0x79a   : > { %v3865_v6 = vpop.f32.mrf.mxu3 }
 0x79b   : > { %v3866_v53 = vadd.f32 %v3865_v6, %v3777_v38  ;;  %v3791_v33 = vpop.f32.mrf.mxu2  ;;  %v4162_v24 = vpop.f32.mrf.mxu0 }
 0x79d   : > { %v3935_v5 = vmax.f32 %v3866_v53, 0.0  ;;  %v4155_v53 = vadd.f32 %v8712_v50, %v4154_v60 }
 0x79e   : > { %v4228_v54 = vpop.f32.mrf.mxu1 }
 0x79f   : > { %v4229_v51 = vadd.f32 %v4228_v54, %v4140_v61 }
 0x7a1   : > { %v4301_v34 = vmax.f32 %v4229_v51, 0.0 }
 0x7a2   : > { %v3867_v63 = vpop.f32.mrf.mxu3 }
 0x7a3   : > { %v3868_v30 = vadd.f32 %v3867_v63, %v3779_v62  ;;  %v4330_v44 = vpack.c.bf16 %v4301_v34, %v4300_v42  ;;  %v3793_v42 = vpop.f32.mrf.mxu2  ;;  %v4164_v7 = vpop.f32.mrf.mxu0  ;;  %v3792_v63 = vadd.f32 %v3791_v33, %v8693_v29  ;;  %v4158_v29 = vadd.f32 %v8712_v50, %v8741_v52 }
 0x7a5   : > { %v3937_v2 = vmax.f32 %v3868_v30, 0.0  ;;  %4430 = vmatmul.bf16.gmra.mxu2 %v4330_v44 }
 0x7a6   : > { %v4231_v8 = vpop.f32.mrf.mxu1 }
 0x7a7   : > { %v3977_v41 = vpack.c.bf16 %v3937_v2, %v3935_v5  ;;  %v4232_v45 = vadd.f32 %v4231_v8, %v4143_v57  ;;  %v3794_v2 = vadd.f32 %v3793_v42, %v8699_v39 }
 0x7a9   : > { %4270 = vmatmul.bf16.gmra.mxu1 %v3977_v41  ;;  %v4302_v48 = vmax.f32 %v4232_v45, 0.0 }
 0x7aa   : > { %v3870_v22 = vpop.f32.mrf.mxu3 }
 0x7ab   : > { %v3871_v27 = vadd.f32 %v3870_v22, %v3782_v55  ;;  %v3796_v19 = vpop.f32.mrf.mxu2  ;;  %v4167_v26 = vpop.f32.mrf.mxu0  ;;  %v4160_v55 = vadd.f32 %v8712_v50, %v4159_v31 }
 0x7ac   : > { %v3797_v39 = vadd.f32 %v3796_v19, %v8704_v15 }
 0x7ad   : > { %v3939_v18 = vmax.f32 %v3871_v27, 0.0 }
 0x7ae   : > { %v4233_v47 = vpop.f32.mrf.mxu1 }
 0x7af   : > { %v4234_v13 = vadd.f32 %v4233_v47, %v4145_v17 }
 0x7b1   : > { %v4303_v4 = vmax.f32 %v4234_v13, 0.0 }
 0x7b2   : > { %v3872_v56 = vpop.f32.mrf.mxu3 }
 0x7b3   : > { %v4331_v1 = vpack.c.bf16 %v4303_v4, %v4302_v48  ;;  %v3873_v46 = vadd.f32 %v3872_v56, %v3784_v43  ;;  %v3798_v4 = vpop.f32.mrf.mxu2 }
 0x7b5   : > { %v3941_v14 = vmax.f32 %v3873_v46, 0.0  ;;  %4435 = vmatmul.bf16.gmra.mxu2 %v4331_v1  ;;  %v3799_v46 = vadd.f32 %v3798_v4, %v8709_v28 }
 0x7b6   : > { %v4236_v11 = vpop.f32.mrf.mxu1 }
 0x7b7   : > { %v3979_v37 = vpack.c.bf16 %v3941_v14, %v3939_v18  ;;  %v4237_v32 = vadd.f32 %v4236_v11, %v4148_v3  ;;  %v4169_v18 = vpop.f32.mrf.mxu0  ;;  %v4163_v3 = vadd.f32 %v8712_v50, %v4162_v24 }
 0x7b8   : > { %v4170_v33 = vadd.f32 %v8712_v50, %v4169_v18 }
 0x7b9   : > { %4275 = vmatmul.bf16.gmra.mxu1 %v3979_v37  ;;  %v4304_v23 = vmax.f32 %v4237_v32, 0.0 }
 0x7ba   : > { %v3875_v35 = vpop.f32.mrf.mxu3 }
 0x7bb   : > { %v3876_v58 = vadd.f32 %v3875_v35, %v3787_v49 }
 0x7bd   : > { %v3943_v54 = vmax.f32 %v3876_v58, 0.0 }
 0x7be   : > { %v4238_v9 = vpop.f32.mrf.mxu1 }
 0x7bf   : > { %v4239_v40 = vadd.f32 %v4238_v9, %v4150_v20  ;;  %v4172_v15 = vpop.f32.mrf.mxu0  ;;  %v4165_v20 = vadd.f32 %v8712_v50, %v4164_v7 }
 0x7c1   : > { %v4305_v25 = vmax.f32 %v4239_v40, 0.0 }
 0x7c2   : > { %v3877_v6 = vpop.f32.mrf.mxu3 }
 0x7c3   : > { %v4332_v10 = vpack.c.bf16 %v4305_v25, %v4304_v23  ;;  %v3878_v61 = vadd.f32 %v3877_v6, %v3789_v0  ;;  %v4168_v0 = vadd.f32 %v8712_v50, %v4167_v26 }
 0x7c5   : > { %v3945_v38 = vmax.f32 %v3878_v61, 0.0  ;;  %4440 = vmatmul.bf16.gmra.mxu2 %v4332_v10 }
 0x7c6   : > { %v4241_v21 = vpop.f32.mrf.mxu1 }
 0x7c7   : > { %v3981_v12 = vpack.c.bf16 %v3945_v38, %v3943_v54  ;;  %v4242_v34 = vadd.f32 %v4241_v21, %v4153_v36  ;;  %v4174_v58 = vpop.f32.mrf.mxu0 }
 0x7c8   : > { %v4175_v7 = vadd.f32 %v8712_v50, %v4174_v58 }
 0x7c9   : > { %4280 = vmatmul.bf16.gmra.mxu1 %v3981_v12  ;;  %v4306_v44 = vmax.f32 %v4242_v34, 0.0  ;;  %v8769_v12 = vld [vmem:[%s8899_s14] ss:$0 sm:$0xff]  ;;  %v4173_v34 = vadd.f32 %v8712_v50, %v4172_v15 }
 0x7ca   : > { %v3880_v51 = vpop.f32.mrf.mxu3 }
 0x7cb   : > { %v3881_v59 = vadd.f32 %v3880_v51, %v3792_v63 }
 0x7cd   : > { %v3947_v57 = vmax.f32 %v3881_v59, 0.0 }
 0x7ce   : > { %v4243_v62 = vpop.f32.mrf.mxu1 }
 0x7cf   : > { %v4244_v30 = vadd.f32 %v4243_v62, %v4155_v53  ;;  %v4177_v24 = vpop.f32.mrf.mxu0 }
 0x7d0   : > { %v4178_v19 = vadd.f32 %v8712_v50, %v4177_v24 }
 0x7d1   : > { %v4307_v5 = vmax.f32 %v4244_v30, 0.0 }
 0x7d2   : > { %v3882_v8 = vpop.f32.mrf.mxu3 }
 0x7d3   : > { %v4333_v41 = vpack.c.bf16 %v4307_v5, %v4306_v44  ;;  %v3883_v22 = vadd.f32 %v3882_v8, %v3794_v2 }
 0x7d5   : > { %v3949_v17 = vmax.f32 %v3883_v22, 0.0  ;;  %4445 = vmatmul.bf16.gmra.mxu2 %v4333_v41 }
 0x7d6   : > { %v4246_v45 = vpop.f32.mrf.mxu1 }
 0x7d7   : > { %v3983_v60 = vpack.c.bf16 %v3949_v17, %v3947_v57  ;;  %v4247_v13 = vadd.f32 %v4246_v45, %v4158_v29  ;;  %v4179_v53 = vpop.f32.mrf.mxu0 }
 0x7d8   : > { %v4180_v45 = vadd.f32 %v8712_v50, %v4179_v53 }
 0x7d9   : > { %4285 = vmatmul.bf16.gmra.mxu1 %v3983_v60  ;;  %v4308_v43 = vmax.f32 %v4247_v13, 0.0 }
 0x7da   : > { %v3885_v47 = vpop.f32.mrf.mxu3 }
 0x7db   : > { %v3886_v56 = vadd.f32 %v3885_v47, %v3797_v39 }
 0x7dd   : > { %v3951_v16 = vmax.f32 %v3886_v56, 0.0 }
 0x7de   : > { %v4248_v48 = vpop.f32.mrf.mxu1 }
 0x7df   : > { %v4249_v27 = vadd.f32 %v4248_v48, %v4160_v55  ;;  %v4182_v41 = vpop.f32.mrf.mxu0 }
 0x7e1   : > { %v4309_v1 = vmax.f32 %v4249_v27, 0.0 }
 0x7e2   : > { %v3887_v14 = vpop.f32.mrf.mxu3 }
 0x7e3   : > { %v4334_v11 = vpack.c.bf16 %v4309_v1, %v4308_v43  ;;  %v3888_v37 = vadd.f32 %v3887_v14, %v3799_v46  ;;  %v4183_v46 = vadd.f32 %v8712_v50, %v4182_v41 }
 0x7e5   : > { %v3953_v35 = vmax.f32 %v3888_v37, 0.0  ;;  %4450 = vmatmul.bf16.gmra.mxu2 %v4334_v11 }
 0x7e6   : > { %v4251_v52 = vpop.f32.mrf.mxu1 }
 0x7e7   : > { %v3985_v31 = vpack.c.bf16 %v3953_v35, %v3951_v16  ;;  %v4252_v32 = vadd.f32 %v4251_v52, %v4163_v3  ;;  %v4184_v26 = vpop.f32.mrf.mxu0 }
 0x7e8   : > { %v4185_v18 = vadd.f32 %v8712_v50, %v4184_v26 }
 0x7e9   : > { %4290 = vmatmul.bf16.vlgmr.msra.gmra.mxu3 %v3985_v31  ;;  %v4310_v28 = vmax.f32 %v4252_v32, 0.0 }
 0x7ee   : > { %v4253_v9 = vpop.f32.mrf.mxu1 }
 0x7ef   : > { %v4254_v49 = vadd.f32 %v4253_v9, %v4165_v20  ;;  %v4187_v43 = vpop.f32.mrf.mxu0 }
 0x7f1   : > { %v4311_v40 = vmax.f32 %v4254_v49, 0.0  ;;  %v4188_v49 = vadd.f32 %v8712_v50, %v4187_v43 }
 0x7f3   : > { %v4335_v23 = vpack.c.bf16 %v4311_v40, %v4310_v28 }
 0x7f5   : > { %4455 = vmatmul.bf16.gmra.mxu2 %v4335_v23 }
 0x7f6   : > { %v4256_v25 = vpop.f32.mrf.mxu1 }
 0x7f7   : > { %v4257_v6 = vadd.f32 %v4256_v25, %v4168_v0  ;;  %v4189_v3 = vpop.f32.mrf.mxu0 }
 0x7f8   : > { %v4190_v40 = vadd.f32 %v8712_v50, %v4189_v3 }
 0x7f9   : > { %v4312_v54 = vmax.f32 %v4257_v6, 0.0 }
 0x7fe   : > { %v4258_v10 = vpop.f32.mrf.mxu1 }
 0x7ff   : > { %v4259_v61 = vadd.f32 %v4258_v10, %v4170_v33  ;;  %v4192_v28 = vpop.f32.mrf.mxu0 }
 0x801   : > { %v4313_v38 = vmax.f32 %v4259_v61, 0.0 }
 0x803   : > { %v4336_v21 = vpack.c.bf16 %v4313_v38, %v4312_v54 }
 0x805   : > { %4460 = vmatmul.bf16.gmra.mxu2 %v4336_v21 }
 0x806   : > { %v4261_v51 = vpop.f32.mrf.mxu1 }
 0x807   : > { %v4262_v62 = vadd.f32 %v4261_v51, %v4173_v34  ;;  %v4194_v24 = vpop.f32.mrf.mxu0  ;;  %v4193_v51 = vadd.f32 %v8712_v50, %v4192_v28 }
 0x808   : > { %v4421_v36 = vpop.f32.mrf.mxu2 }
 0x809   : > { %v4422_v42 = vadd.f32 %v8769_v12, %v4421_v36  ;;  %v4314_v59 = vmax.f32 %v4262_v62, 0.0  ;;  %v4195_v36 = vadd.f32 %v8712_v50, %v4194_v24 }
 0x80b   : > { %4501 = vst [vmem:[%s8773_s21] sm:$0xff] %v4422_v42 }
 0x80e   : > { %v4263_v63 = vpop.f32.mrf.mxu1 }
 0x80f   : > { %v4264_v30 = vadd.f32 %v4263_v63, %v4175_v7  ;;  %v4197_v7 = vpop.f32.mrf.mxu0 }
 0x810   : > { %v4423_v44 = vpop.f32.mrf.mxu2 }
 0x811   : > { %v4315_v5 = vmax.f32 %v4264_v30, 0.0  ;;  %v4424_v2 = vadd.f32 %v8769_v12, %v4423_v44 }
 0x813   : > { %v4337_v8 = vpack.c.bf16 %v4315_v5, %v4314_v59  ;;  %4502 = vst [vmem:[%s8773_s21 + $0x8] sm:$0xff] %v4424_v2 }
 0x815   : > { %4465 = vmatmul.bf16.gmra.mxu2 %v4337_v8 }
 0x816   : > { %v4266_v22 = vpop.f32.mrf.mxu1 }
 0x817   : > { %v4267_v60 = vadd.f32 %v4266_v22, %v4178_v19  ;;  %v4199_v41 = vpop.f32.mrf.mxu0  ;;  %v4198_v22 = vadd.f32 %v8712_v50, %v4197_v7 }
 0x818   : > { %v4426_v57 = vpop.f32.mrf.mxu2 }
 0x819   : > { %v4427_v17 = vadd.f32 %v8769_v12, %v4426_v57  ;;  %v4316_v13 = vmax.f32 %v4267_v60, 0.0  ;;  %v4200_v57 = vadd.f32 %v8712_v50, %v4199_v41 }
 0x81b   : > { %4503 = vst [vmem:[%s8773_s21 + $0x10] sm:$0xff] %v4427_v17 }
 0x81e   : > { %v4268_v47 = vpop.f32.mrf.mxu1 }
 0x81f   : > { %v4269_v29 = vadd.f32 %v4268_v47, %v4180_v45 }
 0x820   : > { %v4428_v55 = vpop.f32.mrf.mxu2 }
 0x821   : > { %v4317_v48 = vmax.f32 %v4269_v29, 0.0  ;;  %v4429_v39 = vadd.f32 %v8769_v12, %v4428_v55 }
 0x823   : > { %v4338_v27 = vpack.c.bf16 %v4317_v48, %v4316_v13  ;;  %4504 = vst [vmem:[%s8773_s21 + $0x18] sm:$0xff] %v4429_v39  ;;  %v4202_v13 = vpop.f32.mrf.mxu0 }
 0x825   : > { %4470 = vmatmul.bf16.gmra.mxu2 %v4338_v27 }
 0x826   : > { %v4271_v4 = vpop.f32.mrf.mxu1 }
 0x827   : > { %v4272_v14 = vadd.f32 %v4271_v4, %v4183_v46 }
 0x828   : > { %v4431_v56 = vpop.f32.mrf.mxu2 }
 0x829   : > { %v4432_v1 = vadd.f32 %v8769_v12, %v4431_v56  ;;  %v4318_v35 = vmax.f32 %v4272_v14, 0.0  ;;  %v4203_v56 = vadd.f32 %v8712_v50, %v4202_v13 }
 0x82b   : > { %4505 = vst [vmem:[%s8773_s21 + $0x20] sm:$0xff] %v4432_v1  ;;  %v4204_v4 = vpop.f32.mrf.mxu0 }
 0x82c   : > { %v4205_v46 = vadd.f32 %v8712_v50, %v4204_v4 }
 0x82e   : > { %v4273_v11 = vpop.f32.mrf.mxu1 }
 0x82f   : > { %v4274_v37 = vadd.f32 %v4273_v11, %v4185_v18 }
 0x830   : > { %v4433_v16 = vpop.f32.mrf.mxu2 }
 0x831   : > { %v4319_v52 = vmax.f32 %v4274_v37, 0.0  ;;  %v4434_v31 = vadd.f32 %v8769_v12, %v4433_v16 }
 0x833   : > { %v4339_v15 = vpack.c.bf16 %v4319_v52, %v4318_v35  ;;  %4506 = vst [vmem:[%s8773_s21 + $0x28] sm:$0xff] %v4434_v31 }
 0x835   : > { %4475 = vmatmul.bf16.gmra.mxu2 %v4339_v15 }
 0x836   : > { %v4276_v20 = vpop.f32.mrf.mxu1 }
 0x837   : > { %v4277_v23 = vadd.f32 %v4276_v20, %v4188_v49 }
 0x838   : > { %v4436_v32 = vpop.f32.mrf.mxu2 }
 0x839   : > { %v4437_v9 = vadd.f32 %v8769_v12, %v4436_v32  ;;  %v4320_v33 = vmax.f32 %v4277_v23, 0.0 }
 0x83b   : > { %4507 = vst [vmem:[%s8773_s21 + $0x30] sm:$0xff] %v4437_v9 }
 0x83e   : > { %v4278_v58 = vpop.f32.mrf.mxu1 }
 0x83f   : > { %v4279_v25 = vadd.f32 %v4278_v58, %v4190_v40 }
 0x840   : > { %v4438_v0 = vpop.f32.mrf.mxu2 }
 0x841   : > { %v4321_v6 = vmax.f32 %v4279_v25, 0.0  ;;  %v4439_v10 = vadd.f32 %v8769_v12, %v4438_v0 }
 0x843   : > { %v4340_v61 = vpack.c.bf16 %v4321_v6, %v4320_v33  ;;  %4508 = vst [vmem:[%s8773_s21 + $0x38] sm:$0xff] %v4439_v10 }
 0x845   : > { %4480 = vmatmul.bf16.gmra.mxu2 %v4340_v61 }
 0x846   : > { %v4281_v54 = vpop.f32.mrf.mxu1 }
 0x847   : > { %v4282_v42 = vadd.f32 %v4281_v54, %v4193_v51 }
 0x848   : > { %v4441_v38 = vpop.f32.mrf.mxu2 }
 0x849   : > { %v4442_v21 = vadd.f32 %v8769_v12, %v4441_v38  ;;  %v4322_v63 = vmax.f32 %v4282_v42, 0.0 }
 0x84b   : > { %4509 = vst [vmem:[%s8773_s21 + $0x40] sm:$0xff] %v4442_v21 }
 0x84e   : > { %v4283_v53 = vpop.f32.mrf.mxu1 }
 0x84f   : > { %v4284_v34 = vadd.f32 %v4283_v53, %v4195_v36 }
 0x850   : > { %v4443_v62 = vpop.f32.mrf.mxu2 }
 0x851   : > { %v4323_v30 = vmax.f32 %v4284_v34, 0.0  ;;  %v4444_v44 = vadd.f32 %v8769_v12, %v4443_v62 }
 0x853   : > { %v4341_v59 = vpack.c.bf16 %v4323_v30, %v4322_v63  ;;  %4510 = vst [vmem:[%s8773_s21 + $0x48] sm:$0xff] %v4444_v44 }
 0x855   : > { %4485 = vmatmul.bf16.gmra.mxu2 %v4341_v59 }
 0x856   : > { %v4286_v5 = vpop.f32.mrf.mxu1 }
 0x857   : > { %v4287_v17 = vadd.f32 %v4286_v5, %v4198_v22 }
 0x858   : > { %v4446_v2 = vpop.f32.mrf.mxu2 }
 0x859   : > { %v4447_v8 = vadd.f32 %v8769_v12, %v4446_v2  ;;  %v4324_v26 = vmax.f32 %v4287_v17, 0.0 }
 0x85b   : > { %4511 = vst [vmem:[%s8773_s21 + $0x50] sm:$0xff] %v4447_v8 }
 0x85e   : > { %v4288_v19 = vpop.f32.mrf.mxu1 }
 0x85f   : > { %v4289_v45 = vadd.f32 %v4288_v19, %v4200_v57 }
 0x860   : > { %v4448_v60 = vpop.f32.mrf.mxu2 }
 0x861   : > { %v4325_v47 = vmax.f32 %v4289_v45, 0.0  ;;  %v4449_v29 = vadd.f32 %v8769_v12, %v4448_v60 }
 0x863   : > { %v4342_v55 = vpack.c.bf16 %v4325_v47, %v4324_v26  ;;  %4512 = vst [vmem:[%s8773_s21 + $0x58] sm:$0xff] %v4449_v29 }
 0x865   : > { %4490 = vmatmul.bf16.gmra.mxu2 %v4342_v55 }
 0x868   : > { %v4451_v48 = vpop.f32.mrf.mxu2 }
 0x869   : > { %v4452_v39 = vadd.f32 %v8769_v12, %v4451_v48 }
 0x86b   : > { %4513 = vst [vmem:[%s8773_s21 + $0x60] sm:$0xff] %v4452_v39 }
 0x86c   : > { %v4291_v27 = vpop.f32.mrf.mxu3 }
 0x86d   : > { %v4292_v18 = vadd.f32 %v4291_v27, %v4203_v56 }
 0x86f   : > { %v4326_v37 = vmax.f32 %v4292_v18, 0.0 }
 0x870   : > { %v4453_v43 = vpop.f32.mrf.mxu2 }
 0x871   : > { %v4454_v1 = vadd.f32 %v8769_v12, %v4453_v43 }
 0x873   : > { %4514 = vst [vmem:[%s8773_s21 + $0x68] sm:$0xff] %v4454_v1 }
 0x874   : > { %v4293_v14 = vpop.f32.mrf.mxu3 }
 0x875   : > { %v4294_v11 = vadd.f32 %v4293_v14, %v4205_v46 }
 0x877   : > { %v4327_v16 = vmax.f32 %v4294_v11, 0.0 }
 0x878   : > { %v4456_v35 = vpop.f32.mrf.mxu2 }
 0x879   : > { %v4343_v52 = vpack.c.bf16 %v4327_v16, %v4326_v37  ;;  %v4457_v31 = vadd.f32 %v8769_v12, %v4456_v35 }
 0x87b   : > { %4515 = vst [vmem:[%s8773_s21 + $0x70] sm:$0xff] %v4457_v31  ;;  %4495 = vmatmul.bf16.gmra.mxu2 %v4343_v52 }
 0x880   : > { %v4458_v3 = vpop.f32.mrf.mxu2 }
 0x881   : > { %v4459_v15 = vadd.f32 %v8769_v12, %v4458_v3 }
 0x883   : > { %4516 = vst [vmem:[%s8773_s21 + $0x78] sm:$0xff] %v4459_v15 }
 0x888   : > { %v4461_v50 = vpop.f32.mrf.mxu2 }
 0x889   : > { %v4462_v20 = vadd.f32 %v8769_v12, %v4461_v50 }
 0x88b   : > { %4517 = vst [vmem:[%s8773_s21 + $0x80] sm:$0xff] %v4462_v20 }
 0x890   : > { %v4463_v32 = vpop.f32.mrf.mxu2 }
 0x891   : > { %v4464_v9 = vadd.f32 %v8769_v12, %v4463_v32 }
 0x893   : > { %4518 = vst [vmem:[%s8773_s21 + $0x88] sm:$0xff] %v4464_v9 }
 0x898   : > { %v4466_v49 = vpop.f32.mrf.mxu2 }
 0x899   : > { %v4467_v28 = vadd.f32 %v8769_v12, %v4466_v49 }
 0x89b   : > { %4519 = vst [vmem:[%s8773_s21 + $0x90] sm:$0xff] %v4467_v28 }
 0x8a0   : > { %v4468_v40 = vpop.f32.mrf.mxu2 }
 0x8a1   : > { %v4469_v23 = vadd.f32 %v8769_v12, %v4468_v40 }
 0x8a3   : > { %4520 = vst [vmem:[%s8773_s21 + $0x98] sm:$0xff] %v4469_v23 }
 0x8a8   : > { %v4471_v58 = vpop.f32.mrf.mxu2 }
 0x8a9   : > { %v4472_v25 = vadd.f32 %v8769_v12, %v4471_v58 }
 0x8ab   : > { %4521 = vst [vmem:[%s8773_s21 + $0xa0] sm:$0xff] %v4472_v25 }
 0x8b0   : > { %v4473_v0 = vpop.f32.mrf.mxu2 }
 0x8b1   : > { %v4474_v33 = vadd.f32 %v8769_v12, %v4473_v0 }
 0x8b3   : > { %4522 = vst [vmem:[%s8773_s21 + $0xa8] sm:$0xff] %v4474_v33 }
 0x8b8   : > { %v4476_v6 = vpop.f32.mrf.mxu2 }
 0x8b9   : > { %v4477_v10 = vadd.f32 %v8769_v12, %v4476_v6 }
 0x8bb   : > { %4523 = vst [vmem:[%s8773_s21 + $0xb0] sm:$0xff] %v4477_v10 }
 0x8c0   : > { %v4478_v61 = vpop.f32.mrf.mxu2 }
 0x8c1   : > { %v4479_v24 = vadd.f32 %v8769_v12, %v4478_v61 }
 0x8c3   : > { %4524 = vst [vmem:[%s8773_s21 + $0xb8] sm:$0xff] %v4479_v24 }
 0x8c8   : > { %v4481_v54 = vpop.f32.mrf.mxu2 }
 0x8c9   : > { %v4482_v38 = vadd.f32 %v8769_v12, %v4481_v54 }
 0x8cb   : > { %4525 = vst [vmem:[%s8773_s21 + $0xc0] sm:$0xff] %v4482_v38 }
 0x8d0   : > { %v4483_v21 = vpop.f32.mrf.mxu2 }
 0x8d1   : > { %v4484_v51 = vadd.f32 %v8769_v12, %v4483_v21 }
 0x8d3   : > { %4526 = vst [vmem:[%s8773_s21 + $0xc8] sm:$0xff] %v4484_v51 }
 0x8d8   : > { %v4486_v36 = vpop.f32.mrf.mxu2 }
 0x8d9   : > { %v4487_v42 = vadd.f32 %v8769_v12, %v4486_v36 }
 0x8db   : > { %4527 = vst [vmem:[%s8773_s21 + $0xd0] sm:$0xff] %v4487_v42 }
 0x8e0   : > { %v4488_v53 = vpop.f32.mrf.mxu2 }
 0x8e1   : > { %v4489_v34 = vadd.f32 %v8769_v12, %v4488_v53 }
 0x8e3   : > { %4528 = vst [vmem:[%s8773_s21 + $0xd8] sm:$0xff] %v4489_v34 }
 0x8e8   : > { %v4491_v7 = vpop.f32.mrf.mxu2 }
 0x8e9   : > { %v4492_v62 = vadd.f32 %v8769_v12, %v4491_v7 }
 0x8eb   : > { %4529 = vst [vmem:[%s8773_s21 + $0xe0] sm:$0xff] %v4492_v62 }
 0x8f0   : > { %v4493_v63 = vpop.f32.mrf.mxu2 }
 0x8f1   : > { %v4494_v30 = vadd.f32 %v8769_v12, %v4493_v63 }
 0x8f3   : > { %4530 = vst [vmem:[%s8773_s21 + $0xe8] sm:$0xff] %v4494_v30 }
 0x8fe   : > { %v4496_v44 = vpop.f32.mrf.mxu2 }
 0x8ff   : > { %v4497_v59 = vadd.f32 %v8769_v12, %v4496_v44 }
 0x901   : > { %4531 = vst [vmem:[%s8773_s21 + $0xf0] sm:$0xff] %v4497_v59 }
 0x906   : > { %v4498_v5 = vpop.f32.mrf.mxu2 }
 0x907   : > { %v4499_v2 = vadd.f32 %v8769_v12, %v4498_v5 }
 0x909   : > { %4532 = vst [vmem:[%s8773_s21 + $0xf8] sm:$0xff] %v4499_v2 }
 0x90a   : > { %6092 = shalt.err (!%p6089_p8)
}
 0x90b   : > { %s6162_s17 = smov 128   ;;  %s6163_s24 = smov 8  }
 0x90c   : > { %5690 = dma.vmem_to_hbm [thread:$0]  (%p6282_p5), %s4547_s15, 4096, %s4549_s1, %s4534_s3, %s6162_s17, %s6162_s17, %s6163_s24  }
 0x90d PF: > { %s9364_s23 = sld [smem:[#allocation26_spill]] }
 0x90e   : > { %s9365_s26 = sld [smem:[#allocation24_spill]] }
 0x913   : > { %p5742_p9 = scmp.ge.s32.totalorder %s9364_s23, 2 }
 0x914   : > { %s4563_s25 = sand.u32 1, %s9365_s26  }
 0x915   : > { %p5721_p10 = pnand %p5742_p9, %p6286_p6  ;;  %s4564_s10 = scalar_lea.sflag [#allocation4], %s4563_s25 }
 0x917   : > { %p5722_p11 = pneg %p5721_p10 }
 0x919   : > { %6130 = dma.done.wait (%p5722_p11), %s4564_s10, 4096  }
 0x91a   : > { %6132 = vsyncadd (%p5722_p11), %s4564_s10, 4294963200  ;;  %s9367_s21 = sld [smem:[#allocation27_spill]]  ;;  %s9370_s18 = smov %s6139_s19 }
 0x91b   : > { %s9368_s16 = sld [smem:[#allocation25_spill]] }
 0x91c   : > { %s9369_s20 = sld [smem:[#allocation28_spill]] }
 0x920   : > { %p30_p12 = scmp.ge.s32.totalorder %s9367_s21, 4  }
 0x921   : > { %s9371_s19 = smov %s9368_s16 }
 0x922   :  { %32 = sbr.rel (!%p30_p12) target bundleno = 16 (0x10), region = 152 }
 0x927   :  { %4570 = vsyncpa [#allocation3], 1 }
 0x928   :  { %4572 = vsyncpa [#allocation3 + $0x1], 1 }
 0x929   :  { %4573 = vsyncpa [#allocation6], 1 }
 0x92a   :  { %4574 = vsyncpa [#allocation9], 1 }
 0x92b   :  { %4575 = vsyncpa [#allocation12], 1 }
 0x92c   :  { %4576 = vsyncpa [#allocation15], 1 }
 0x92d   :  { %4577 = vsyncpa [#allocation4], 1 }
 0x92e   :  { %4579 = vsyncpa [#allocation4 + $0x1], 1 }

</bundles_post_ra>
